<compile_context>
chip_gen: v6e
topology: v6e:2x2x1
jax: 0.10.0
libtpu: 0.0.40
codegen_flags: <defaults>
</compile_context>

<pallas_src>
import functools

import jax
import jax.numpy as jnp
import numpy as np
from jax.experimental import pallas as pl
from jax.experimental.pallas import tpu as pltpu


def _round_up(x, m):
    return ((x + m - 1) // m) * m


def _floor_tile(x, m=128):
    return max(m, (x // m) * m)


def _vmem_budget_bytes():
    """Generation-aware VMEM budget (leave ~20% headroom for the pipeline)."""
    try:
        cap = int(pltpu.get_tpu_info().vmem_capacity_bytes)
    except Exception:
        cap = 64 << 20          # conservative (v7x-sized) fallback
    return int(cap * 0.8)


# --------------------------------------------------------------------------
# Stride-1 streaming path: implicit GEMM, taps sliced out of one VMEM slab.
# --------------------------------------------------------------------------
def _conv_stream_s1(x, w_scaled, bias, *, N, H, W, C1, C2, k, p, d, act,
                    compute_dtype, out_dtype, tm=1024, tn=1024):
    Hp, Wp = H + 2 * p, W + 2 * p
    H_out, W_out = Hp - d * (k - 1), Wp - d * (k - 1)
    kk = k * k
    C1p = _round_up(C1, 128)
    halo = (k - 1) * d * Wp + (k - 1) * d       # largest tap row offset

    in_b = jnp.dtype(compute_dtype).itemsize
    out_b = jnp.dtype(out_dtype).itemsize

    # ---- tile selection (lane-dense, VMEM-budget aware, 2-TC friendly) ----
    M_over = N * Hp * Wp                        # over-computed rows (junk sliced off)
    tn = min(tn, _round_up(C2, 128))
    tm = min(tm, _round_up(M_over, 128))

    budget = _vmem_budget_bytes()

    def est(tm_, tn_):
        slab = _round_up(tm_ + halo, 8) * C1p * in_b     # activation slab scratch
        wbuf = 2 * kk * C1p * tn_ * in_b                 # dbl-buffered weight block
        obuf = 2 * tm_ * tn_ * out_b                     # dbl-buffered output block
        return slab + wbuf + obuf + tm_ * tn_ * 4 + 4 * tn_ * 4  # + f32 acc + bias

    while est(tm, tn) > budget:
        if tn > 128:
            tn = _floor_tile(tn // 2)
        elif tm > 128:
            tm = _floor_tile(tm // 2)
        else:
            break

    C2p = _round_up(C2, tn)
    Mp = _round_up(M_over, tm)
    # v7x has 2 TensorCores: keep at least one parallel grid axis >= 2.
    if Mp // tm == 1 and C2p // tn == 1 and M_over > 256:
        tm = _round_up(-(-M_over // 2), 128)
        Mp = _round_up(M_over, tm)

    slab_rows = _round_up(tm + halo, 8)
    rows_total = Mp + (slab_rows - tm)
    grid = (Mp // tm, C2p // tn)

    # ---- data prep: spatial+channel pad, flatten rows; tap-major weights ----
    xp = jnp.pad(x.astype(compute_dtype),
                 ((0, 0), (p, p), (p, p), (0, C1p - C1)))
    x_flat = xp.reshape(N * Hp * Wp, C1p)
    x_flat = jnp.pad(x_flat, ((0, rows_total - M_over), (0, 0)))

    # (C2, C1, k, k) -> (k*k, C1p, C2p); BN scale already folded (fp32).
    w_taps = jnp.transpose(w_scaled, (2, 3, 1, 0)).reshape(kk, C1, C2)
    w_taps = jnp.pad(w_taps, ((0, 0), (0, C1p - C1), (0, C2p - C2)))
    w_taps = w_taps.astype(compute_dtype)
    bias_p = jnp.pad(bias, (0, C2p - C2)).reshape(1, C2p)

    tap_off = [(t // k) * d * Wp + (t % k) * d for t in range(kk)]

    def kernel(x_hbm, w_ref, bias_ref, o_ref, slab_ref, acc_ref, sem_ref):
        i = pl.program_id(0)
        row0 = pl.multiple_of(i * tm, 8)
        # One slab DMA per M-tile instead of a k^2-inflated im2col stream.
        cp = pltpu.make_async_copy(x_hbm.at[pl.ds(row0, slab_rows), :],
                                   slab_ref, sem_ref)
        cp.start()
        cp.wait()
        # TODO(synk): the slab DMA is exposed (no cross-step prefetch); a
        # double-buffered slab with next-step prediction could hide it.
        for t in range(kk):
            part = jnp.dot(slab_ref[pl.ds(tap_off[t], tm), :], w_ref[t],
                           preferred_element_type=jnp.float32)
            if t == 0:
                acc_ref[...] = part
            else:
                acc_ref[...] += part
        y = acc_ref[...] + bias_ref[...]          # folded BN + conv bias
        if act:
            y = jnp.maximum(y, 0.1 * y)           # LeakyReLU(0.1)
        o_ref[...] = y.astype(o_ref.dtype)

    flops = 2 * Mp * C2p * kk * C1p
    bytes_accessed = (rows_total * C1p * in_b + kk * C1p * C2p * in_b
                      + C2p * 4 + Mp * C2p * out_b)
    vmem_limit = int(min(budget, est(tm, tn) + (16 << 20)))

    out = pl.pallas_call(
        kernel,
        out_shape=jax.ShapeDtypeStruct((Mp, C2p), out_dtype),
        grid_spec=pltpu.PrefetchScalarGridSpec(
            num_scalar_prefetch=0,
            grid=grid,
            in_specs=[
                pl.BlockSpec(memory_space=pl.ANY),                    # activation rows (HBM)
                pl.BlockSpec((kk, C1p, tn), lambda i, j: (0, 0, j)),  # folded weights
                pl.BlockSpec((1, tn), lambda i, j: (0, j)),           # folded bias
            ],
            out_specs=pl.BlockSpec((tm, tn), lambda i, j: (i, j)),
            scratch_shapes=[
                pltpu.VMEM((slab_rows, C1p), compute_dtype),
                pltpu.VMEM((tm, tn), jnp.float32),
                pltpu.SemaphoreType.DMA(()),
            ]),
        compiler_params=pltpu.CompilerParams(
            dimension_semantics=("parallel", "parallel"),
            vmem_limit_bytes=vmem_limit),
        cost_estimate=pl.CostEstimate(flops=flops, transcendentals=0,
                                      bytes_accessed=bytes_accessed),
    )(x_flat, w_taps, bias_p)

    out = out[:M_over, :C2].reshape(N, Hp, Wp, C2)
    return out[:, :H_out, :W_out, :]


# --------------------------------------------------------------------------
# im2col GEMM fallback (strided / configs the streaming path does not cover).
# --------------------------------------------------------------------------
def _im2col_gemm_kernel(a_ref, w_ref, bias_ref, o_ref, acc_ref, *, act):
    kstep = pl.program_id(2)

    @pl.when(kstep == 0)
    def _():
        acc_ref[...] = jnp.zeros_like(acc_ref)

    acc_ref[...] += jnp.dot(a_ref[...], w_ref[...],
                            preferred_element_type=jnp.float32)

    @pl.when(kstep == pl.num_programs(2) - 1)
    def _():
        y = acc_ref[...] + bias_ref[...]          # folded BN + conv bias
        if act:
            y = jnp.maximum(y, 0.1 * y)           # LeakyReLU(0.1)
        o_ref[...] = y.astype(o_ref.dtype)


def _conv_im2col(x, w_scaled, bias, *, N, H, W, C1, C2, k, s, p, d, act,
                 compute_dtype, out_dtype, H_out, W_out,
                 tm=1024, tn=512, tk=1024):
    xp = jnp.pad(x.astype(compute_dtype), ((0, 0), (p, p), (p, p), (0, 0)))
    patches = []
    for kh in range(k):
        for kw in range(k):
            h0, w0 = kh * d, kw * d
            patches.append(xp[:, h0:h0 + s * H_out:s, w0:w0 + s * W_out:s, :])
    A = jnp.concatenate(patches, axis=-1).reshape(N * H_out * W_out, k * k * C1)

    Wm = jnp.transpose(w_scaled, (2, 3, 1, 0)).reshape(k * k * C1, C2)
    Wm = Wm.astype(compute_dtype)

    M, Kdim = A.shape
    in_b = jnp.dtype(compute_dtype).itemsize
    out_b = jnp.dtype(out_dtype).itemsize

    tn = min(tn, _round_up(C2, 128))
    tk = min(tk, _round_up(Kdim, 128))
    tm = min(tm, _round_up(M, 128))

    budget = _vmem_budget_bytes()

    def est(tm_, tn_, tk_):
        return (2 * (tm_ * tk_ + tk_ * tn_) * in_b + 2 * tm_ * tn_ * out_b
                + tm_ * tn_ * 4 + 4 * tn_ * 4)

    while est(tm, tn, tk) > budget:
        if tk > 256:
            tk = _floor_tile(tk // 2)
        elif tn > 128:
            tn = _floor_tile(tn // 2)
        elif tm > 256:
            tm = _floor_tile(tm // 2)
        else:
            break

    Mp, Kp, C2p = _round_up(M, tm), _round_up(Kdim, tk), _round_up(C2, tn)
    if Mp // tm == 1 and C2p // tn == 1 and M > 256:
        tm = _round_up(-(-M // 2), 128)
        Mp = _round_up(M, tm)

    A = jnp.pad(A, ((0, Mp - M), (0, Kp - Kdim)))
    Wm = jnp.pad(Wm, ((0, Kp - Kdim), (0, C2p - C2)))
    bias_p = jnp.pad(bias, (0, C2p - C2)).reshape(1, C2p)

    grid = (Mp // tm, C2p // tn, Kp // tk)
    vmem_limit = int(min(budget, est(tm, tn, tk) + (16 << 20)))
    flops = 2 * Mp * Kp * C2p
    bytes_accessed = (Mp * Kp * in_b * (C2p // tn) + Kp * C2p * in_b
                      + C2p * 4 + Mp * C2p * out_b)

    out = pl.pallas_call(
        functools.partial(_im2col_gemm_kernel, act=act),
        out_shape=jax.ShapeDtypeStruct((Mp, C2p), out_dtype),
        grid_spec=pltpu.PrefetchScalarGridSpec(
            num_scalar_prefetch=0,
            grid=grid,
            in_specs=[
                pl.BlockSpec((tm, tk), lambda i, j, kq: (i, kq)),
                pl.BlockSpec((tk, tn), lambda i, j, kq: (kq, j)),
                pl.BlockSpec((1, tn), lambda i, j, kq: (0, j)),
            ],
            out_specs=pl.BlockSpec((tm, tn), lambda i, j, kq: (i, j)),
            scratch_shapes=[pltpu.VMEM((tm, tn), jnp.float32)]),
        compiler_params=pltpu.CompilerParams(
            dimension_semantics=("parallel", "parallel", "arbitrary"),
            vmem_limit_bytes=vmem_limit),
        cost_estimate=pl.CostEstimate(flops=flops, transcendentals=0,
                                      bytes_accessed=bytes_accessed),
    )(A, Wm, bias_p)

    return out[:M, :C2].reshape(N, H_out, W_out, C2)


# --------------------------------------------------------------------------
# Module-level wrappers.
# --------------------------------------------------------------------------
def conv_bn_lrelu_nhwc(x, weight, conv_bias, gamma, beta, running_mean,
                       running_var, *, k, s=1, p=0, d=1, g=1, act=True,
                       eps=1e-5, compute_dtype=jnp.bfloat16, out_dtype=None):
    """Forward of Conv(c1, c2, k, s, p, d, g=1, act) on an NHWC activation."""
    assert g == 1  # TODO(synk): grouped conv (g > 1) not supported.
    if out_dtype is None:
        out_dtype = x.dtype

    N, H, W, C1 = x.shape
    C2 = weight.shape[0]
    H_out = (H + 2 * p - d * (k - 1) - 1) // s + 1
    W_out = (W + 2 * p - d * (k - 1) - 1) // s + 1

    # Fold BN (eval mode) + conv bias: scale -> weights (fp32, pre-cast), bias vector.
    bn_scale = (gamma / jnp.sqrt(running_var + eps)).astype(jnp.float32)
    bias = (beta + (conv_bias - running_mean) * bn_scale).astype(jnp.float32)
    w_scaled = weight.astype(jnp.float32) * bn_scale[:, None, None, None]

    common = dict(N=N, H=H, W=W, C1=C1, C2=C2, k=k, p=p, d=d, act=act,
                  compute_dtype=compute_dtype, out_dtype=out_dtype)
    if s == 1:
        return _conv_stream_s1(x, w_scaled, bias, **common)
    return _conv_im2col(x, w_scaled, bias, s=s, H_out=H_out, W_out=W_out,
                        **common)


def conv_module_forward(x_nchw, weight, conv_bias, gamma, beta, running_mean,
                        running_var, *, k, s=1, p=0, d=1, g=1, act=True,
                        eps=1e-5, compute_dtype=jnp.bfloat16, out_dtype=None):
    """NCHW wrapper mirroring the PyTorch Conv module (keep stacks in NHWC!)."""
    x = jnp.transpose(x_nchw, (0, 2, 3, 1))
    out = conv_bn_lrelu_nhwc(x, weight, conv_bias, gamma, beta, running_mean,
                             running_var, k=k, s=s, p=p, d=d, g=g, act=act,
                             eps=eps, compute_dtype=compute_dtype,
                             out_dtype=out_dtype)
    return jnp.transpose(out, (0, 3, 1, 2))


if __name__ == "__main__":
    key = jax.random.PRNGKey(0)
    k1, k2, k3, k4, k5 = jax.random.split(key, 5)

    # Conv(c1=4, c2=8, k=3)
    N, C1, H, W = 2, 4, 16, 16
    C2, K = 8, 3

    x = jax.random.normal(k1, (N, C1, H, W), jnp.float32)
    weight = 0.1 * jax.random.normal(k2, (C2, C1, K, K), jnp.float32)
    conv_bias = 0.1 * jax.random.normal(k3, (C2,), jnp.float32)
    gamma = 1.0 + 0.1 * jax.random.normal(k4, (C2,), jnp.float32)
    beta = 0.1 * jax.random.normal(k5, (C2,), jnp.float32)
    running_mean = jnp.zeros((C2,), jnp.float32)
    running_var = jnp.ones((C2,), jnp.float32)

    def torch_ref(xin, s, p):
        y = jax.lax.conv_general_dilated(
            xin, weight, (s, s), ((p, p), (p, p)),
            dimension_numbers=("NCHW", "OIHW", "NCHW"))
        y = y + conv_bias[None, :, None, None]
        sc = gamma / jnp.sqrt(running_var + 1e-5)
        y = (y - running_mean[None, :, None, None]) * sc[None, :, None, None] \
            + beta[None, :, None, None]
        return jnp.where(y > 0, y, 0.1 * y)

    # stride-1 streaming path (s=1, p=1)
    out1 = conv_module_forward(x, weight, conv_bias, gamma, beta,
                               running_mean, running_var, k=K, s=1, p=1)
    out1 = jax.block_until_ready(out1)
    assert out1.shape == (N, C2, H, W)
    np.testing.assert_allclose(np.asarray(out1), np.asarray(torch_ref(x, 1, 1)),
                               rtol=2e-2, atol=2e-2)

    # strided im2col fallback path (s=2, p=1)
    out2 = conv_module_forward(x, weight, conv_bias, gamma, beta,
                               running_mean, running_var, k=K, s=2, p=1)
    out2 = jax.block_until_ready(out2)
    assert out2.shape == (N, C2, H // 2, W // 2)
    np.testing.assert_allclose(np.asarray(out2), np.asarray(torch_ref(x, 2, 1)),
                               rtol=2e-2, atol=2e-2)

    print("KERNEL_OK")
</pallas_src>

<mosaic_0001>
module attributes {stable_mosaic.version = 11 : i64} {
  func.func @kernel(%arg0: i32, %arg1: i32, %arg2: memref<808x128xbf16, #tpu.memory_space<any>>, %arg3: memref<9x128x128xbf16, #tpu.memory_space<vmem>>, %arg4: memref<1x128xf32, #tpu.memory_space<vmem>>, %arg5: memref<384x128xf32, #tpu.memory_space<vmem>>, %arg6: memref<424x128xbf16, #tpu.memory_space<vmem>>, %arg7: memref<384x128xf32, #tpu.memory_space<vmem>>, %arg8: memref<!tpu.dma_semaphore, #tpu.memory_space<semaphore_mem>>) attributes {dimension_semantics = [#tpu.dimension_semantics<parallel>, #tpu.dimension_semantics<parallel>], iteration_bounds = array<i64: 2, 1>, scalar_prefetch = 0 : i64, scratch_operands = 3 : i64, tpu.core_type = #tpu.core_type<tc>, window_params = [{}, {transform_indices = @transform_1, window_bounds = array<i64: 9, 128, 128>}, {transform_indices = @transform_2, window_bounds = array<i64: 1, 128>}, {transform_indices = @transform_3, window_bounds = array<i64: 384, 128>}]} {
    %c384_i32 = arith.constant 384 : i32
    %0 = arith.muli %arg0, %c384_i32 : i32
    %1 = tpu.assume_multiple %0, 8 : i32
    %c0_i32 = arith.constant 0 : i32
    %2 = tpu.memref_slice %arg2[%1, %c0_i32] : memref<808x128xbf16, #tpu.memory_space<any>> -> memref<424x128xbf16, #tpu.memory_space<any>>
    tpu.enqueue_dma source(%2 : memref<424x128xbf16, #tpu.memory_space<any>>) target(%arg6 : memref<424x128xbf16, #tpu.memory_space<vmem>>) target_semaphore(%arg8 : memref<!tpu.dma_semaphore, #tpu.memory_space<semaphore_mem>>)
    %c0_i32_0 = arith.constant 0 : i32
    %3 = tpu.memref_slice %arg2[%1, %c0_i32_0] : memref<808x128xbf16, #tpu.memory_space<any>> -> memref<424x128xbf16, #tpu.memory_space<any>>
    tpu.wait_dma2 semaphore(%arg8 : memref<!tpu.dma_semaphore, #tpu.memory_space<semaphore_mem>>) src(%3 : memref<424x128xbf16, #tpu.memory_space<any>>) dst(%arg6 : memref<424x128xbf16, #tpu.memory_space<vmem>>)
    %c0 = arith.constant 0 : index
    %c0_1 = arith.constant 0 : index
    %4 = vector.load %arg6[%c0, %c0_1] : memref<424x128xbf16, #tpu.memory_space<vmem>>, vector<384x128xbf16>
    %c0_2 = arith.constant 0 : index
    %c0_3 = arith.constant 0 : index
    %c0_4 = arith.constant 0 : index
    %5 = vector.load %arg3[%c0_2, %c0_3, %c0_4] : memref<9x128x128xbf16, #tpu.memory_space<vmem>>, vector<1x128x128xbf16>
    %6 = vector.shape_cast %5 : vector<1x128x128xbf16> to vector<128x128xbf16>
    %cst = arith.constant dense<0.000000e+00> : vector<384x128xf32>
    %7 = tpu.matmul %4, %6, %cst {dimension_numbers = #tpu.dot_dimension_numbers<[1], [0], [0], [1], [0, 0, 1, 1], [], []>} : vector<384x128xbf16>, vector<128x128xbf16>, vector<384x128xf32> -> vector<384x128xf32>
    %c0_5 = arith.constant 0 : index
    %c0_6 = arith.constant 0 : index
    %8 = vector.load %arg7[%c0_5, %c0_6] : memref<384x128xf32, #tpu.memory_space<vmem>>, vector<384x128xf32>
    tpu.vector_store %arg7[%c0_5, %c0_6], %7 {strides = array<i32>} : memref<384x128xf32, #tpu.memory_space<vmem>>, vector<384x128xf32>,
    %c1 = arith.constant 1 : index
    %c0_7 = arith.constant 0 : index
    %9 = vector.load %arg6[%c1, %c0_7] : memref<424x128xbf16, #tpu.memory_space<vmem>>, vector<384x128xbf16>
    %c1_8 = arith.constant 1 : index
    %c0_9 = arith.constant 0 : index
    %c0_10 = arith.constant 0 : index
    %10 = vector.load %arg3[%c1_8, %c0_9, %c0_10] : memref<9x128x128xbf16, #tpu.memory_space<vmem>>, vector<1x128x128xbf16>
    %11 = vector.shape_cast %10 : vector<1x128x128xbf16> to vector<128x128xbf16>
    %cst_11 = arith.constant dense<0.000000e+00> : vector<384x128xf32>
    %12 = tpu.matmul %9, %11, %cst_11 {dimension_numbers = #tpu.dot_dimension_numbers<[1], [0], [0], [1], [0, 0, 1, 1], [], []>} : vector<384x128xbf16>, vector<128x128xbf16>, vector<384x128xf32> -> vector<384x128xf32>
    %c0_12 = arith.constant 0 : index
    %c0_13 = arith.constant 0 : index
    %13 = vector.load %arg7[%c0_12, %c0_13] : memref<384x128xf32, #tpu.memory_space<vmem>>, vector<384x128xf32>
    %14 = arith.addf %13, %12 : vector<384x128xf32>
    %c0_14 = arith.constant 0 : index
    %c0_15 = arith.constant 0 : index
    %15 = vector.load %arg7[%c0_14, %c0_15] : memref<384x128xf32, #tpu.memory_space<vmem>>, vector<384x128xf32>
    tpu.vector_store %arg7[%c0_14, %c0_15], %14 {strides = array<i32>} : memref<384x128xf32, #tpu.memory_space<vmem>>, vector<384x128xf32>,
    %c2 = arith.constant 2 : index
    %c0_16 = arith.constant 0 : index
    %16 = vector.load %arg6[%c2, %c0_16] : memref<424x128xbf16, #tpu.memory_space<vmem>>, vector<384x128xbf16>
    %c2_17 = arith.constant 2 : index
    %c0_18 = arith.constant 0 : index
    %c0_19 = arith.constant 0 : index
    %17 = vector.load %arg3[%c2_17, %c0_18, %c0_19] : memref<9x128x128xbf16, #tpu.memory_space<vmem>>, vector<1x128x128xbf16>
    %18 = vector.shape_cast %17 : vector<1x128x128xbf16> to vector<128x128xbf16>
    %cst_20 = arith.constant dense<0.000000e+00> : vector<384x128xf32>
    %19 = tpu.matmul %16, %18, %cst_20 {dimension_numbers = #tpu.dot_dimension_numbers<[1], [0], [0], [1], [0, 0, 1, 1], [], []>} : vector<384x128xbf16>, vector<128x128xbf16>, vector<384x128xf32> -> vector<384x128xf32>
    %c0_21 = arith.constant 0 : index
    %c0_22 = arith.constant 0 : index
    %20 = vector.load %arg7[%c0_21, %c0_22] : memref<384x128xf32, #tpu.memory_space<vmem>>, vector<384x128xf32>
    %21 = arith.addf %20, %19 : vector<384x128xf32>
    %c0_23 = arith.constant 0 : index
    %c0_24 = arith.constant 0 : index
    %22 = vector.load %arg7[%c0_23, %c0_24] : memref<384x128xf32, #tpu.memory_space<vmem>>, vector<384x128xf32>
    tpu.vector_store %arg7[%c0_23, %c0_24], %21 {strides = array<i32>} : memref<384x128xf32, #tpu.memory_space<vmem>>, vector<384x128xf32>,
    %c18 = arith.constant 18 : index
    %c0_25 = arith.constant 0 : index
    %23 = vector.load %arg6[%c18, %c0_25] : memref<424x128xbf16, #tpu.memory_space<vmem>>, vector<384x128xbf16>
    %c3 = arith.constant 3 : index
    %c0_26 = arith.constant 0 : index
    %c0_27 = arith.constant 0 : index
    %24 = vector.load %arg3[%c3, %c0_26, %c0_27] : memref<9x128x128xbf16, #tpu.memory_space<vmem>>, vector<1x128x128xbf16>
    %25 = vector.shape_cast %24 : vector<1x128x128xbf16> to vector<128x128xbf16>
    %cst_28 = arith.constant dense<0.000000e+00> : vector<384x128xf32>
    %26 = tpu.matmul %23, %25, %cst_28 {dimension_numbers = #tpu.dot_dimension_numbers<[1], [0], [0], [1], [0, 0, 1, 1], [], []>} : vector<384x128xbf16>, vector<128x128xbf16>, vector<384x128xf32> -> vector<384x128xf32>
    %c0_29 = arith.constant 0 : index
    %c0_30 = arith.constant 0 : index
    %27 = vector.load %arg7[%c0_29, %c0_30] : memref<384x128xf32, #tpu.memory_space<vmem>>, vector<384x128xf32>
    %28 = arith.addf %27, %26 : vector<384x128xf32>
    %c0_31 = arith.constant 0 : index
    %c0_32 = arith.constant 0 : index
    %29 = vector.load %arg7[%c0_31, %c0_32] : memref<384x128xf32, #tpu.memory_space<vmem>>, vector<384x128xf32>
    tpu.vector_store %arg7[%c0_31, %c0_32], %28 {strides = array<i32>} : memref<384x128xf32, #tpu.memory_space<vmem>>, vector<384x128xf32>,
    %c19 = arith.constant 19 : index
    %c0_33 = arith.constant 0 : index
    %30 = vector.load %arg6[%c19, %c0_33] : memref<424x128xbf16, #tpu.memory_space<vmem>>, vector<384x128xbf16>
    %c4 = arith.constant 4 : index
    %c0_34 = arith.constant 0 : index
    %c0_35 = arith.constant 0 : index
    %31 = vector.load %arg3[%c4, %c0_34, %c0_35] : memref<9x128x128xbf16, #tpu.memory_space<vmem>>, vector<1x128x128xbf16>
    %32 = vector.shape_cast %31 : vector<1x128x128xbf16> to vector<128x128xbf16>
    %cst_36 = arith.constant dense<0.000000e+00> : vector<384x128xf32>
    %33 = tpu.matmul %30, %32, %cst_36 {dimension_numbers = #tpu.dot_dimension_numbers<[1], [0], [0], [1], [0, 0, 1, 1], [], []>} : vector<384x128xbf16>, vector<128x128xbf16>, vector<384x128xf32> -> vector<384x128xf32>
    %c0_37 = arith.constant 0 : index
    %c0_38 = arith.constant 0 : index
    %34 = vector.load %arg7[%c0_37, %c0_38] : memref<384x128xf32, #tpu.memory_space<vmem>>, vector<384x128xf32>
    %35 = arith.addf %34, %33 : vector<384x128xf32>
    %c0_39 = arith.constant 0 : index
    %c0_40 = arith.constant 0 : index
    %36 = vector.load %arg7[%c0_39, %c0_40] : memref<384x128xf32, #tpu.memory_space<vmem>>, vector<384x128xf32>
    tpu.vector_store %arg7[%c0_39, %c0_40], %35 {strides = array<i32>} : memref<384x128xf32, #tpu.memory_space<vmem>>, vector<384x128xf32>,
    %c20 = arith.constant 20 : index
    %c0_41 = arith.constant 0 : index
    %37 = vector.load %arg6[%c20, %c0_41] : memref<424x128xbf16, #tpu.memory_space<vmem>>, vector<384x128xbf16>
    %c5 = arith.constant 5 : index
    %c0_42 = arith.constant 0 : index
    %c0_43 = arith.constant 0 : index
    %38 = vector.load %arg3[%c5, %c0_42, %c0_43] : memref<9x128x128xbf16, #tpu.memory_space<vmem>>, vector<1x128x128xbf16>
    %39 = vector.shape_cast %38 : vector<1x128x128xbf16> to vector<128x128xbf16>
    %cst_44 = arith.constant dense<0.000000e+00> : vector<384x128xf32>
    %40 = tpu.matmul %37, %39, %cst_44 {dimension_numbers = #tpu.dot_dimension_numbers<[1], [0], [0], [1], [0, 0, 1, 1], [], []>} : vector<384x128xbf16>, vector<128x128xbf16>, vector<384x128xf32> -> vector<384x128xf32>
    %c0_45 = arith.constant 0 : index
    %c0_46 = arith.constant 0 : index
    %41 = vector.load %arg7[%c0_45, %c0_46] : memref<384x128xf32, #tpu.memory_space<vmem>>, vector<384x128xf32>
    %42 = arith.addf %41, %40 : vector<384x128xf32>
    %c0_47 = arith.constant 0 : index
    %c0_48 = arith.constant 0 : index
    %43 = vector.load %arg7[%c0_47, %c0_48] : memref<384x128xf32, #tpu.memory_space<vmem>>, vector<384x128xf32>
    tpu.vector_store %arg7[%c0_47, %c0_48], %42 {strides = array<i32>} : memref<384x128xf32, #tpu.memory_space<vmem>>, vector<384x128xf32>,
    %c36 = arith.constant 36 : index
    %c0_49 = arith.constant 0 : index
    %44 = vector.load %arg6[%c36, %c0_49] : memref<424x128xbf16, #tpu.memory_space<vmem>>, vector<384x128xbf16>
    %c6 = arith.constant 6 : index
    %c0_50 = arith.constant 0 : index
    %c0_51 = arith.constant 0 : index
    %45 = vector.load %arg3[%c6, %c0_50, %c0_51] : memref<9x128x128xbf16, #tpu.memory_space<vmem>>, vector<1x128x128xbf16>
    %46 = vector.shape_cast %45 : vector<1x128x128xbf16> to vector<128x128xbf16>
    %cst_52 = arith.constant dense<0.000000e+00> : vector<384x128xf32>
    %47 = tpu.matmul %44, %46, %cst_52 {dimension_numbers = #tpu.dot_dimension_numbers<[1], [0], [0], [1], [0, 0, 1, 1], [], []>} : vector<384x128xbf16>, vector<128x128xbf16>, vector<384x128xf32> -> vector<384x128xf32>
    %c0_53 = arith.constant 0 : index
    %c0_54 = arith.constant 0 : index
    %48 = vector.load %arg7[%c0_53, %c0_54] : memref<384x128xf32, #tpu.memory_space<vmem>>, vector<384x128xf32>
    %49 = arith.addf %48, %47 : vector<384x128xf32>
    %c0_55 = arith.constant 0 : index
    %c0_56 = arith.constant 0 : index
    %50 = vector.load %arg7[%c0_55, %c0_56] : memref<384x128xf32, #tpu.memory_space<vmem>>, vector<384x128xf32>
    tpu.vector_store %arg7[%c0_55, %c0_56], %49 {strides = array<i32>} : memref<384x128xf32, #tpu.memory_space<vmem>>, vector<384x128xf32>,
    %c37 = arith.constant 37 : index
    %c0_57 = arith.constant 0 : index
    %51 = vector.load %arg6[%c37, %c0_57] : memref<424x128xbf16, #tpu.memory_space<vmem>>, vector<384x128xbf16>
    %c7 = arith.constant 7 : index
    %c0_58 = arith.constant 0 : index
    %c0_59 = arith.constant 0 : index
    %52 = vector.load %arg3[%c7, %c0_58, %c0_59] : memref<9x128x128xbf16, #tpu.memory_space<vmem>>, vector<1x128x128xbf16>
    %53 = vector.shape_cast %52 : vector<1x128x128xbf16> to vector<128x128xbf16>
    %cst_60 = arith.constant dense<0.000000e+00> : vector<384x128xf32>
    %54 = tpu.matmul %51, %53, %cst_60 {dimension_numbers = #tpu.dot_dimension_numbers<[1], [0], [0], [1], [0, 0, 1, 1], [], []>} : vector<384x128xbf16>, vector<128x128xbf16>, vector<384x128xf32> -> vector<384x128xf32>
    %c0_61 = arith.constant 0 : index
    %c0_62 = arith.constant 0 : index
    %55 = vector.load %arg7[%c0_61, %c0_62] : memref<384x128xf32, #tpu.memory_space<vmem>>, vector<384x128xf32>
    %56 = arith.addf %55, %54 : vector<384x128xf32>
    %c0_63 = arith.constant 0 : index
    %c0_64 = arith.constant 0 : index
    %57 = vector.load %arg7[%c0_63, %c0_64] : memref<384x128xf32, #tpu.memory_space<vmem>>, vector<384x128xf32>
    tpu.vector_store %arg7[%c0_63, %c0_64], %56 {strides = array<i32>} : memref<384x128xf32, #tpu.memory_space<vmem>>, vector<384x128xf32>,
    %c38 = arith.constant 38 : index
    %c0_65 = arith.constant 0 : index
    %58 = vector.load %arg6[%c38, %c0_65] : memref<424x128xbf16, #tpu.memory_space<vmem>>, vector<384x128xbf16>
    %c8 = arith.constant 8 : index
    %c0_66 = arith.constant 0 : index
    %c0_67 = arith.constant 0 : index
    %59 = vector.load %arg3[%c8, %c0_66, %c0_67] : memref<9x128x128xbf16, #tpu.memory_space<vmem>>, vector<1x128x128xbf16>
    %60 = vector.shape_cast %59 : vector<1x128x128xbf16> to vector<128x128xbf16>
    %cst_68 = arith.constant dense<0.000000e+00> : vector<384x128xf32>
    %61 = tpu.matmul %58, %60, %cst_68 {dimension_numbers = #tpu.dot_dimension_numbers<[1], [0], [0], [1], [0, 0, 1, 1], [], []>} : vector<384x128xbf16>, vector<128x128xbf16>, vector<384x128xf32> -> vector<384x128xf32>
    %c0_69 = arith.constant 0 : index
    %c0_70 = arith.constant 0 : index
    %62 = vector.load %arg7[%c0_69, %c0_70] : memref<384x128xf32, #tpu.memory_space<vmem>>, vector<384x128xf32>
    %63 = arith.addf %62, %61 : vector<384x128xf32>
    %c0_71 = arith.constant 0 : index
    %c0_72 = arith.constant 0 : index
    %64 = vector.load %arg7[%c0_71, %c0_72] : memref<384x128xf32, #tpu.memory_space<vmem>>, vector<384x128xf32>
    tpu.vector_store %arg7[%c0_71, %c0_72], %63 {strides = array<i32>} : memref<384x128xf32, #tpu.memory_space<vmem>>, vector<384x128xf32>,
    %c0_73 = arith.constant 0 : index
    %c0_74 = arith.constant 0 : index
    %65 = vector.load %arg7[%c0_73, %c0_74] : memref<384x128xf32, #tpu.memory_space<vmem>>, vector<384x128xf32>
    %c0_75 = arith.constant 0 : index
    %c0_76 = arith.constant 0 : index
    %66 = vector.load %arg4[%c0_75, %c0_76] : memref<1x128xf32, #tpu.memory_space<vmem>>, vector<1x128xf32>
    %67 = vector.broadcast %66 : vector<1x128xf32> to vector<384x128xf32>
    %68 = arith.addf %65, %67 : vector<384x128xf32>
    %cst_77 = arith.constant 1.000000e-01 : f32
    %69 = vector.broadcast %cst_77 : f32 to vector<384x128xf32>
    %70 = arith.mulf %69, %68 : vector<384x128xf32>
    %71 = arith.maximumf %68, %70 : vector<384x128xf32>
    %c0_78 = arith.constant 0 : index
    %c0_79 = arith.constant 0 : index
    %72 = vector.load %arg5[%c0_78, %c0_79] : memref<384x128xf32, #tpu.memory_space<vmem>>, vector<384x128xf32>
    tpu.vector_store %arg5[%c0_78, %c0_79], %71 {strides = array<i32>} : memref<384x128xf32, #tpu.memory_space<vmem>>, vector<384x128xf32>,
    return
  }
  func.func @transform_1(%arg0: i32, %arg1: i32) -> (i32, i32, i32) {
    %c0_i32 = arith.constant 0 : i32
    %c0_i32_0 = arith.constant 0 : i32
    %c0_i32_1 = arith.constant 0 : i32
    return %c0_i32, %c0_i32_0, %arg1 : i32, i32, i32
  }
  func.func @transform_2(%arg0: i32, %arg1: i32) -> (i32, i32) {
    %c0_i32 = arith.constant 0 : i32
    %c0_i32_0 = arith.constant 0 : i32
    return %c0_i32, %arg1 : i32, i32
  }
  func.func @transform_3(%arg0: i32, %arg1: i32) -> (i32, i32) {
    %c0_i32 = arith.constant 0 : i32
    return %arg0, %arg1 : i32, i32
  }
}

</mosaic_0001>

<bundles_post_ra>
// kernel: tpu_custom_call.1
= control target key start
LH: loop header
LB: loop body
LE: loop exit
PB: predicated region body
PF: predicated region fallthrough
CT: control target
= control target key end

     0   :  { %8 = vsyncpa [#allocation6], 0  ;;  %s9876_s0 = inlined_call_operand.hbm [shape: bf16[808,128], index: 0, kind: input, shape index: {}]   ;;  %s9877_s1 = inlined_call_operand.hbm [shape: bf16[9,128,128], index: 1, kind: input, shape index: {}]   ;;  %s9878_s2 = inlined_call_operand.vmem [shape: f32[1,128], index: 2, kind: input, shape index: {}]   ;;  %s9879_s3 = inlined_call_operand.hbm [shape: f32[768,128], index: 3, kind: output, shape index: {}]  }
   0x1   :  { %9 = vsyncpa [#allocation7], 0 }
   0x2   :  { %11 = vsyncpa [#allocation7 + $0x1], 0  ;;  %s8732_s12 = smov 0   ;;  %s8734_s13 = smov 0  }
   0x3   :  { %s8736_s14 = smov 0   ;;  %s8738_s15 = smov 0  }
   0x4   :  { %s8740_s16 = smov 0   ;;  %s8742_s17 = smov 0  }
   0x5 LB: > { %s7015_s18 = sadd.s32 4294967295, %s8703_s17   ;;  %s7016_s19 = sadd.s32 4294967294, %s8703_s17   ;;  %s8703_s17 = sphi %s8742_s17, %s17_s17   ;;  %s8699_s16 = sphi %s8740_s16, %s9952_s16   ;;  %s8695_s15 = sphi %s8738_s15, %s9951_s15   ;;  %s8691_s14 = sphi %s8736_s14, %s9950_s14   ;;  %s8687_s13 = sphi %s8734_s13, %s9949_s13   ;;  %s8683_s12 = sphi %s8732_s12, %s9948_s12  }
   0x6   : > { %s29_s20 = sadd.s32 1, %s8699_s16  ;;  %s90_s21 = sadd.s32 1, %s8691_s14 }
   0x7   : > { %p31_p0 = scmp.ge.s32.totalorder %s29_s20, 2  ;;  %p100_p1 = scmp.ne.s32.totalorder %s8691_s14, %s8687_s13 }
   0x8   : > { %p101_p2 = scmp.eq.s32.totalorder %s7015_s18, 1  ;;  %p106_p3 = scmp.ne.s32.totalorder %s8687_s13, %s8683_s12 }
   0x9   : > { %s9954_s20 = smov (%p31_p0, %s29_s20), 0  ;;  %p107_p5 = scmp.eq.s32.totalorder %s7016_s19, 1 }
   0xa   : > { %p8772_p4 = por %p101_p2, %p100_p1  ;;  %s85_s23 = ssub.s32 %s8699_s16, %s9954_s20 }
   0xb   : > { %p7017_p6 = scmp.ge.s32.totalorder %s8703_s17, 1  ;;  %p88_p7 = scmp.eq.s32.totalorder %s85_s23, 0 }
   0xc   : > { %p8779_p8 = por %p107_p5, %p106_p3  ;;  %p114_p9 = scmp.lt.s32.totalorder %s8703_s17, 3 }
   0xd   : > { %s8785_s25 = scalar_select %p88_p7, %s8691_s14, %s90_s21  }
   0xe   : > { %p8787_p10 = pnand %p7017_p6, %p114_p9  ;;  %p8791_p11 = scmp.eq.s32.totalorder %s7015_s18, 0 }
   0xf   : > { %s8705_s28 = smov [#allocation5]  }
  0x10   : > { %p8212_p12 = pneg %p8787_p10  ;;  %s128_s29 = sshll.u32 %s8705_s28, 4  ;;  %s129_s29 = int_to_ptr.vmem [resolvable:$true] %s128_s29 }
  0x11   : > { %s8584_s30 = scalar_lea.vmem %s129_s29, 9216  ;;  %p8592_p5 = scmp.lt.s32.totalorder %s129_s29, %s129_s29 }
  0x12   : > { %p8213_p13 = pnand %p8791_p11, %p8212_p12  ;;  %p8585_p1 = scmp.ne.s32.totalorder %s129_s29, %s8584_s30 }
  0x13   : > { %p8593_p6 = scmp.lt.s32.totalorder %s8584_s30, %s8584_s30 }
  0x14   : > { %p8575_p0 = pneg %p8213_p13 }
  0x15   : > { %p8594_p7 = por %p8593_p6, %p8592_p5 }
  0x16   : > { %p8587_p2 = pnand %p8585_p1, %p8575_p0 }
  0x18   : > { %p8588_p3 = pneg %p8587_p2 }
  0x1a   : > { %p8595_p9 = pnand %p8594_p7, %p8588_p3 }
  0x1c   : > { %8598 = shalt.err (!%p8595_p9)
}
  0x1d   : > { %s8706_s4 = smov 64   ;;  %s8707_s5 = smov 4  }
  0x1e   : > { %8215 = dma.hbm_to_vmem [thread:$0]  (!%p8213_p13), %s9877_s1, 9216, %s129_s29, [#allocation6], %s8706_s4, %s8706_s4, %s8707_s5  }
  0x1f   : > { %150 = sbr.rel (%p8787_p10) target bundleno = 741 (0x2e5), region = 28 }
  0x24   : > { %8672 = dma.done.wait (%p8791_p11), [#allocation6], 9216  }
  0x25   : > { %8674 = vsyncadd (%p8791_p11), [#allocation6], 4294958080  ;;  %s167_s8 = sand.u32 1, %s8687_s13   ;;  %s175_s9 = smul.u32 384, %s8695_s15 }
  0x26   : > { %s8205_s10 = smul.u32 384, %s167_s8  ;;  %s8708_s18 = smov [#allocation2]  }
  0x27   : > { %s176_s11 = sshra.s32 %s175_s9, 3  ;;  %s187_s19 = sshll.u32 %s8708_s18, 4  ;;  %s188_s19 = int_to_ptr.vmem [resolvable:$true] %s187_s19 }
  0x28   : > { %s7022_s21 = sshll.u32 %s176_s11, 6  ;;  %s8601_s4 = scalar_lea.hbm %s9876_s0, 6464 }
  0x29   : > { %s179_s28 = scalar_lea.hbm %s9876_s0, %s7022_s21 }
  0x2a   : > { %s8599_s29 = scalar_lea.hbm %s179_s28, 3392  ;;  %p8602_p11 = scmp.lt.s32.totalorder %s179_s28, %s9876_s0 }
  0x2b   : > { %p8600_p10 = scmp.ne.s32.totalorder %s179_s28, %s8599_s29  ;;  %p8603_p12 = scmp.lt.s32.totalorder %s8601_s4, %s8599_s29 }
  0x2d   : > { %p8604_p13 = por %p8603_p12, %p8602_p11 }
  0x2f   : > { %p8605_p0 = pnand %p8604_p13, %p8600_p10 }
  0x31   : > { %8608 = shalt.err (!%p8605_p0)  }
  0x32   : > { %s8609_s7 = scalar_lea.vmem %s188_s19, 3392  ;;  %p8614_p2 = scmp.lt.s32.totalorder %s188_s19, %s188_s19 }
  0x33   : > { %p8610_p1 = scmp.ne.s32.totalorder %s188_s19, %s8609_s7  ;;  %p8615_p3 = scmp.lt.s32.totalorder %s8609_s7, %s8609_s7 }
  0x35   : > { %p8616_p5 = por %p8615_p3, %p8614_p2 }
  0x37   : > { %p8617_p6 = pnand %p8616_p5, %p8610_p1 }
  0x39   : > { %8620 = shalt.err (!%p8617_p6)  }
  0x3a   : > { %190 = dma.hbm_to_vmem [thread:$0]  %s179_s28, 3392, %s188_s19, [#allocation4] }
  0x3b   : > { %s8821_s9 = scalar_lea.vmem [#allocation8], %s8205_s10 }
  0x3c   : > { %8675 = dma.done.wait [#allocation4], 3392 }
  0x3d   : > { %8676 = vsyncadd [#allocation4], 4294963904  ;;  %v8277_v0 = vld [vmem:[#allocation5 + $0x38] sm:$0xff]   ;;  %v8278_v1 = vld [vmem:[#allocation5 + $0x30] sm:$0xff]   ;;  %vm913_vm0 = vsmask.f32 7424 }
  0x3e   : > { %7613 = vmatprep.subr.bf16.mxu0 %v8277_v0  ;;  %8189 = vmatprep.subr.bf16.mxu1 %v8277_v0  ;;  %v8279_v2 = vld [vmem:[#allocation5 + $0x28] sm:$0xff]   ;;  %v8280_v3 = vld [vmem:[#allocation5 + $0x20] sm:$0xff]   ;;  %v8281_v6 = vld [vmem:[#allocation5 + $0x18] sm:$0xff]   ;;  %vm1740_vm1 = vcmask 1046528   ;;  %vm3099_vm2 = vsmask.f32 6400 }
  0x3f   : > { %7614 = vmatpush3.bf16.msra.mxu0 %v8277_v0  ;;  %8197 = vmatpush3.bf16.msra.mxu1 %v8277_v0  ;;  %v8285_v4 = vld [vmem:[#allocation2] sm:$0xff]   ;;  %v8284_v9 = vld [vmem:[#allocation5] sm:$0xff]   ;;  %v8289_v10 = vld [vmem:[#allocation5 + $0x78] sm:$0xff]   ;;  %vm3954_vm3 = vcmask 1045504   ;;  %vm5313_vm4 = vsmask.f32 5376 }
  0x40   : > { %7615 = vmatprep.subr.bf16.mxu0 %v8278_v1  ;;  %8190 = vmatprep.subr.bf16.mxu1 %v8278_v1  ;;  %v8286_v5 = vld [vmem:[#allocation2 + $0x60] sm:$0xff]   ;;  %v8287_v11 = vld [vmem:[#allocation2 + $0x8] sm:$0xff]   ;;  %v8292_v15 = vld [vmem:[#allocation2 + $0x10] sm:$0xff]   ;;  %vm6168_vm5 = vcmask 1044480   ;;  %s7324_s18 = smul.u32 6144, %s8695_s15  ;;  %s6921_s19 = sshll.u32 %s8821_s9, 4  ;;  %s9825_s19 = int_to_ptr.vmem [resolvable:$true] %s6921_s19 }
  0x41   : > { %7629 = vmatprep.mubr.bf16.mxu0 %v8285_v4  ;;  %7653 = vmatprep.mubr.bf16.mxu1 %v8286_v5  ;;  %v8282_v7 = vld [vmem:[#allocation5 + $0x10] sm:$0xff]   ;;  %v8283_v8 = vld [vmem:[#allocation5 + $0x8] sm:$0xff]   ;;  %v8290_v12 = vld [vmem:[#allocation5 + $0xb8] sm:$0xff]   ;;  %s9831_s15 = scalar_lea.sflag [#allocation7], %s167_s8  ;;  %s8621_s28 = scalar_lea.vmem %s9825_s19, 6144 }
  0x42   : > { %v8288_v13 = vld [vmem:[#allocation2 + $0x68] sm:$0xff]   ;;  %v8293_v16 = vld [vmem:[#allocation2 + $0x70] sm:$0xff]   ;;  %v8297_v18 = vld [vmem:[#allocation5 + $0x68] sm:$0xff]   ;;  %s9823_s26 = scalar_lea.hbm %s9879_s3, %s7324_s18  ;;  %p8622_p7 = scmp.ne.s32.totalorder %s9825_s19, %s8621_s28 }
  0x43   : > { %7616 = vmatpush3.bf16.msra.mxu0 %v8278_v1  ;;  %8198 = vmatpush3.bf16.msra.mxu1 %v8278_v1  ;;  %v8291_v14 = vld [vmem:[#allocation5 + $0x70] sm:$0xff]   ;;  %v8294_v19 = vld [vmem:[#allocation2 + $0x18] sm:$0xff]   ;;  %v8309_v28 = vld [vmem:[#allocation5 + $0x58] sm:$0xff]   ;;  %s8709_s29 = smov [#allocation8]  }
  0x44   : > { %7617 = vmatprep.subr.bf16.mxu0 %v8279_v2  ;;  %8191 = vmatprep.subr.bf16.mxu1 %v8279_v2  ;;  %v8296_v17 = vld [vmem:[#allocation5 + $0xb0] sm:$0xff]   ;;  %v8298_v20 = vld [vmem:[#allocation5 + $0xa8] sm:$0xff]   ;;  %v8303_v24 = vld [vmem:[#allocation5 + $0x60] sm:$0xff]   ;;  %p8623_p9 = pnand %p8622_p7, %p8772_p4  ;;  %s8625_s27 = sshll.u32 %s8709_s29, 4  ;;  %s8626_s27 = int_to_ptr.vmem [resolvable:$false] %s8625_s27 }
  0x45   : > { %v8295_v21 = vld [vmem:[#allocation2 + $0x78] sm:$0xff]   ;;  %v8299_v22 = vld [vmem:[#allocation2 + $0x20] sm:$0xff]   ;;  %v8301_v26 = vld [vmem:[#allocation2 + $0x28] sm:$0xff]   ;;  %s8627_s30 = scalar_lea.vmem %s8626_s27, 12288  ;;  %p8628_p11 = scmp.lt.s32.totalorder %s9825_s19, %s8626_s27 }
  0x46   : > { %v8300_v23 = vld [vmem:[#allocation2 + $0x80] sm:$0xff]   ;;  %v8304_v25 = vld [vmem:[#allocation5 + $0xa0] sm:$0xff]   ;;  %v8302_v27 = vld [vmem:[#allocation2 + $0x88] sm:$0xff]   ;;  %p8624_p10 = pneg %p8623_p9  ;;  %p8629_p12 = scmp.lt.s32.totalorder %s8627_s30, %s8621_s28 }
  0x47   : > { %7618 = vmatpush3.bf16.msra.mxu0 %v8279_v2  ;;  %8199 = vmatpush3.bf16.msra.mxu1 %v8279_v2  ;;  %v8310_v29 = vld [vmem:[#allocation5 + $0x98] sm:$0xff]   ;;  %v8311_v32 = vld [vmem:[#allocation5 + $0x50] sm:$0xff]   ;;  %v8307_v34 = vld [vmem:[#allocation2 + $0x38] sm:$0xff]  }
  0x48   : > { %7619 = vmatprep.subr.bf16.mxu0 %v8280_v3  ;;  %8192 = vmatprep.subr.bf16.mxu1 %v8280_v3  ;;  %v8305_v30 = vld [vmem:[#allocation2 + $0x30] sm:$0xff]   ;;  %v8316_v33 = vld [vmem:[#allocation5 + $0x90] sm:$0xff]   ;;  %v8308_v35 = vld [vmem:[#allocation2 + $0x98] sm:$0xff]   ;;  %p8630_p13 = por %p8629_p12, %p8628_p11 }
  0x49   : > { %v8306_v31 = vld [vmem:[#allocation2 + $0x90] sm:$0xff]   ;;  %v8312_v36 = vld [vmem:[#allocation2 + $0x40] sm:$0xff]   ;;  %v8326_v43 = vld [vmem:[#allocation2 + $0x8] sm:$0xff]  }
  0x4a   : > { %v8317_v37 = vld [vmem:[#allocation5 + $0x48] sm:$0xff]   ;;  %v8323_v40 = vld [vmem:[#allocation5 + $0x40] sm:$0xff]   ;;  %v8314_v44 = vld [vmem:[#allocation2 + $0x48] sm:$0xff]   ;;  %v922_v52 = vshll.u32 %v8326_v43, 16  ;;  %v926_v0 = vshrl.u32 %v8326_v43, 16  ;;  %p8631_p0 = pnand %p8630_p13, %p8624_p10 }
  0x4b   : > { %7620 = vmatpush3.bf16.msra.mxu0 %v8280_v3  ;;  %8200 = vmatpush3.bf16.msra.mxu1 %v8280_v3  ;;  %v8318_v38 = vld [vmem:[#allocation5 + $0x88] sm:$0xff]   ;;  %v8324_v42 = vld [vmem:[#allocation5 + $0x80] sm:$0xff]   ;;  %v8315_v45 = vld [vmem:[#allocation2 + $0xa8] sm:$0xff]  }
  0x4c   : > { %7621 = vmatprep.subr.bf16.mxu0 %v8281_v6  ;;  %8193 = vmatprep.subr.bf16.mxu1 %v8281_v6  ;;  %v8313_v39 = vld [vmem:[#allocation2 + $0xa0] sm:$0xff]   ;;  %v8823_v47 = vld [vmem:[#allocation5 + $0xf8] sm:$0xff]   ;;  %v8321_v57 = vld [vmem:[#allocation2 + $0x58] sm:$0xff]   ;;  %v924_v59 = vrot.slane %v922_v52, 1 }
  0x4d   : > { %v8325_v41 = vld [vmem:[#allocation2] sm:$0xff]   ;;  %v8319_v48 = vld [vmem:[#allocation2 + $0x50] sm:$0xff]   ;;  %v8328_v55 = vld [vmem:[#allocation2 + $0x8] sm:$0xff]  }
  0x4e   : > { %v917_v46 = vshll.u32 %v8325_v41, 16  ;;  %v8320_v49 = vld [vmem:[#allocation2 + $0xb0] sm:$0xff]   ;;  %v915_v51 = vshrl.u32 %v8325_v41, 16  ;;  %v8327_v53 = vld [vmem:[#allocation2] sm:$0xfe]   ;;  %v1742_v61 = vrot.slane %v8328_v55, 1 }
  0x4f   : > { %7622 = vmatpush3.bf16.msra.mxu0 %v8281_v6  ;;  %8201 = vmatpush3.bf16.msra.mxu1 %v8281_v6  ;;  %v8332_v50 = vld [vmem:[#allocation5 + $0x138] sm:$0xff]   ;;  %v1741_v60 = vrot.slane %v8327_v53, 1  ;;  %v8333_v62 = vld [vmem:[#allocation2 + $0x18] sm:$0xff]   ;;  %v8345_v52 = vld [vmem:[#allocation2 + $0x40] sm:$0xff]  }
  0x50   : > { %7623 = vmatprep.subr.bf16.mxu0 %v8282_v7  ;;  %8194 = vmatprep.subr.bf16.mxu1 %v8282_v7  ;;  %v919_v54 = vrot.slane %v917_v46, 1  ;;  %v8329_v56 = vld [vmem:[#allocation2 + $0x10] sm:$0xff]   ;;  %v8322_v63 = vld [vmem:[#allocation2 + $0xb8] sm:$0xff]   ;;  %v938_v6 = vshll.u32 %v8333_v62, 16  ;;  %v8349_v55 = vld [vmem:[#allocation2 + $0x48] sm:$0xff]  }
  0x51   : > { %v930_v1 = vshll.u32 %v8329_v56, 16  ;;  %v8330_v2 = vld [vmem:[#allocation2 + $0x10] sm:$0xff]   ;;  %v1743_v4 = vsel %vm1740_vm1, %v1741_v60, %v1742_v61  ;;  %v934_v5 = vshrl.u32 %v8329_v56, 16  ;;  %v978_v60 = vshll.u32 %v8345_v52, 16 }
  0x52   : > { %v920_v58 = vor.u32 %v919_v54, %v915_v51 }
  0x53   : > { %7624 = vmatpush3.bf16.msra.mxu0 %v8282_v7  ;;  %8202 = vmatpush3.bf16.msra.mxu1 %v8282_v7  ;;  %v8334_v7 = vld [vmem:[#allocation2 + $0x18] sm:$0xff]  }
  0x54   : > { %7625 = vmatprep.subr.bf16.mxu0 %v8283_v8  ;;  %8195 = vmatprep.subr.bf16.mxu1 %v8283_v8  ;;  %v925_v3 = vsel %vm913_vm0, %v920_v58, %v924_v59  ;;  %v8363_v58 = vld [vmem:[#allocation5 + $0xd8] sm:$0xff]  }
  0x57   : > { %7626 = vmatpush3.bf16.msra.mxu0 %v8283_v8  ;;  %8203 = vmatpush3.bf16.msra.mxu1 %v8283_v8  ;;  %v8335_v8 = vld [vmem:[#allocation2 + $0x20] sm:$0xff]  }
  0x58   : > { %7627 = vmatprep.subr.bf16.mxu0 %v8284_v9  ;;  %8196 = vmatprep.subr.bf16.mxu1 %v8284_v9 }
  0x5b   : > { %7628 = vmatpush3.bf16.msra.mxu0 %v8284_v9  ;;  %8204 = vmatpush3.bf16.msra.mxu1 %v8284_v9  ;;  %v928_v9 = vor.u32 %v926_v0, %v924_v59  ;;  %v8364_v59 = vld [vmem:[#allocation5 + $0x118] sm:$0xff]  }
  0x5c   : > { %7677 = vmatprep.subr.bf16.mxu1 %v8289_v10  ;;  %7741 = vmatprep.subr.bf16.mxu0 %v8290_v12 }
  0x5e   : > { %7630 = vmatmul.mubr.bf16.vlgmr.msra.gmra.mxu0 %v8287_v11  ;;  %7654 = vmatmul.mubr.bf16.vlgmr.msra.gmra.mxu1 %v8288_v13  ;;  %v1744_v11 = vrot.slane %v8330_v2, 1  ;;  %v8339_v13 = vld [vmem:[#allocation2 + $0x28] sm:$0xff]  }
  0x5f   : > { %7678 = vmatpush3.bf16.msra.mxu1 %v8289_v10  ;;  %7742 = vmatpush3.bf16.msra.mxu0 %v8290_v12  ;;  %v932_v10 = vrot.slane %v930_v1, 1  ;;  %v942_v12 = vshrl.u32 %v8333_v62, 16  ;;  %v8350_v1 = vld [vmem:[#allocation2 + $0x48] sm:$0xff]  }
  0x60   : > { %7679 = vmatprep.subr.bf16.mxu1 %v8291_v14  ;;  %7633 = vmatprep.mubr.bf16.mxu0 %v8292_v15  ;;  %v940_v15 = vrot.slane %v938_v6, 1  ;;  %v8369_v6 = vld [vmem:[#allocation5 + $0xd0] sm:$0xff]  }
  0x61   : > { %7657 = vmatprep.mubr.bf16.mxu1 %v8293_v16  ;;  %7743 = vmatprep.subr.bf16.mxu0 %v8296_v17  ;;  %v1746_v16 = vrot.slane %v8334_v7, 1  ;;  %v980_v7 = vrot.slane %v978_v60, 1  ;;  %v8362_v60 = vld [vmem:[#allocation2 + $0x70] sm:$0xff]  }
  0x63   : > { %7680 = vmatpush3.bf16.msra.mxu1 %v8291_v14  ;;  %7744 = vmatpush3.bf16.msra.mxu0 %v8296_v17  ;;  %v936_v14 = vor.u32 %v934_v5, %v932_v10  ;;  %v946_v17 = vshll.u32 %v8335_v8, 16  ;;  %v986_v5 = vshll.u32 %v8349_v55, 16 }
  0x64   : > { %7681 = vmatprep.subr.bf16.mxu1 %v8297_v18  ;;  %7745 = vmatprep.subr.bf16.mxu0 %v8298_v20 }
  0x66   : > { %7634 = vmatmul.mubr.bf16.gmra.mxu0 %v8294_v19  ;;  %7658 = vmatmul.mubr.bf16.gmra.mxu1 %v8295_v21  ;;  %v933_v19 = vsel %vm913_vm0, %v928_v9, %v932_v10  ;;  %v8337_v21 = vld [vmem:[#allocation5 + $0xf0] sm:$0xff]  }
  0x67   : > { %7682 = vmatpush3.bf16.msra.mxu1 %v8297_v18  ;;  %7637 = vmatprep.mubr.bf16.mxu0 %v8299_v22  ;;  %v8336_v18 = vld [vmem:[#allocation2 + $0x20] sm:$0xff]   ;;  %v950_v22 = vshrl.u32 %v8335_v8, 16  ;;  %v8351_v8 = vld [vmem:[#allocation2 + $0x50] sm:$0xff]  }
  0x68   : > { %7661 = vmatprep.mubr.bf16.mxu1 %v8300_v23  ;;  %7746 = vmatpush3.bf16.msra.mxu0 %v8298_v20  ;;  %v1745_v20 = vsel %vm1740_vm1, %v1742_v61, %v1744_v11  ;;  %v954_v23 = vshll.u32 %v8339_v13, 16  ;;  %v8346_v61 = vld [vmem:[#allocation2 + $0x40] sm:$0xff]  }
  0x69   : > { %7683 = vmatprep.subr.bf16.mxu1 %v8303_v24  ;;  %7747 = vmatprep.subr.bf16.mxu0 %v8304_v25  ;;  %v8370_v9 = vld [vmem:[#allocation5 + $0x110] sm:$0xff]  }
  0x6b   : > { %7684 = vmatpush3.bf16.msra.mxu1 %v8303_v24  ;;  %v8340_v24 = vld [vmem:[#allocation2 + $0x28] sm:$0xff]  }
  0x6c   : > { %7748 = vmatpush3.bf16.msra.mxu0 %v8304_v25  ;;  %7685 = vmatprep.subr.bf16.mxu1 %v8309_v28  ;;  %v941_v25 = vsel %vm913_vm0, %v936_v14, %v940_v15  ;;  %v988_v14 = vrot.slane %v986_v5, 1  ;;  %v1768_v5 = vrot.slane %v8362_v60, 1 }
  0x6d   : > { %7749 = vmatprep.subr.bf16.mxu0 %v8310_v29 }
  0x6e   : > { %7638 = vmatmul.mubr.bf16.gmra.mxu0 %v8301_v26  ;;  %7662 = vmatmul.mubr.bf16.gmra.mxu1 %v8302_v27  ;;  %v1747_v26 = vsel %vm1740_vm1, %v1744_v11, %v1746_v16  ;;  %v8338_v27 = vld [vmem:[#allocation5 + $0x130] sm:$0xff]   ;;  %v1756_v11 = vrot.slane %v8346_v61, 1 }
  0x6f   : > { %7641 = vmatprep.mubr.bf16.mxu0 %v8305_v30  ;;  %7665 = vmatprep.mubr.bf16.mxu1 %v8306_v31  ;;  %v944_v30 = vor.u32 %v942_v12, %v940_v15  ;;  %v1748_v31 = vrot.slane %v8336_v18, 1  ;;  %v1758_v12 = vrot.slane %v8350_v1, 1  ;;  %v8355_v15 = vld [vmem:[#allocation2 + $0x58] sm:$0xff]  }
  0x70   : > { %7686 = vmatpush3.bf16.msra.mxu1 %v8309_v28  ;;  %7750 = vmatpush3.bf16.msra.mxu0 %v8310_v29  ;;  %v948_v28 = vrot.slane %v946_v17, 1  ;;  %v8341_v29 = vld [vmem:[#allocation2 + $0x30] sm:$0xff]   ;;  %v994_v17 = vshll.u32 %v8351_v8, 16  ;;  %v8366_v1 = vld [vmem:[#allocation2 + $0x78] sm:$0xff]  }
  0x71   : > { %7687 = vmatprep.subr.bf16.mxu1 %v8311_v32  ;;  %7751 = vmatprep.subr.bf16.mxu0 %v8316_v33  ;;  %v1749_v41 = vsel %vm1740_vm1, %v1746_v16, %v1748_v31  ;;  %v966_v46 = vshrl.u32 %v8341_v29, 16  ;;  %v990_v16 = vshrl.u32 %v8349_v55, 16  ;;  %v8365_v55 = vld [vmem:[#allocation2 + $0x78] sm:$0xff]  }
  0x74   : > { %7688 = vmatpush3.bf16.msra.mxu1 %v8311_v32  ;;  %7752 = vmatpush3.bf16.msra.mxu0 %v8316_v33  ;;  %v8833_v32 = vld [vmem:[#allocation2 + $0x38] sm:$0xff]   ;;  %v952_v33 = vor.u32 %v950_v22, %v948_v28 }
  0x75   : > { %7689 = vmatprep.subr.bf16.mxu1 %v8317_v37  ;;  %7753 = vmatprep.subr.bf16.mxu0 %v8318_v38  ;;  %v970_v43 = vshll.u32 %v8833_v32, 16  ;;  %v974_v0 = vshrl.u32 %v8833_v32, 16 }
  0x76   : > { %7642 = vmatmul.mubr.bf16.gmra.mxu0 %v8307_v34  ;;  %7666 = vmatmul.mubr.bf16.gmra.mxu1 %v8308_v35  ;;  %v956_v34 = vrot.slane %v954_v23, 1  ;;  %v1750_v35 = vrot.slane %v8340_v24, 1  ;;  %v1759_v23 = vsel %vm1740_vm1, %v1756_v11, %v1758_v12  ;;  %v1002_v24 = vshll.u32 %v8355_v15, 16 }
  0x77   : > { %7645 = vmatprep.mubr.bf16.mxu0 %v8312_v36  ;;  %7669 = vmatprep.mubr.bf16.mxu1 %v8313_v39  ;;  %v8347_v36 = vld [vmem:[#allocation5 + $0xe8] sm:$0xff]   ;;  %v962_v39 = vshll.u32 %v8341_v29, 16  ;;  %v972_v54 = vrot.slane %v970_v43, 1  ;;  %v992_v29 = vor.u32 %v990_v16, %v988_v14 }
  0x78   : > { %7690 = vmatpush3.bf16.msra.mxu1 %v8317_v37  ;;  %7754 = vmatpush3.bf16.msra.mxu0 %v8318_v38  ;;  %v8348_v37 = vld [vmem:[#allocation5 + $0x128] sm:$0xff]   ;;  %v8342_v38 = vld [vmem:[#allocation2 + $0x30] sm:$0xff]  }
  0x79   : > { %7691 = vmatprep.subr.bf16.mxu1 %v8323_v40  ;;  %7755 = vmatprep.subr.bf16.mxu0 %v8324_v42  ;;  %v964_v51 = vrot.slane %v962_v39, 1  ;;  %v976_v10 = vor.u32 %v974_v0, %v972_v54  ;;  %v1034_v0 = vshll.u32 %v8365_v55, 16 }
  0x7b   : > { %v968_v56 = vor.u32 %v966_v46, %v964_v51  ;;  %v981_v18 = vsel %vm913_vm0, %v976_v10, %v980_v7 }
  0x7c   : > { %7692 = vmatpush3.bf16.msra.mxu1 %v8323_v40  ;;  %7756 = vmatpush3.bf16.msra.mxu0 %v8324_v42  ;;  %v949_v40 = vsel %vm913_vm0, %v944_v30, %v948_v28  ;;  %v958_v42 = vshrl.u32 %v8339_v13, 16  ;;  %v8359_v28 = vld [vmem:[#allocation2 + $0x68] sm:$0xff]  }
  0x7d   : > { %7805 = vmatprep.subr.bf16.mxu1 %v8823_v47  ;;  %7869 = vmatprep.subr.bf16.mxu0 %v8332_v50  ;;  %v973_v2 = vsel %vm913_vm0, %v968_v56, %v972_v54 }
  0x7e   : > { %7646 = vmatmul.mubr.bf16.gmra.mxu0 %v8314_v44  ;;  %7670 = vmatmul.mubr.bf16.gmra.mxu1 %v8315_v45  ;;  %v957_v44 = vsel %vm913_vm0, %v952_v33, %v956_v34  ;;  %v1751_v45 = vsel %vm1740_vm1, %v1748_v31, %v1750_v35  ;;  %v960_v53 = vor.u32 %v958_v42, %v956_v34  ;;  %v8379_v31 = vld [vmem:[#allocation5 + $0xc8] sm:$0xff]   ;;  %v1004_v33 = vrot.slane %v1002_v24, 1 }
  0x7f   : > { %7649 = vmatprep.mubr.bf16.mxu0 %v8319_v48  ;;  %7673 = vmatprep.mubr.bf16.mxu1 %v8320_v49  ;;  %v1752_v48 = vrot.slane %v8342_v38, 1  ;;  %v8353_v49 = vld [vmem:[#allocation5 + $0xe0] sm:$0xff]   ;;  %v1018_v38 = vshll.u32 %v8359_v28, 16 }
  0x80   : > { %v965_v62 = vsel %vm913_vm0, %v960_v53, %v964_v51  ;;  %v8386_v51 = vld [vmem:[#allocation5 + $0x100] sm:$0xff]  }
  0x86   : > { %7650 = vmatmul.mubr.bf16.gmra.mxu0 %v8321_v57  ;;  %7674 = vmatmul.mubr.bf16.gmra.mxu1 %v8322_v63  ;;  %v1753_v63 = vsel %vm1740_vm1, %v1750_v35, %v1752_v48  ;;  %v8358_v35 = vld [vmem:[#allocation2 + $0x60] sm:$0xff]  }
  0x87   : > { %7693 = vmatprep.mubr.bf16.mxu1 %v925_v3  ;;  %7757 = vmatprep.mubr.bf16.mxu0 %v1743_v4  ;;  %v982_v4 = vshrl.u32 %v8345_v52, 16  ;;  %v1764_v46 = vrot.slane %v8358_v35, 1 }
  0x89   : > { %v984_v13 = vor.u32 %v982_v4, %v980_v7  ;;  %v1036_v7 = vrot.slane %v1034_v0, 1 }
  0x8b   : > { %v989_v22 = vsel %vm913_vm0, %v984_v13, %v988_v14  ;;  %v1038_v14 = vshrl.u32 %v8365_v55, 16 }
  0x8d   : > { %v1040_v24 = vor.u32 %v1038_v14, %v1036_v7 }
  0x8e   : > { %7694 = vmatmul.mubr.bf16.vlgmr.msra.gmra.mxu1 %v933_v19  ;;  %7758 = vmatmul.mubr.bf16.vlgmr.msra.gmra.mxu0 %v1745_v20  ;;  %v8352_v20 = vld [vmem:[#allocation2 + $0x50] sm:$0xff]  }
  0x8f   : > { %7806 = vmatpush3.bf16.msra.mxu1 %v8823_v47  ;;  %7870 = vmatpush3.bf16.msra.mxu0 %v8332_v50  ;;  %v8344_v47 = vld [vmem:[#allocation2 + $0x38] sm:$0xff]   ;;  %v1760_v30 = vrot.slane %v8352_v20, 1  ;;  %v8861_v20 = vld [vmem:[#allocation5 + $0x178] sm:$0xff]  }
  0x90   : > { %7697 = vmatprep.mubr.bf16.mxu1 %v941_v25  ;;  %7761 = vmatprep.mubr.bf16.mxu0 %v1747_v26  ;;  %v8354_v50 = vld [vmem:[#allocation5 + $0x120] sm:$0xff]   ;;  %v1754_v57 = vrot.slane %v8344_v47, 1  ;;  %v996_v26 = vrot.slane %v994_v17, 1 }
  0x91   : > { %7807 = vmatprep.subr.bf16.mxu1 %v8337_v21  ;;  %7871 = vmatprep.subr.bf16.mxu0 %v8338_v27  ;;  %v8356_v25 = vld [vmem:[#allocation2 + $0x58] sm:$0xff]  }
  0x92   : > { %v1755_v3 = vsel %vm1740_vm1, %v1752_v48, %v1754_v57  ;;  %v1757_v19 = vsel %vm1740_vm1, %v1754_v57, %v1756_v11  ;;  %v1762_v34 = vrot.slane %v8356_v25, 1  ;;  %v997_v39 = vsel %vm913_vm0, %v992_v29, %v996_v26  ;;  %v8385_v47 = vld [vmem:[#allocation5 + $0xc0] sm:$0xff]   ;;  %v8368_v11 = vld [vmem:[#allocation2 + $0x80] sm:$0xff]  }
  0x93   : > { %7808 = vmatpush3.bf16.msra.mxu1 %v8337_v21  ;;  %7872 = vmatpush3.bf16.msra.mxu0 %v8338_v27  ;;  %v998_v21 = vshrl.u32 %v8351_v8, 16  ;;  %v8357_v27 = vld [vmem:[#allocation2 + $0x60] sm:$0xff]   ;;  %v1770_v8 = vrot.slane %v8366_v1, 1  ;;  %v1772_v25 = vrot.slane %v8368_v11, 1  ;;  %v8375_v29 = vld [vmem:[#allocation2 + $0x98] sm:$0xff]  }
  0x94   : > { %7809 = vmatprep.subr.bf16.mxu1 %v8347_v36  ;;  %7873 = vmatprep.subr.bf16.mxu0 %v8348_v37  ;;  %v1763_v43 = vsel %vm1740_vm1, %v1760_v30, %v1762_v34  ;;  %v8393_v11 = vld [vmem:[#allocation2 + $0x8] sm:$0xfe]  }
  0x95   : > { %v1000_v32 = vor.u32 %v998_v21, %v996_v26  ;;  %v1771_v17 = vsel %vm1740_vm1, %v1768_v5, %v1770_v8  ;;  %v8863_v21 = vld [vmem:[#allocation5 + $0x1b8] sm:$0xff]  }
  0x96   : > { %7698 = vmatmul.mubr.bf16.gmra.mxu1 %v949_v40  ;;  %7762 = vmatmul.mubr.bf16.gmra.mxu0 %v1749_v41  ;;  %v1761_v40 = vsel %vm1740_vm1, %v1758_v12, %v1760_v30  ;;  %v1006_v41 = vshrl.u32 %v8355_v15, 16  ;;  %v8372_v15 = vld [vmem:[#allocation2 + $0x88] sm:$0xff]  }
  0x97   : > { %7701 = vmatprep.mubr.bf16.mxu1 %v957_v44  ;;  %7765 = vmatprep.mubr.bf16.mxu0 %v1751_v45  ;;  %v1005_v42 = vsel %vm913_vm0, %v1000_v32, %v1004_v33  ;;  %v1014_v44 = vshrl.u32 %v8357_v27, 16  ;;  %v8360_v45 = vld [vmem:[#allocation2 + $0x68] sm:$0xff]   ;;  %v1774_v26 = vrot.slane %v8372_v15, 1  ;;  %v1773_v32 = vsel %vm1740_vm1, %v1770_v8, %v1772_v25  ;;  %v8394_v8 = vld [vmem:[#allocation2 + $0x10] sm:$0xff]  }
  0x98   : > { %7810 = vmatpush3.bf16.msra.mxu1 %v8347_v36  ;;  %7874 = vmatpush3.bf16.msra.mxu0 %v8348_v37  ;;  %v8380_v36 = vld [vmem:[#allocation5 + $0x108] sm:$0xff]   ;;  %v1010_v37 = vshll.u32 %v8357_v27, 16  ;;  %v1008_v52 = vor.u32 %v1006_v41, %v1004_v33  ;;  %v1766_v54 = vrot.slane %v8360_v45, 1 }
  0x99   : > { %7811 = vmatprep.subr.bf16.mxu1 %v8353_v49  ;;  %7875 = vmatprep.subr.bf16.mxu0 %v8354_v50  ;;  %v8377_v41 = vld [vmem:[#allocation2 + $0xa0] sm:$0xff]  }
  0x9a   : > { %v1012_v48 = vrot.slane %v1010_v37, 1  ;;  %v1769_v13 = vsel %vm1740_vm1, %v1766_v54, %v1768_v5  ;;  %v1775_v37 = vsel %vm1740_vm1, %v1772_v25, %v1774_v26  ;;  %v8389_v15 = vld [vmem:[#allocation2 + $0xc0] ss:$0 sps:$4 sm:$0x11]   ;;  %v3109_v25 = vshrl.u32 %v8394_v8, 16 }
  0x9c   : > { %7812 = vmatpush3.bf16.msra.mxu1 %v8353_v49  ;;  %7876 = vmatpush3.bf16.msra.mxu0 %v8354_v50  ;;  %v1020_v49 = vrot.slane %v1018_v38, 1  ;;  %v8361_v50 = vld [vmem:[#allocation2 + $0x70] sm:$0xff]   ;;  %v1016_v53 = vor.u32 %v1014_v44, %v1012_v48  ;;  %v1013_v57 = vsel %vm913_vm0, %v1008_v52, %v1012_v48  ;;  %v1066_v38 = vshll.u32 %v8375_v29, 16  ;;  %v8378_v52 = vld [vmem:[#allocation2 + $0xa0] sm:$0xff]  }
  0x9d   : > { %7813 = vmatprep.subr.bf16.mxu1 %v8363_v58  ;;  %7877 = vmatprep.subr.bf16.mxu0 %v8364_v59  ;;  %v1026_v56 = vshll.u32 %v8361_v50, 16  ;;  %v1074_v48 = vshll.u32 %v8377_v41, 16 }
  0x9e   : > { %7702 = vmatmul.mubr.bf16.gmra.mxu1 %v965_v62  ;;  %7766 = vmatmul.mubr.bf16.gmra.mxu0 %v1753_v63  ;;  %v1021_v61 = vsel %vm913_vm0, %v1016_v53, %v1020_v49  ;;  %v1767_v62 = vsel %vm1740_vm1, %v1764_v46, %v1766_v54  ;;  %v1030_v63 = vshrl.u32 %v8361_v50, 16  ;;  %v1068_v45 = vrot.slane %v1066_v38, 1  ;;  %v8382_v54 = vld [vmem:[#allocation2 + $0xa8] sm:$0xff]  }
  0x9f   : > { %7705 = vmatprep.mubr.bf16.mxu1 %v973_v2  ;;  %7769 = vmatprep.mubr.bf16.mxu0 %v1755_v3  ;;  %v1028_v2 = vrot.slane %v1026_v56, 1  ;;  %v8367_v3 = vld [vmem:[#allocation2 + $0x80] sm:$0xff]   ;;  %v1078_v53 = vshrl.u32 %v8377_v41, 16  ;;  %v1076_v60 = vrot.slane %v1074_v48, 1 }
  0xa0   : > { %7814 = vmatpush3.bf16.msra.mxu1 %v8363_v58  ;;  %7878 = vmatpush3.bf16.msra.mxu0 %v8364_v59  ;;  %v1765_v58 = vsel %vm1740_vm1, %v1762_v34, %v1764_v46  ;;  %v1022_v59 = vshrl.u32 %v8359_v28, 16  ;;  %v1042_v10 = vshll.u32 %v8367_v3, 16  ;;  %v8374_v34 = vld [vmem:[#allocation2 + $0x90] sm:$0xff]   ;;  %v8400_v41 = vld [vmem:[#allocation2 + $0x20] sm:$0xff]  }
  0xa1   : > { %7815 = vmatprep.subr.bf16.mxu1 %v8369_v6  ;;  %7879 = vmatprep.subr.bf16.mxu0 %v8370_v9  ;;  %v1080_v0 = vor.u32 %v1078_v53, %v1076_v60  ;;  %v8402_v53 = vld [vmem:[#allocation2 + $0x28] sm:$0xff]  }
  0xa2   : > { %v1024_v4 = vor.u32 %v1022_v59, %v1020_v49  ;;  %v8384_v59 = vld [vmem:[#allocation2 + $0xb0] sm:$0xff]  }
  0xa4   : > { %7816 = vmatpush3.bf16.msra.mxu1 %v8369_v6  ;;  %7880 = vmatpush3.bf16.msra.mxu0 %v8370_v9  ;;  %v1032_v6 = vor.u32 %v1030_v63, %v1028_v2  ;;  %v8371_v9 = vld [vmem:[#allocation2 + $0x88] sm:$0xff]   ;;  %v1029_v12 = vsel %vm913_vm0, %v1024_v4, %v1028_v2  ;;  %v1780_v63 = vrot.slane %v8378_v52, 1  ;;  %v1782_v2 = vrot.slane %v8382_v54, 1  ;;  %v8875_v4 = vld [vmem:[#allocation2 + $0xb8] sm:$0xff]  }
  0xa5   : > { %7817 = vmatprep.subr.bf16.mxu1 %v8379_v31  ;;  %7881 = vmatprep.subr.bf16.mxu0 %v8380_v36  ;;  %v1054_v33 = vshrl.u32 %v8371_v9, 16  ;;  %v3130_v52 = vshll.u32 %v8400_v41, 16  ;;  %v8395_v54 = vld [vmem:[#allocation2 + $0x18] sm:$0xff]  }
  0xa6   : > { %7706 = vmatmul.mubr.bf16.gmra.mxu1 %v981_v18  ;;  %7770 = vmatmul.mubr.bf16.gmra.mxu0 %v1757_v19  ;;  %v1037_v16 = vsel %vm913_vm0, %v1032_v6, %v1036_v7  ;;  %v1046_v18 = vshrl.u32 %v8367_v3, 16  ;;  %v1050_v19 = vshll.u32 %v8371_v9, 16  ;;  %v1784_v6 = vrot.slane %v8384_v59, 1 }
  0xa7   : > { %7709 = vmatprep.mubr.bf16.mxu1 %v989_v22  ;;  %7773 = vmatprep.mubr.bf16.mxu0 %v1759_v23  ;;  %v1044_v22 = vrot.slane %v1042_v10, 1  ;;  %v8373_v23 = vld [vmem:[#allocation2 + $0x90] sm:$0xff]  }
  0xa8   : > { %7818 = vmatpush3.bf16.msra.mxu1 %v8379_v31  ;;  %7882 = vmatpush3.bf16.msra.mxu0 %v8380_v36  ;;  %v1052_v28 = vrot.slane %v1050_v19, 1  ;;  %v1058_v30 = vshll.u32 %v8373_v23, 16  ;;  %v1062_v35 = vshrl.u32 %v8373_v23, 16  ;;  %v3101_v23 = vshrl.u32 %v8393_v11, 16 }
  0xa9   : > { %7819 = vmatprep.subr.bf16.mxu1 %v8385_v47  ;;  %7883 = vmatprep.subr.bf16.mxu0 %v8386_v51  ;;  %v1048_v27 = vor.u32 %v1046_v18, %v1044_v22  ;;  %v1045_v31 = vsel %vm913_vm0, %v1040_v24, %v1044_v22  ;;  %v3104_v24 = vshll.u32 %v8393_v11, 16  ;;  %v8890_v11 = vld [vmem:[#allocation2 + $0x30] sm:$0xff]  }
  0xab   : > { %v1053_v36 = vsel %vm913_vm0, %v1048_v27, %v1052_v28 }
  0xac   : > { %7820 = vmatpush3.bf16.msra.mxu1 %v8385_v47  ;;  %7884 = vmatpush3.bf16.msra.mxu0 %v8386_v51  ;;  %v8381_v47 = vld [vmem:[#allocation2 + $0xa8] sm:$0xff]   ;;  %v1070_v51 = vshrl.u32 %v8375_v29, 16 }
  0xad   : > { %7933 = vmatprep.subr.bf16.mxu1 %v8861_v20  ;;  %7997 = vmatprep.subr.bf16.mxu0 %v8863_v21  ;;  %v1086_v5 = vshrl.u32 %v8381_v47, 16  ;;  %v8391_v29 = vld [vmem:[#allocation2 + $0x8] sm:$0xfe]  }
  0xae   : > { %7710 = vmatmul.mubr.bf16.gmra.mxu1 %v997_v39  ;;  %7774 = vmatmul.mubr.bf16.gmra.mxu0 %v1761_v40  ;;  %v8376_v39 = vld [vmem:[#allocation2 + $0x98] sm:$0xff]   ;;  %v1060_v40 = vrot.slane %v1058_v30, 1  ;;  %v1785_v30 = vsel %vm1740_vm1, %v1782_v2, %v1784_v6 }
  0xaf   : > { %7713 = vmatprep.mubr.bf16.mxu1 %v1005_v42  ;;  %7777 = vmatprep.mubr.bf16.mxu0 %v1763_v43  ;;  %v1056_v42 = vor.u32 %v1054_v33, %v1052_v28  ;;  %v1776_v43 = vrot.slane %v8374_v34, 1  ;;  %v1778_v46 = vrot.slane %v8376_v39, 1  ;;  %v8390_v28 = vld [vmem:[#allocation2 + $0xc0] ss:$0 sps:$4 sm:$0x11]   ;;  %v8392_v34 = vld [vmem:[#allocation2 + $0x10] sm:$0xff]  }
  0xb0   : > { %v1064_v44 = vor.u32 %v1062_v35, %v1060_v40  ;;  %v3103_v35 = vrot.slane %v3101_v23, 1  ;;  %v2421_v48 = vrot.slane %v8392_v34, 1  ;;  %v8403_v23 = vld [vmem:[#allocation5 + $0x170] sm:$0xff]   ;;  %v8414_v34 = vld [vmem:[#allocation5 + $0x1a8] sm:$0xff]  }
  0xb1   : > { %v1061_v49 = vsel %vm913_vm0, %v1056_v42, %v1060_v40  ;;  %v1777_v50 = vsel %vm1740_vm1, %v1774_v26, %v1776_v43  ;;  %v1779_v56 = vsel %vm1740_vm1, %v1776_v43, %v1778_v46  ;;  %v1781_v10 = vsel %vm1740_vm1, %v1778_v46, %v1780_v63 }
  0xb2   : > { %v1069_v55 = vsel %vm913_vm0, %v1064_v44, %v1068_v45  ;;  %v3112_v26 = vshll.u32 %v8394_v8, 16  ;;  %v3106_v40 = vrot.slane %v3104_v24, 2  ;;  %v1788_v43 = vrot.slane %v8390_v28, 1  ;;  %v8404_v24 = vld [vmem:[#allocation5 + $0x1b0] sm:$0xff]  }
  0xb3   : > { %v2429_v28 = vrot.slane %v8890_v11, 1 }
  0xb6   : > { %7714 = vmatmul.mubr.bf16.gmra.mxu1 %v1013_v57  ;;  %7778 = vmatmul.mubr.bf16.gmra.mxu0 %v1765_v58  ;;  %v1082_v57 = vshll.u32 %v8381_v47, 16  ;;  %v8383_v58 = vld [vmem:[#allocation2 + $0xb0] sm:$0xff]   ;;  %v2420_v47 = vrot.slane %v8391_v29, 1 }
  0xb7   : > { %7717 = vmatprep.mubr.bf16.mxu1 %v1021_v61  ;;  %7781 = vmatprep.mubr.bf16.mxu0 %v1767_v62  ;;  %v8387_v61 = vld [vmem:[#allocation2 + $0xb8] sm:$0xff]   ;;  %v1072_v62 = vor.u32 %v1070_v51, %v1068_v45  ;;  %v1090_v3 = vshll.u32 %v8383_v58, 16  ;;  %v1094_v14 = vshrl.u32 %v8383_v58, 16  ;;  %v3127_v51 = vshrl.u32 %v8400_v41, 16 }
  0xb8   : > { %v1084_v1 = vrot.slane %v1082_v57, 1  ;;  %v1098_v7 = vshll.u32 %v8387_v61, 16  ;;  %v1102_v22 = vshrl.u32 %v8387_v61, 16  ;;  %v8406_v57 = vld [vmem:[#allocation2 + $0x30] sm:$0xff]  }
  0xb9   : > { %v1077_v9 = vsel %vm913_vm0, %v1072_v62, %v1076_v60  ;;  %v2422_v60 = vsel %vm1740_vm1, %v2420_v47, %v2421_v48  ;;  %v8399_v62 = vld [vmem:[#allocation2 + $0x20] sm:$0xff]   ;;  %v8420_v47 = vld [vmem:[#allocation5 + $0x1a0] sm:$0xff]  }
  0xba   : > { %v1088_v18 = vor.u32 %v1086_v5, %v1084_v1  ;;  %v1100_v19 = vrot.slane %v1098_v7, 1  ;;  %v3145_v5 = vshrl.u32 %v8406_v57, 16  ;;  %v2425_v7 = vrot.slane %v8399_v62, 1 }
  0xbc   : > { %v1104_v46 = vor.u32 %v1102_v22, %v1100_v19 }
  0xbe   : > { %7718 = vmatmul.mubr.bf16.gmra.mxu1 %v1029_v12  ;;  %7782 = vmatmul.mubr.bf16.gmra.mxu0 %v1769_v13  ;;  %v1085_v12 = vsel %vm913_vm0, %v1080_v0, %v1084_v1  ;;  %v1783_v13 = vsel %vm1740_vm1, %v1780_v63, %v1782_v2  ;;  %v3129_v63 = vrot.slane %v3127_v51, 1  ;;  %v3132_v0 = vrot.slane %v3130_v52, 2 }
  0xbf   : > { %7721 = vmatprep.mubr.bf16.mxu1 %v1037_v16  ;;  %7785 = vmatprep.mubr.bf16.mxu0 %v1771_v17  ;;  %v1092_v16 = vrot.slane %v1090_v3, 1  ;;  %v1786_v17 = vrot.slane %v8875_v4, 1  ;;  %v3136_v1 = vshrl.u32 %v8402_v53, 16  ;;  %v2423_v2 = vrot.slane %v8395_v54, 1  ;;  %v8411_v54 = vld [vmem:[#allocation2 + $0x48] sm:$0xff]  }
  0xc0   : > { %v3139_v3 = vshll.u32 %v8402_v53, 16  ;;  %v3133_v8 = vor.u32 %v3132_v0, %v3129_v63  ;;  %v8418_v0 = vld [vmem:[#allocation2 + $0x58] sm:$0xff]  }
  0xc1   : > { %v1096_v27 = vor.u32 %v1094_v14, %v1092_v16  ;;  %v1093_v33 = vsel %vm913_vm0, %v1088_v18, %v1092_v16  ;;  %v1787_v39 = vsel %vm1740_vm1, %v1784_v6, %v1786_v17  ;;  %v1789_v59 = vsel %vm1740_vm1, %v1786_v17, %v1788_v43  ;;  %v8410_v18 = vld [vmem:[#allocation2 + $0x40] sm:$0xff]  }
  0xc2   : > { %v3148_v6 = vshll.u32 %v8406_v57, 16  ;;  %v3147_v16 = vrot.slane %v3145_v5, 1  ;;  %v8430_v57 = vld [vmem:[#allocation5 + $0x198] sm:$0xff]   ;;  %v8435_v5 = vld [vmem:[#allocation5 + $0x150] sm:$0xff]   ;;  %v3193_v11 = vshll.u32 %v8418_v0, 16 }
  0xc3   : > { %v1101_v38 = vsel %vm913_vm0, %v1096_v27, %v1100_v19  ;;  %v2426_v19 = vsel %vm1740_vm1, %v2423_v2, %v2425_v7 }
  0xc4   : > { %v3150_v17 = vrot.slane %v3148_v6, 2  ;;  %v8436_v6 = vld [vmem:[#allocation5 + $0x190] sm:$0xff]  }
  0xc6   : > { %7722 = vmatmul.mubr.bf16.gmra.mxu1 %v1045_v31  ;;  %7786 = vmatmul.mubr.bf16.gmra.mxu0 %v1773_v32  ;;  %v1106_v31 = vshll.u32 %v8389_v15, 16  ;;  %v8396_v32 = vld [vmem:[#allocation2 + $0x18] sm:$0xff]   ;;  %v3141_v15 = vrot.slane %v3139_v3, 2 }
  0xc7   : > { %7725 = vmatprep.mubr.bf16.mxu1 %v1053_v36  ;;  %7789 = vmatprep.mubr.bf16.mxu0 %v1775_v37  ;;  %v3111_v36 = vrot.slane %v3109_v25, 1  ;;  %v3114_v37 = vrot.slane %v3112_v26, 2  ;;  %v3118_v44 = vshrl.u32 %v8396_v32, 16  ;;  %v3121_v45 = vshll.u32 %v8396_v32, 16 }
  0xc8   : > { %v1108_v42 = vrot.slane %v1106_v31, 1  ;;  %v3163_v31 = vshrl.u32 %v8410_v18, 16  ;;  %v3166_v32 = vshll.u32 %v8410_v18, 16  ;;  %v8446_v18 = vld [vmem:[#allocation5 + $0x188] sm:$0xff]  }
  0xca   : > { %v1109_v58 = vsel %vm913_vm0, %v1104_v46, %v1108_v42  ;;  %v3165_v43 = vrot.slane %v3163_v31, 1 }
  0xce   : > { %7726 = vmatmul.mubr.bf16.gmra.mxu1 %v1061_v49  ;;  %7790 = vmatmul.mubr.bf16.gmra.mxu0 %v1777_v50  ;;  %v3107_v49 = vor.u32 %v3106_v40, %v3103_v35  ;;  %v3115_v50 = vor.u32 %v3114_v37, %v3111_v36  ;;  %v8407_v35 = vld [vmem:[#allocation2 + $0x38] sm:$0xff]   ;;  %v8899_v37 = vld [vmem:[#allocation2 + $0x40] sm:$0xff]   ;;  %v8416_v40 = vld [vmem:[#allocation2 + $0x50] sm:$0xff]  }
  0xcf   : > { %7729 = vmatprep.mubr.bf16.mxu1 %v1069_v55  ;;  %7793 = vmatprep.mubr.bf16.mxu0 %v1779_v56  ;;  %v3120_v55 = vrot.slane %v3118_v44, 1  ;;  %v3123_v56 = vrot.slane %v3121_v45, 2  ;;  %v3168_v44 = vrot.slane %v3166_v32, 2  ;;  %v8419_v45 = vld [vmem:[#allocation5 + $0x160] sm:$0xff]   ;;  %v2431_v46 = vrot.slane %v8407_v35, 1 }
  0xd0   : > { %v3116_v61 = vsel %vm3099_vm2, %v3107_v49, %v3115_v50  ;;  %v2433_v51 = vrot.slane %v8899_v37, 1  ;;  %v3181_v52 = vshrl.u32 %v8416_v40, 16  ;;  %v8451_v32 = vld [vmem:[#allocation5 + $0x140] sm:$0xff]   ;;  %v8423_v37 = vld [vmem:[#allocation2 + $0x68] sm:$0xff]  }
  0xd1   : > { %v3124_v4 = vor.u32 %v3123_v56, %v3120_v55  ;;  %v3169_v53 = vor.u32 %v3168_v44, %v3165_v43  ;;  %v3184_v55 = vshll.u32 %v8416_v40, 16  ;;  %v8429_v56 = vld [vmem:[#allocation5 + $0x158] sm:$0xff]  }
  0xd2   : > { %v3183_v63 = vrot.slane %v3181_v52, 1  ;;  %v8924_v44 = vld [vmem:[#allocation5 + $0x238] sm:$0xff]   ;;  %v8432_v52 = vld [vmem:[#allocation2 + $0x80] sm:$0xff]  }
  0xd3   : > { %v3125_v14 = vsel %vm3099_vm2, %v3115_v50, %v3124_v4  ;;  %v3134_v22 = vsel %vm3099_vm2, %v3124_v4, %v3133_v8  ;;  %v3186_v4 = vrot.slane %v3184_v55, 2 }
  0xd6   : > { %7730 = vmatmul.mubr.bf16.gmra.mxu1 %v1077_v9  ;;  %7794 = vmatmul.mubr.bf16.gmra.mxu0 %v1781_v10  ;;  %v8401_v9 = vld [vmem:[#allocation2 + $0x28] sm:$0xff]   ;;  %v3138_v10 = vrot.slane %v3136_v1, 1  ;;  %v8422_v1 = vld [vmem:[#allocation2 + $0x60] sm:$0xff]  }
  0xd7   : > { %7733 = vmatprep.mubr.bf16.mxu1 %v1085_v12  ;;  %7797 = vmatprep.mubr.bf16.mxu0 %v1783_v13  ;;  %v8408_v12 = vld [vmem:[#allocation2 + $0x38] sm:$0xff]   ;;  %v2424_v13 = vsel %vm1740_vm1, %v2421_v48, %v2423_v2  ;;  %v2427_v26 = vrot.slane %v8401_v9, 1  ;;  %v2434_v2 = vsel %vm1740_vm1, %v2431_v46, %v2433_v51 }
  0xd8   : > { %v3154_v25 = vshrl.u32 %v8408_v12, 16  ;;  %v3142_v27 = vor.u32 %v3141_v15, %v3138_v10  ;;  %v3157_v29 = vshll.u32 %v8408_v12, 16  ;;  %v8417_v9 = vld [vmem:[#allocation2 + $0x58] sm:$0xff]   ;;  %v3190_v10 = vshrl.u32 %v8418_v0, 16  ;;  %v8434_v0 = vld [vmem:[#allocation2 + $0x88] sm:$0xff]  }
  0xd9   : > { %v2430_v41 = vsel %vm1740_vm1, %v2427_v26, %v2429_v28  ;;  %v3199_v12 = vshrl.u32 %v8422_v1, 16  ;;  %v3187_v15 = vor.u32 %v3186_v4, %v3183_v63  ;;  %v2439_v31 = vrot.slane %v8417_v9, 1  ;;  %v8438_v4 = vld [vmem:[#allocation2 + $0x90] sm:$0xff]  }
  0xda   : > { %v3156_v36 = vrot.slane %v3154_v25, 1  ;;  %v3195_v25 = vrot.slane %v3193_v11, 2  ;;  %v3244_v11 = vshrl.u32 %v8434_v0, 16 }
  0xde   : > { %7734 = vmatmul.mubr.bf16.gmra.mxu1 %v1093_v33  ;;  %7798 = vmatmul.mubr.bf16.gmra.mxu0 %v1785_v30  ;;  %v3151_v30 = vor.u32 %v3150_v17, %v3147_v16  ;;  %v8413_v33 = vld [vmem:[#allocation5 + $0x168] sm:$0xff]  }
  0xdf   : > { %7737 = vmatprep.mubr.bf16.mxu1 %v1101_v38  ;;  %7801 = vmatprep.mubr.bf16.mxu0 %v1787_v39  ;;  %v3143_v38 = vsel %vm3099_vm2, %v3133_v8, %v3142_v27  ;;  %v3159_v39 = vrot.slane %v3157_v29, 2  ;;  %v8913_v16 = vld [vmem:[#allocation2 + $0x60] sm:$0xff]  }
  0xe0   : > { %v3152_v42 = vsel %vm3099_vm2, %v3142_v27, %v3151_v30  ;;  %v8445_v17 = vld [vmem:[#allocation5 + $0x148] sm:$0xff]  }
  0xe1   : > { %v3160_v50 = vor.u32 %v3159_v39, %v3156_v36  ;;  %v8920_v39 = vld [vmem:[#allocation2 + $0x70] sm:$0xff]  }
  0xe3   : > { %v3161_v62 = vsel %vm3099_vm2, %v3151_v30, %v3160_v50  ;;  %v3170_v3 = vsel %vm3099_vm2, %v3160_v50, %v3169_v53 }
  0xe6   : > { %7738 = vmatmul.mubr.bf16.gmra.mxu1 %v1109_v58  ;;  %7802 = vmatmul.mubr.bf16.gmra.mxu0 %v1789_v59 }
  0xe7   : > { %7821 = vmatprep.mubr.bf16.mxu1 %v2422_v60  ;;  %7885 = vmatprep.mubr.bf16.mxu0 %v3116_v61  ;;  %v8906_v60 = vld [vmem:[#allocation2 + $0x50] sm:$0xff]   ;;  %v2432_v61 = vsel %vm1740_vm1, %v2429_v28, %v2431_v46 }
  0xe8   : > { %v8426_v28 = vld [vmem:[#allocation2 + $0x70] sm:$0xff]  }
  0xe9   : > { %v3220_v40 = vshll.u32 %v8426_v28, 16 }
  0xee   : > { %7822 = vmatmul.mubr.bf16.vlgmr.msra.gmra.mxu1 %v2424_v13  ;;  %7886 = vmatmul.mubr.bf16.vlgmr.msra.gmra.mxu0 %v3125_v14  ;;  %v3202_v13 = vshll.u32 %v8422_v1, 16  ;;  %v2437_v14 = vrot.slane %v8906_v60, 1  ;;  %v3235_v60 = vshrl.u32 %v8432_v52, 16 }
  0xef   : > { %7934 = vmatpush3.bf16.msra.mxu1 %v8861_v20  ;;  %7998 = vmatpush3.bf16.msra.mxu0 %v8863_v21  ;;  %v8412_v20 = vld [vmem:[#allocation2 + $0x48] sm:$0xff]   ;;  %v2428_v21 = vsel %vm1740_vm1, %v2425_v7, %v2427_v26  ;;  %v2435_v7 = vrot.slane %v8411_v54, 1  ;;  %v3201_v26 = vrot.slane %v3199_v12, 1  ;;  %v2445_v54 = vrot.slane %v8920_v39, 1 }
  0xf0   : > { %7825 = vmatprep.mubr.bf16.mxu1 %v2426_v19  ;;  %7889 = vmatprep.mubr.bf16.mxu0 %v3134_v22  ;;  %v3172_v48 = vshrl.u32 %v8412_v20, 16  ;;  %v3175_v49 = vshll.u32 %v8412_v20, 16  ;;  %v3204_v27 = vrot.slane %v3202_v13, 2  ;;  %v3247_v13 = vshll.u32 %v8434_v0, 16 }
  0xf1   : > { %7935 = vmatprep.subr.bf16.mxu1 %v8403_v23  ;;  %7999 = vmatprep.subr.bf16.mxu0 %v8404_v24  ;;  %v2436_v19 = vsel %vm1740_vm1, %v2433_v51, %v2435_v7  ;;  %v2438_v29 = vsel %vm1740_vm1, %v2435_v7, %v2437_v14  ;;  %v3222_v51 = vrot.slane %v3220_v40, 2  ;;  %v3237_v7 = vrot.slane %v3235_v60, 1 }
  0xf2   : > { %v3174_v58 = vrot.slane %v3172_v48, 1  ;;  %v3177_v59 = vrot.slane %v3175_v49, 2 }
  0xf3   : > { %7936 = vmatpush3.bf16.msra.mxu1 %v8403_v23  ;;  %8000 = vmatpush3.bf16.msra.mxu0 %v8404_v24  ;;  %v8424_v23 = vld [vmem:[#allocation2 + $0x68] sm:$0xff]   ;;  %v3192_v24 = vrot.slane %v3190_v10, 1 }
  0xf4   : > { %7937 = vmatprep.subr.bf16.mxu1 %v8413_v33  ;;  %8001 = vmatprep.subr.bf16.mxu0 %v8414_v34  ;;  %v3178_v8 = vor.u32 %v3177_v59, %v3174_v58  ;;  %v3208_v35 = vshrl.u32 %v8424_v23, 16  ;;  %v3211_v20 = vshll.u32 %v8424_v23, 16 }
  0xf5   : > { %v3196_v36 = vor.u32 %v3195_v25, %v3192_v24  ;;  %v3249_v25 = vrot.slane %v3247_v13, 2 }
  0xf6   : > { %7826 = vmatmul.mubr.bf16.gmra.mxu1 %v2428_v21  ;;  %7890 = vmatmul.mubr.bf16.gmra.mxu0 %v3143_v38  ;;  %v3179_v22 = vsel %vm3099_vm2, %v3169_v53, %v3178_v8  ;;  %v3188_v30 = vsel %vm3099_vm2, %v3178_v8, %v3187_v15  ;;  %v3217_v21 = vshrl.u32 %v8426_v28, 16  ;;  %v3205_v38 = vor.u32 %v3204_v27, %v3201_v26 }
  0xf7   : > { %7829 = vmatprep.mubr.bf16.mxu1 %v2430_v41  ;;  %7893 = vmatprep.mubr.bf16.mxu0 %v3152_v42  ;;  %v8428_v41 = vld [vmem:[#allocation2 + $0x78] sm:$0xff]   ;;  %v8922_v42 = vld [vmem:[#allocation5 + $0x1f8] sm:$0xff]   ;;  %v3210_v43 = vrot.slane %v3208_v35, 1  ;;  %v3197_v46 = vsel %vm3099_vm2, %v3187_v15, %v3196_v36  ;;  %v2443_v53 = vrot.slane %v8423_v37, 1 }
  0xf8   : > { %7938 = vmatpush3.bf16.msra.mxu1 %v8413_v33  ;;  %8002 = vmatpush3.bf16.msra.mxu0 %v8414_v34  ;;  %v8452_v33 = vld [vmem:[#allocation5 + $0x180] sm:$0xff]   ;;  %v2441_v34 = vrot.slane %v8913_v16, 1  ;;  %v3219_v48 = vrot.slane %v3217_v21, 1  ;;  %v3206_v50 = vsel %vm3099_vm2, %v3196_v36, %v3205_v38  ;;  %v3226_v55 = vshrl.u32 %v8428_v41, 16  ;;  %v8433_v16 = vld [vmem:[#allocation2 + $0x88] sm:$0xff]  }
  0xf9   : > { %7939 = vmatprep.subr.bf16.mxu1 %v8419_v45  ;;  %8003 = vmatprep.subr.bf16.mxu0 %v8420_v47  ;;  %v3229_v58 = vshll.u32 %v8428_v41, 16  ;;  %v8439_v41 = vld [vmem:[#allocation2 + $0x98] sm:$0xff]  }
  0xfa   : > { %v2442_v49 = vsel %vm1740_vm1, %v2439_v31, %v2441_v34  ;;  %v3223_v59 = vor.u32 %v3222_v51, %v3219_v48  ;;  %v3228_v63 = vrot.slane %v3226_v55, 1  ;;  %v2444_v1 = vsel %vm1740_vm1, %v2441_v34, %v2443_v53  ;;  %v8956_v48 = vld [vmem:[#allocation2 + $0xa0] sm:$0xff]  }
  0xfc   : > { %7940 = vmatpush3.bf16.msra.mxu1 %v8419_v45  ;;  %8004 = vmatpush3.bf16.msra.mxu0 %v8420_v47  ;;  %v2440_v45 = vsel %vm1740_vm1, %v2437_v14, %v2439_v31  ;;  %v3213_v47 = vrot.slane %v3211_v20, 2  ;;  %v3253_v14 = vshrl.u32 %v8438_v4, 16 }
  0xfd   : > { %7941 = vmatprep.subr.bf16.mxu1 %v8429_v56  ;;  %8005 = vmatprep.subr.bf16.mxu0 %v8430_v57 }
  0xfe   : > { %7830 = vmatmul.mubr.bf16.gmra.mxu1 %v2432_v61  ;;  %7894 = vmatmul.mubr.bf16.gmra.mxu0 %v3161_v62  ;;  %v3238_v61 = vshll.u32 %v8432_v52, 16  ;;  %v8431_v62 = vld [vmem:[#allocation2 + $0x80] sm:$0xff]   ;;  %v3255_v26 = vrot.slane %v3253_v14, 1  ;;  %v8448_v52 = vld [vmem:[#allocation2 + $0xb0] sm:$0xff]  }
  0xff   : > { %7833 = vmatprep.mubr.bf16.mxu1 %v2434_v2  ;;  %7897 = vmatprep.mubr.bf16.mxu0 %v3170_v3  ;;  %v3231_v3 = vrot.slane %v3229_v58, 2  ;;  %v2449_v10 = vrot.slane %v8431_v62, 1 }
 0x100   : > { %7942 = vmatpush3.bf16.msra.mxu1 %v8429_v56  ;;  %8006 = vmatpush3.bf16.msra.mxu0 %v8430_v57  ;;  %v3214_v56 = vor.u32 %v3213_v47, %v3210_v43  ;;  %v8427_v57 = vld [vmem:[#allocation2 + $0x78] sm:$0xff]   ;;  %v3240_v8 = vrot.slane %v3238_v61, 2  ;;  %v8444_v43 = vld [vmem:[#allocation2 + $0xa8] sm:$0xff]  }
 0x101   : > { %7943 = vmatprep.subr.bf16.mxu1 %v8435_v5  ;;  %8007 = vmatprep.subr.bf16.mxu0 %v8436_v6  ;;  %v2447_v9 = vrot.slane %v8427_v57, 1  ;;  %v3232_v12 = vor.u32 %v3231_v3, %v3228_v63  ;;  %v3283_v62 = vshll.u32 %v8444_v43, 16  ;;  %v2455_v63 = vrot.slane %v8439_v41, 1 }
 0x102   : > { %v3215_v2 = vsel %vm3099_vm2, %v3205_v38, %v3214_v56  ;;  %v3241_v15 = vor.u32 %v3240_v8, %v3237_v7  ;;  %v8443_v7 = vld [vmem:[#allocation2 + $0xa8] sm:$0xff]  }
 0x103   : > { %v2448_v23 = vsel %vm1740_vm1, %v2445_v54, %v2447_v9  ;;  %v3233_v24 = vsel %vm3099_vm2, %v3223_v59, %v3232_v12  ;;  %v2450_v27 = vsel %vm1740_vm1, %v2447_v9, %v2449_v10 }
 0x104   : > { %7944 = vmatpush3.bf16.msra.mxu1 %v8435_v5  ;;  %8008 = vmatpush3.bf16.msra.mxu0 %v8436_v6  ;;  %v2446_v5 = vsel %vm1740_vm1, %v2443_v53, %v2445_v54  ;;  %v3224_v6 = vsel %vm3099_vm2, %v3214_v56, %v3223_v59  ;;  %v3242_v28 = vsel %vm3099_vm2, %v3232_v12, %v3241_v15  ;;  %v3280_v59 = vshrl.u32 %v8444_v43, 16  ;;  %v8979_v12 = vld [vmem:[#allocation2 + $0xb0] sm:$0xff]  }
 0x105   : > { %7945 = vmatprep.subr.bf16.mxu1 %v8445_v17  ;;  %8009 = vmatprep.subr.bf16.mxu0 %v8446_v18 }
 0x106   : > { %7834 = vmatmul.mubr.bf16.gmra.mxu1 %v2436_v19  ;;  %7898 = vmatmul.mubr.bf16.gmra.mxu0 %v3179_v22  ;;  %v3246_v19 = vrot.slane %v3244_v11, 1  ;;  %v8440_v22 = vld [vmem:[#allocation2 + $0x98] sm:$0xff]   ;;  %v3282_v8 = vrot.slane %v3280_v59, 1  ;;  %v3285_v11 = vrot.slane %v3283_v62, 2 }
 0x107   : > { %7837 = vmatprep.mubr.bf16.mxu1 %v2438_v29  ;;  %7901 = vmatprep.mubr.bf16.mxu0 %v3188_v30  ;;  %v8442_v30 = vld [vmem:[#allocation2 + $0xa0] sm:$0xff]   ;;  %v3262_v34 = vshrl.u32 %v8440_v22, 16  ;;  %v3265_v37 = vshll.u32 %v8440_v22, 16 }
 0x108   : > { %7946 = vmatpush3.bf16.msra.mxu1 %v8445_v17  ;;  %8010 = vmatpush3.bf16.msra.mxu0 %v8446_v18  ;;  %v3256_v17 = vshll.u32 %v8438_v4, 16  ;;  %v8937_v18 = vld [vmem:[#allocation2 + $0x90] sm:$0xff]   ;;  %v3250_v35 = vor.u32 %v3249_v25, %v3246_v19  ;;  %v3271_v39 = vshrl.u32 %v8442_v30, 16  ;;  %v3274_v40 = vshll.u32 %v8442_v30, 16 }
 0x109   : > { %7947 = vmatprep.subr.bf16.mxu1 %v8451_v32  ;;  %8011 = vmatprep.subr.bf16.mxu0 %v8452_v33  ;;  %v2453_v36 = vrot.slane %v8937_v18, 1  ;;  %v3264_v47 = vrot.slane %v3262_v34, 1  ;;  %v3267_v51 = vrot.slane %v3265_v37, 2  ;;  %v2457_v4 = vrot.slane %v8956_v48, 1 }
 0x10a   : > { %v3258_v29 = vrot.slane %v3256_v17, 2  ;;  %v3273_v57 = vrot.slane %v3271_v39, 1  ;;  %v3276_v58 = vrot.slane %v3274_v40, 2  ;;  %v8449_v39 = vld [vmem:[#allocation2 + $0xb8] sm:$0xff]  }
 0x10b   : > { %v3268_v0 = vor.u32 %v3267_v51, %v3264_v47  ;;  %v2456_v13 = vsel %vm1740_vm1, %v2453_v36, %v2455_v63  ;;  %v2458_v19 = vsel %vm1740_vm1, %v2455_v63, %v2457_v4  ;;  %v8456_v40 = vld [vmem:[#allocation2 + $0xc8] ss:$0 sps:$4 sm:$0x33]   ;;  %v8453_v47 = vld [vmem:[#allocation2 + $0xc0] sm:$0xff]  }
 0x10c   : > { %7948 = vmatpush3.bf16.msra.mxu1 %v8451_v32  ;;  %8012 = vmatpush3.bf16.msra.mxu0 %v8452_v33  ;;  %v2451_v33 = vrot.slane %v8433_v16, 1  ;;  %v3259_v38 = vor.u32 %v3258_v29, %v3255_v26  ;;  %v8450_v16 = vld [vmem:[#allocation2 + $0xb8] sm:$0xff]   ;;  %v3286_v29 = vor.u32 %v3285_v11, %v3282_v8  ;;  %v2465_v8 = vrot.slane %v8453_v47, 1 }
 0x10d   : > { %8061 = vmatprep.subr.bf16.mxu1 %v8922_v42  ;;  %8125 = vmatprep.subr.bf16.mxu0 %v8924_v44  ;;  %v3298_v30 = vshrl.u32 %v8450_v16, 16 }
 0x10e   : > { %7838 = vmatmul.mubr.bf16.gmra.mxu1 %v2440_v45  ;;  %7902 = vmatmul.mubr.bf16.gmra.mxu0 %v3197_v46  ;;  %v2454_v55 = vsel %vm1740_vm1, %v2451_v33, %v2453_v36  ;;  %v3260_v56 = vsel %vm3099_vm2, %v3250_v35, %v3259_v38  ;;  %v3269_v14 = vsel %vm3099_vm2, %v3259_v38, %v3268_v0 }
 0x10f   : > { %7841 = vmatprep.mubr.bf16.mxu1 %v2442_v49  ;;  %7905 = vmatprep.mubr.bf16.mxu0 %v3206_v50  ;;  %v2452_v49 = vsel %vm1740_vm1, %v2449_v10, %v2451_v33  ;;  %v3251_v50 = vsel %vm3099_vm2, %v3241_v15, %v3250_v35  ;;  %v3301_v33 = vshll.u32 %v8450_v16, 16 }
 0x111   : > { %v3303_v51 = vrot.slane %v3301_v33, 2 }
 0x116   : > { %7842 = vmatmul.mubr.bf16.gmra.mxu1 %v2444_v1  ;;  %7906 = vmatmul.mubr.bf16.gmra.mxu0 %v3215_v2  ;;  %v3289_v1 = vshrl.u32 %v8448_v52, 16 }
 0x117   : > { %7845 = vmatprep.mubr.bf16.mxu1 %v2446_v5  ;;  %7909 = vmatprep.mubr.bf16.mxu0 %v3224_v6  ;;  %v3277_v5 = vor.u32 %v3276_v58, %v3273_v57  ;;  %v3292_v6 = vshll.u32 %v8448_v52, 16 }
 0x118   : > { %v3291_v15 = vrot.slane %v3289_v1, 1 }
 0x119   : > { %v3278_v22 = vsel %vm3099_vm2, %v3268_v0, %v3277_v5  ;;  %v2463_v0 = vrot.slane %v8449_v39, 1 }
 0x11b   : > { %v2466_v33 = vsel %vm1740_vm1, %v2463_v0, %v2465_v8 }
 0x11e   : > { %v8943_v31 = vpop.f32.mrf.mxu0  ;;  %v8945_v32 = vpop.f32.mrf.mxu1  ;;  %7846 = vmatmul.mubr.bf16.gmra.mxu1 %v2448_v23  ;;  %7910 = vmatmul.mubr.bf16.gmra.mxu0 %v3233_v24  ;;  %v3294_v23 = vrot.slane %v3292_v6, 2  ;;  %v8454_v24 = vld [vmem:[#allocation2 + $0xc0] sm:$0xff]  }
 0x11f   : > { %7849 = vmatprep.mubr.bf16.mxu1 %v2450_v27  ;;  %7913 = vmatprep.mubr.bf16.mxu0 %v3242_v28  ;;  %v2459_v27 = vrot.slane %v8443_v7, 1  ;;  %v2461_v28 = vrot.slane %v8979_v12, 1  ;;  %v3307_v37 = vshrl.u32 %v8454_v24, 16  ;;  %v3310_v38 = vshll.u32 %v8454_v24, 16 }
 0x120   : > { %v8948_v20 = vpop.f32.mrf.mxu0  ;;  %v8950_v21 = vpop.f32.mrf.mxu1  ;;  %v3295_v36 = vor.u32 %v3294_v23, %v3291_v15  ;;  %v8455_v12 = vld [vmem:[#allocation2 + $0xc8] ss:$0 sps:$4 sm:$0x11]  }
 0x121   : > { %v2460_v48 = vsel %vm1740_vm1, %v2457_v4, %v2459_v27  ;;  %v3309_v58 = vrot.slane %v3307_v37, 1  ;;  %v3312_v59 = vrot.slane %v3310_v38, 2  ;;  %v3316_v4 = vshrl.u32 %v8456_v40, 16  ;;  %v8459_v38 = vld [vmem:[#allocation2 + $0x10] sm:$0xfc]  }
 0x122   : > { %v8952_v45 = vpop.f32.mrf.mxu0  ;;  %v8954_v46 = vpop.f32.mrf.mxu1  ;;  %v3296_v57 = vsel %vm3099_vm2, %v3286_v29, %v3295_v36 }
 0x123   : > { %v3313_v11 = vor.u32 %v3312_v59, %v3309_v58  ;;  %v3318_v24 = vrot.slane %v3316_v4, 1  ;;  %v8462_v4 = vld [vmem:[#allocation2 + $0x20] sm:$0xff]  }
 0x124   : > { %v8960_v53 = vpop.f32.mrf.mxu0  ;;  %v8962_v54 = vpop.f32.mrf.mxu1 }
 0x126   : > { %v8966_v60 = vpop.f32.mrf.mxu0  ;;  %v8968_v61 = vpop.f32.mrf.mxu1  ;;  %7850 = vmatmul.mubr.bf16.gmra.mxu1 %v2452_v49  ;;  %7914 = vmatmul.mubr.bf16.gmra.mxu0 %v3251_v50  ;;  %v3287_v49 = vsel %vm3099_vm2, %v3277_v5, %v3286_v29  ;;  %v3300_v50 = vrot.slane %v3298_v30, 1  ;;  %v3319_v5 = vshll.u32 %v8456_v40, 16 }
 0x127   : > { %7853 = vmatprep.mubr.bf16.mxu1 %v2454_v55  ;;  %7917 = vmatprep.mubr.bf16.mxu0 %v3260_v56  ;;  %v2462_v56 = vsel %vm1740_vm1, %v2459_v27, %v2461_v28 }
 0x128   : > { %v8970_v2 = vpop.f32.mrf.mxu0  ;;  %v8972_v3 = vpop.f32.mrf.mxu1  ;;  %v3304_v1 = vor.u32 %v3303_v51, %v3300_v50  ;;  %v3321_v27 = vrot.slane %v3319_v5, 2  ;;  %v4634_v51 = vrot.slane %v8459_v38, 2 }
 0x12a   : > { %v8975_v9 = vpop.f32.mrf.mxu0  ;;  %v8977_v10 = vpop.f32.mrf.mxu1  ;;  %v3305_v23 = vsel %vm3099_vm2, %v3295_v36, %v3304_v1  ;;  %v3314_v37 = vsel %vm3099_vm2, %v3304_v1, %v3313_v11  ;;  %v3322_v36 = vor.u32 %v3321_v27, %v3318_v24  ;;  %v8461_v1 = vld [vmem:[#allocation2 + $0x18] sm:$0xff]  }
 0x12c   : > { %v8983_v17 = vpop.f32.mrf.mxu0  ;;  %v8985_v18 = vpop.f32.mrf.mxu1 }
 0x12e   : > { %v8989_v25 = vpop.f32.mrf.mxu0  ;;  %v8991_v26 = vpop.f32.mrf.mxu1  ;;  %7854 = vmatmul.mubr.bf16.gmra.mxu1 %v2456_v13  ;;  %7918 = vmatmul.mubr.bf16.gmra.mxu0 %v3269_v14  ;;  %v8457_v13 = vld [vmem:[#allocation2 + $0x8] sm:$0xfc]   ;;  %v8458_v14 = vld [vmem:[#allocation2 + $0x10] sm:$0xff]  }
 0x12f   : > { %7857 = vmatprep.mubr.bf16.mxu1 %v2458_v19  ;;  %7921 = vmatprep.mubr.bf16.mxu0 %v3278_v22  ;;  %v8460_v19 = vld [vmem:[#allocation2 + $0x18] sm:$0xff]   ;;  %v2464_v22 = vsel %vm1740_vm1, %v2461_v28, %v2463_v0  ;;  %v2467_v28 = vrot.slane %v8455_v12, 1  ;;  %v3955_v47 = vrot.slane %v8457_v13, 2  ;;  %v3323_v0 = vsel %vm3099_vm2, %v3313_v11, %v3322_v36 }
 0x130   : > { %v8994_v34 = vpop.f32.mrf.mxu0  ;;  %v8996_v35 = vpop.f32.mrf.mxu1  ;;  %v4637_v11 = vrot.slane %v8462_v4, 2 }
 0x131   : > { %v2468_v59 = vsel %vm1740_vm1, %v2465_v8, %v2467_v28  ;;  %v3958_v8 = vrot.slane %v8461_v1, 2 }
 0x132   : > { %v8998_v41 = vpop.f32.mrf.mxu0  ;;  %v9000_v43 = vpop.f32.mrf.mxu1 }
 0x134   : > { %v9004_v52 = vpop.f32.mrf.mxu0  ;;  %v9006_v55 = vpop.f32.mrf.mxu1 }
 0x136   : > { %v9010_v62 = vpop.f32.mrf.mxu0  ;;  %v9012_v63 = vpop.f32.mrf.mxu1  ;;  %7858 = vmatmul.mubr.bf16.gmra.mxu1 %v2460_v48  ;;  %7922 = vmatmul.mubr.bf16.gmra.mxu0 %v3287_v49  ;;  %v3956_v48 = vrot.slane %v8458_v14, 2 }
 0x137   : > { %7861 = vmatprep.mubr.bf16.mxu1 %v2462_v56  ;;  %7925 = vmatprep.mubr.bf16.mxu0 %v3296_v57  ;;  %v4635_v56 = vrot.slane %v8460_v19, 2  ;;  %v8465_v19 = vld [vmem:[#allocation2 + $0x20] sm:$0xff]  }
 0x138   : > { %v9014_v6 = vpop.f32.mrf.mxu0  ;;  %v9016_v7 = vpop.f32.mrf.mxu1  ;;  %v3957_v13 = vsel %vm3954_vm3, %v3955_v47, %v3956_v48  ;;  %v8467_v47 = vld [vmem:[#allocation2 + $0x28] sm:$0xff]  }
 0x139   : > { %v4636_v14 = vsel %vm3954_vm3, %v4634_v51, %v4635_v56  ;;  %v8468_v51 = vld [vmem:[#allocation2 + $0x30] sm:$0xff]  }
 0x13a   : > { %v9018_v15 = vpop.f32.mrf.mxu0  ;;  %v9020_v16 = vpop.f32.mrf.mxu1 }
 0x13c   : > { %v9024_v29 = vpop.f32.mrf.mxu0  ;;  %v9026_v30 = vpop.f32.mrf.mxu1 }
 0x13d   : > { %9885 = vst [vmem:[#allocation16_spill] sm:$0xff] %v9026_v30  ;;  %v8480_v30 = vld [vmem:[#allocation5 + $0x228] sm:$0xff]  }
 0x13e   : > { %v9030_v39 = vpop.f32.mrf.mxu0  ;;  %v9032_v40 = vpop.f32.mrf.mxu1  ;;  %7862 = vmatmul.mubr.bf16.gmra.mxu1 %v2464_v22  ;;  %7926 = vmatmul.mubr.bf16.gmra.mxu0 %v3305_v23  ;;  %v8466_v22 = vld [vmem:[#allocation2 + $0x28] sm:$0xff]  }
 0x13f   : > { %9886 = vst [vmem:[#allocation17_spill] sm:$0xff] %v9032_v40  ;;  %7865 = vmatprep.mubr.bf16.mxu1 %v2466_v33  ;;  %7929 = vmatprep.mubr.bf16.mxu0 %v3314_v37  ;;  %v3960_v37 = vrot.slane %v8465_v19, 2  ;;  %v4639_v38 = vrot.slane %v8466_v22, 2  ;;  %v8469_v22 = vld [vmem:[#allocation5 + $0x1f0] sm:$0xff]  }
 0x140   : > { %v9034_v49 = vpop.f32.mrf.mxu0  ;;  %v9036_v50 = vpop.f32.mrf.mxu1 }
 0x141   : > { %9887 = vst [vmem:[#allocation18_spill] sm:$0xff] %v9036_v50  ;;  %v4640_v19 = vsel %vm3954_vm3, %v4637_v11, %v4639_v38  ;;  %v8479_v50 = vld [vmem:[#allocation5 + $0x1e8] sm:$0xff]  }
 0x142   : > { %v9038_v57 = vpop.f32.mrf.mxu0  ;;  %v9040_v58 = vpop.f32.mrf.mxu1 }
 0x143   : > { %9888 = vst [vmem:[#allocation19_spill] sm:$0xff] %v9040_v58 }
 0x144   : > { %v9044_v5 = vpop.f32.mrf.mxu0  ;;  %v9046_v12 = vpop.f32.mrf.mxu1 }
 0x145   : > { %9889 = vst [vmem:[#allocation20_spill] sm:$0xff] %v9046_v12 }
 0x146   : > { %v9050_v23 = vpop.f32.mrf.mxu0  ;;  %v9052_v24 = vpop.f32.mrf.mxu1  ;;  %7866 = vmatmul.mubr.bf16.gmra.mxu1 %v2468_v59  ;;  %7930 = vmatmul.mubr.bf16.gmra.mxu0 %v3323_v0  ;;  %v4638_v59 = vsel %vm3954_vm3, %v4635_v56, %v4637_v11  ;;  %v9064_v0 = vld [vmem:[#allocation2 + $0x30] sm:$0xff]   ;;  %v4641_v56 = vrot.slane %v8468_v51, 2  ;;  %v8474_v51 = vld [vmem:[#allocation2 + $0x40] sm:$0xff]  }
 0x147   : > { %9890 = vst [vmem:[#allocation21_spill] sm:$0xff] %v9052_v24  ;;  %7949 = vmatprep.mubr.bf16.mxu1 %v3957_v13  ;;  %8013 = vmatprep.mubr.bf16.mxu0 %v4636_v14  ;;  %v3959_v24 = vsel %vm3954_vm3, %v3956_v48, %v3958_v8  ;;  %v9070_v13 = vld [vmem:[#allocation2 + $0x38] sm:$0xff]   ;;  %v3961_v14 = vsel %vm3954_vm3, %v3958_v8, %v3960_v37  ;;  %v3962_v48 = vrot.slane %v8467_v47, 2 }
 0x148   : > { %v9054_v27 = vpop.f32.mrf.mxu0  ;;  %v9056_v33 = vpop.f32.mrf.mxu1  ;;  %v4643_v11 = vrot.slane %v9070_v13, 2 }
 0x149   : > { %9891 = vst [vmem:[#allocation22_spill] sm:$0xff] %v9056_v33 }
 0x14a   : > { %v9058_v28 = vpop.f32.mrf.mxu0  ;;  %v9060_v36 = vpop.f32.mrf.mxu1 }
 0x14b   : > { %9892 = vst [vmem:[#allocation23_spill] sm:$0xff] %v9060_v36  ;;  %v8470_v36 = vld [vmem:[#allocation5 + $0x230] sm:$0xff]  }
 0x14c   : > { %v9066_v1 = vpop.f32.mrf.mxu0  ;;  %v9068_v4 = vpop.f32.mrf.mxu1 }
 0x14d   : > { %9893 = vst [vmem:[#allocation24_spill] sm:$0xff] %v9068_v4  ;;  %v9880_v4 = vrot.slane %v9064_v0, 2 }
 0x14e   : > { %v7695_v33 = vpop.f32.mrf.mxu1  ;;  %v7759_v12 = vpop.f32.mrf.mxu0  ;;  %7950 = vmatmul.mubr.bf16.vlgmr.msra.gmra.mxu1 %v3959_v24  ;;  %8014 = vmatmul.mubr.bf16.vlgmr.msra.gmra.mxu0 %v4638_v59 }
 0x14f   : > { %v1457_v58 = vadd.f32 %v7695_v33, %v8943_v31  ;;  %8062 = vmatpush3.bf16.msra.mxu1 %v8922_v42  ;;  %8126 = vmatpush3.bf16.msra.mxu0 %v8924_v44  ;;  %v8473_v31 = vld [vmem:[#allocation2 + $0x38] sm:$0xff]   ;;  %v3963_v44 = vsel %vm3954_vm3, %v3960_v37, %v3962_v48  ;;  %v3965_v13 = vsel %vm3954_vm3, %v3962_v48, %v9880_v4  ;;  %v9093_v37 = vld [vmem:[#allocation2 + $0x48] sm:$0xff]   ;;  %v4645_v4 = vrot.slane %v8474_v51, 2  ;;  %v8478_v51 = vld [vmem:[#allocation2 + $0x50] sm:$0xff]  }
 0x150   : > { %v1216_v8 = vpop.f32.mrf.mxu1  ;;  %v1896_v40 = vpop.f32.mrf.mxu0  ;;  %7953 = vmatprep.mubr.bf16.mxu1 %v3961_v14  ;;  %8017 = vmatprep.mubr.bf16.mxu0 %v4640_v19  ;;  %v4642_v19 = vsel %vm3954_vm3, %v4639_v38, %v4641_v56 }
 0x151   : > { %v9079_v24 = vadd.f32 %v7759_v12, %v1457_v58  ;;  %v1455_v47 = vadd.f32 %v1216_v8, %v8948_v20  ;;  %8063 = vmatprep.subr.bf16.mxu1 %v8469_v22  ;;  %8127 = vmatprep.subr.bf16.mxu0 %v8470_v36  ;;  %v9087_v58 = vld [vmem:[#allocation2 + $0x40] sm:$0xff]   ;;  %v4644_v8 = vsel %vm3954_vm3, %v4641_v56, %v4643_v11  ;;  %v3966_v56 = vrot.slane %v8473_v31, 2 }
 0x152   : > { %v7696_v42 = vpop.f32.mrf.mxu1  ;;  %v7760_v33 = vpop.f32.mrf.mxu0 }
 0x153   : > { %9894 = vst [vmem:[#allocation25_spill] sm:$0xff] %v9079_v24  ;;  %v9083_v59 = vadd.f32 %v1896_v40, %v1455_v47  ;;  %v1458_v14 = vadd.f32 %v7696_v42, %v8952_v45  ;;  %8064 = vmatpush3.bf16.msra.mxu1 %v8469_v22  ;;  %8128 = vmatpush3.bf16.msra.mxu0 %v8470_v36  ;;  %v8485_v40 = vld [vmem:[#allocation5 + $0x1e0] sm:$0xff]  }
 0x154   : > { %v1219_v12 = vpop.f32.mrf.mxu1  ;;  %v1899_v20 = vpop.f32.mrf.mxu0  ;;  %8065 = vmatprep.subr.bf16.mxu1 %v8479_v50  ;;  %8129 = vmatprep.subr.bf16.mxu0 %v8480_v30  ;;  %v8486_v36 = vld [vmem:[#allocation5 + $0x220] sm:$0xff]  }
 0x155   : > { %9895 = vst [vmem:[#allocation26_spill] sm:$0xff] %v9083_v59  ;;  %v9095_v45 = vadd.f32 %v7760_v33, %v1458_v14  ;;  %v1456_v38 = vadd.f32 %v1219_v12, %v8960_v53  ;;  %v3968_v33 = vrot.slane %v9087_v58, 2  ;;  %v4647_v14 = vrot.slane %v9093_v37, 2  ;;  %v8495_v53 = vld [vmem:[#allocation5 + $0x1d8] sm:$0xff]  }
 0x156   : > { %v7699_v22 = vpop.f32.mrf.mxu1  ;;  %v7763_v47 = vpop.f32.mrf.mxu0  ;;  %7954 = vmatmul.mubr.bf16.gmra.mxu1 %v3963_v44  ;;  %8018 = vmatmul.mubr.bf16.gmra.mxu0 %v4642_v19  ;;  %v8477_v19 = vld [vmem:[#allocation2 + $0x48] sm:$0xff]   ;;  %v9113_v37 = vld [vmem:[#allocation2 + $0x50] sm:$0xff]  }
 0x157   : > { %v9098_v42 = vadd.f32 %v1899_v20, %v1456_v38  ;;  %v1461_v48 = vadd.f32 %v7699_v22, %v8966_v60  ;;  %7957 = vmatprep.mubr.bf16.mxu1 %v3965_v13  ;;  %8021 = vmatprep.mubr.bf16.mxu0 %v4644_v8  ;;  %v8496_v60 = vld [vmem:[#allocation5 + $0x218] sm:$0xff]   ;;  %v9896_v8 = vrot.slane %v9064_v0, 2  ;;  %v3969_v38 = vsel %vm3954_vm3, %v3966_v56, %v3968_v33 }
 0x158   : > { %v1232_v59 = vpop.f32.mrf.mxu1  ;;  %v1912_v24 = vpop.f32.mrf.mxu0  ;;  %8066 = vmatpush3.bf16.msra.mxu1 %v8479_v50  ;;  %8130 = vmatpush3.bf16.msra.mxu0 %v8480_v30  ;;  %v4646_v50 = vsel %vm3954_vm3, %v4643_v11, %v4645_v4  ;;  %v4648_v22 = vsel %vm3954_vm3, %v4645_v4, %v4647_v14  ;;  %v8502_v11 = vld [vmem:[#allocation5 + $0x210] sm:$0xff]  }
 0x159   : > { %v9103_v12 = vadd.f32 %v7763_v47, %v1461_v48  ;;  %v1459_v44 = vadd.f32 %v1232_v59, %v8970_v2  ;;  %8067 = vmatprep.subr.bf16.mxu1 %v8485_v40  ;;  %8131 = vmatprep.subr.bf16.mxu0 %v8486_v36  ;;  %v3967_v30 = vsel %vm3954_vm3, %v9896_v8, %v3966_v56  ;;  %v9117_v47 = vld [vmem:[#allocation2 + $0x58] sm:$0xff]  }
 0x15a   : > { %v7700_v20 = vpop.f32.mrf.mxu1  ;;  %v7764_v31 = vpop.f32.mrf.mxu0 }
 0x15b   : > { %v9106_v13 = vadd.f32 %v1912_v24, %v1459_v44  ;;  %v1462_v58 = vadd.f32 %v7700_v20, %v8975_v9  ;;  %v8501_v24 = vld [vmem:[#allocation5 + $0x1d0] sm:$0xff]  }
 0x15c   : > { %v1235_v2 = vpop.f32.mrf.mxu1  ;;  %v1915_v59 = vpop.f32.mrf.mxu0  ;;  %8068 = vmatpush3.bf16.msra.mxu1 %v8485_v40  ;;  %8132 = vmatpush3.bf16.msra.mxu0 %v8486_v36  ;;  %v3970_v40 = vrot.slane %v8477_v19, 2  ;;  %v4649_v36 = vrot.slane %v8478_v51, 2  ;;  %v8484_v51 = vld [vmem:[#allocation2 + $0x60] sm:$0xff]  }
 0x15d   : > { %v9119_v9 = vadd.f32 %v7764_v31, %v1462_v58  ;;  %v1460_v0 = vadd.f32 %v1235_v2, %v8983_v17  ;;  %8069 = vmatprep.subr.bf16.mxu1 %v8495_v53  ;;  %8133 = vmatprep.subr.bf16.mxu0 %v8496_v60  ;;  %v3972_v58 = vrot.slane %v9113_v37, 2  ;;  %v4651_v17 = vrot.slane %v9117_v47, 2  ;;  %v8512_v2 = vld [vmem:[#allocation5 + $0x208] sm:$0xff]  }
 0x15e   : > { %v7703_v48 = vpop.f32.mrf.mxu1  ;;  %v7767_v44 = vpop.f32.mrf.mxu0  ;;  %7958 = vmatmul.mubr.bf16.gmra.mxu1 %v3967_v30  ;;  %8022 = vmatmul.mubr.bf16.gmra.mxu0 %v4646_v50  ;;  %v8483_v50 = vld [vmem:[#allocation2 + $0x58] sm:$0xff]  }
 0x15f   : > { %v9122_v20 = vadd.f32 %v1915_v59, %v1460_v0  ;;  %v1465_v4 = vadd.f32 %v7703_v48, %v8989_v25  ;;  %7961 = vmatprep.mubr.bf16.mxu1 %v3969_v38  ;;  %8025 = vmatprep.mubr.bf16.mxu0 %v4648_v22  ;;  %v8511_v25 = vld [vmem:[#allocation5 + $0x1c8] sm:$0xff]   ;;  %v3971_v22 = vsel %vm3954_vm3, %v3968_v33, %v3970_v40  ;;  %v8518_v33 = vld [vmem:[#allocation5 + $0x200] sm:$0xff]  }
 0x160   : > { %v1248_v56 = vpop.f32.mrf.mxu1  ;;  %v1928_v31 = vpop.f32.mrf.mxu0  ;;  %8070 = vmatpush3.bf16.msra.mxu1 %v8495_v53  ;;  %8134 = vmatpush3.bf16.msra.mxu0 %v8496_v60  ;;  %v4650_v53 = vsel %vm3954_vm3, %v4647_v14, %v4649_v36  ;;  %v9135_v60 = vld [vmem:[#allocation2 + $0x60] sm:$0xff]   ;;  %v3973_v0 = vsel %vm3954_vm3, %v3970_v40, %v3972_v58  ;;  %v4652_v48 = vsel %vm3954_vm3, %v4649_v36, %v4651_v17 }
 0x161   : > { %v9127_v8 = vadd.f32 %v7767_v44, %v1465_v4  ;;  %v1463_v30 = vadd.f32 %v1248_v56, %v8994_v34  ;;  %8071 = vmatprep.subr.bf16.mxu1 %v8501_v24  ;;  %8135 = vmatprep.subr.bf16.mxu0 %v8502_v11  ;;  %v9139_v44 = vld [vmem:[#allocation2 + $0x68] sm:$0xff]   ;;  %v8517_v4 = vld [vmem:[#allocation5 + $0x1c0] sm:$0xff]  }
 0x162   : > { %v7704_v59 = vpop.f32.mrf.mxu1  ;;  %v7768_v19 = vpop.f32.mrf.mxu0 }
 0x163   : > { %v9130_v38 = vadd.f32 %v1928_v31, %v1463_v30  ;;  %v1466_v37 = vadd.f32 %v7704_v59, %v8998_v41 }
 0x164   : > { %v1251_v47 = vpop.f32.mrf.mxu1  ;;  %v1931_v34 = vpop.f32.mrf.mxu0  ;;  %8072 = vmatpush3.bf16.msra.mxu1 %v8501_v24  ;;  %8136 = vmatpush3.bf16.msra.mxu0 %v8502_v11  ;;  %v3974_v24 = vrot.slane %v8483_v50, 2  ;;  %v4653_v11 = vrot.slane %v8484_v51, 2 }
 0x165   : > { %v9141_v56 = vadd.f32 %v7768_v19, %v1466_v37  ;;  %v1464_v41 = vadd.f32 %v1251_v47, %v9004_v52  ;;  %8073 = vmatprep.subr.bf16.mxu1 %v8511_v25  ;;  %8137 = vmatprep.subr.bf16.mxu0 %v8512_v2  ;;  %v3976_v19 = vrot.slane %v9135_v60, 2  ;;  %v4655_v52 = vrot.slane %v9139_v44, 2  ;;  %v8489_v47 = vld [vmem:[#allocation2 + $0x68] sm:$0xff]   ;;  %v8491_v44 = vld [vmem:[#allocation2 + $0x70] sm:$0xff]  }
 0x166   : > { %v7707_v14 = vpop.f32.mrf.mxu1  ;;  %v7771_v31 = vpop.f32.mrf.mxu0  ;;  %7962 = vmatmul.mubr.bf16.gmra.mxu1 %v3971_v22  ;;  %8026 = vmatmul.mubr.bf16.gmra.mxu0 %v4650_v53  ;;  %v3975_v51 = vsel %vm3954_vm3, %v3972_v58, %v3974_v24  ;;  %v4654_v60 = vsel %vm3954_vm3, %v4651_v17, %v4653_v11 }
 0x167   : > { %v9144_v30 = vadd.f32 %v1931_v34, %v1464_v41  ;;  %v1469_v40 = vadd.f32 %v7707_v14, %v9010_v62  ;;  %7965 = vmatprep.mubr.bf16.mxu1 %v3973_v0  ;;  %8029 = vmatprep.mubr.bf16.mxu0 %v4652_v48  ;;  %v8490_v0 = vld [vmem:[#allocation2 + $0x70] sm:$0xff]   ;;  %v3977_v48 = vsel %vm3954_vm3, %v3974_v24, %v3976_v19  ;;  %v8492_v41 = vld [vmem:[#allocation2 + $0x78] sm:$0xff]   ;;  %v3978_v24 = vrot.slane %v8489_v47, 2 }
 0x168   : > { %v1264_v36 = vpop.f32.mrf.mxu1  ;;  %v1944_v59 = vpop.f32.mrf.mxu0  ;;  %8074 = vmatpush3.bf16.msra.mxu1 %v8511_v25  ;;  %8138 = vmatpush3.bf16.msra.mxu0 %v8512_v2 }
 0x169   : > { %v9149_v37 = vadd.f32 %v7771_v31, %v1469_v40  ;;  %v1467_v22 = vadd.f32 %v1264_v36, %v9014_v6  ;;  %8075 = vmatprep.subr.bf16.mxu1 %v8517_v4  ;;  %8139 = vmatprep.subr.bf16.mxu0 %v8518_v33  ;;  %v4656_v6 = vsel %vm3954_vm3, %v4653_v11, %v4655_v52  ;;  %v4657_v11 = vrot.slane %v8490_v0, 2  ;;  %v8494_v0 = vld [vmem:[#allocation2 + $0x80] sm:$0xff]  }
 0x16a   : > { %v7708_v53 = vpop.f32.mrf.mxu1  ;;  %v7772_v62 = vpop.f32.mrf.mxu0 }
 0x16b   : > { %v9152_v34 = vadd.f32 %v1944_v59, %v1467_v22  ;;  %v1470_v50 = vadd.f32 %v7708_v53, %v9018_v15  ;;  %v4658_v47 = vsel %vm3954_vm3, %v4655_v52, %v4657_v11 }
 0x16c   : > { %v1267_v25 = vpop.f32.mrf.mxu1  ;;  %v1947_v2 = vpop.f32.mrf.mxu0  ;;  %8076 = vmatpush3.bf16.msra.mxu1 %v8517_v4  ;;  %8140 = vmatpush3.bf16.msra.mxu0 %v8518_v33  ;;  %v3980_v4 = vrot.slane %v8491_v44, 2  ;;  %v4659_v33 = vrot.slane %v8492_v41, 2  ;;  %v8497_v44 = vld [vmem:[#allocation2 + $0x80] sm:$0xff]  }
 0x16d   : > { %v9159_v14 = vadd.f32 %v7772_v62, %v1470_v50  ;;  %v1468_v31 = vadd.f32 %v1267_v25, %v9024_v29  ;;  %v8493_v50 = vld [vmem:[#allocation2 + $0x78] sm:$0xff]  }
 0x16e   : > { %v7711_v15 = vpop.f32.mrf.mxu1  ;;  %v7775_v40 = vpop.f32.mrf.mxu0  ;;  %7966 = vmatmul.mubr.bf16.gmra.mxu1 %v3975_v51  ;;  %8030 = vmatmul.mubr.bf16.gmra.mxu0 %v4654_v60  ;;  %v3982_v52 = vrot.slane %v8493_v50, 2 }
 0x16f   : > { %v9162_v58 = vadd.f32 %v1947_v2, %v1468_v31  ;;  %v1473_v17 = vadd.f32 %v7711_v15, %v9030_v39  ;;  %7969 = vmatprep.mubr.bf16.mxu1 %v3977_v48  ;;  %8033 = vmatprep.mubr.bf16.mxu0 %v4656_v6  ;;  %v3979_v39 = vsel %vm3954_vm3, %v3976_v19, %v3978_v24 }
 0x170   : > { %v1280_v36 = vpop.f32.mrf.mxu1  ;;  %v1960_v59 = vpop.f32.mrf.mxu0  ;;  %v3981_v48 = vsel %vm3954_vm3, %v3978_v24, %v3980_v4  ;;  %v4660_v6 = vsel %vm3954_vm3, %v4657_v11, %v4659_v33 }
 0x171   : > { %v9165_v22 = vadd.f32 %v7775_v40, %v1473_v17  ;;  %v1471_v29 = vadd.f32 %v1280_v36, %v9034_v49  ;;  %v8498_v49 = vld [vmem:[#allocation2 + $0x88] sm:$0xff]   ;;  %v4661_v17 = vrot.slane %v8494_v0, 2  ;;  %v3984_v36 = vrot.slane %v8497_v44, 2  ;;  %v8500_v0 = vld [vmem:[#allocation2 + $0x90] sm:$0xff]  }
 0x172   : > { %v7712_v53 = vpop.f32.mrf.mxu1  ;;  %v7776_v62 = vpop.f32.mrf.mxu0  ;;  %v8503_v44 = vld [vmem:[#allocation2 + $0x90] sm:$0xff]  }
 0x173   : > { %v9168_v51 = vadd.f32 %v1960_v59, %v1471_v29  ;;  %v1474_v60 = vadd.f32 %v7712_v53, %v9038_v57  ;;  %v4663_v59 = vrot.slane %v8498_v49, 2  ;;  %v4662_v50 = vsel %vm3954_vm3, %v4659_v33, %v4661_v17 }
 0x174   : > { %v1283_v25 = vpop.f32.mrf.mxu1  ;;  %v1963_v2 = vpop.f32.mrf.mxu0 }
 0x175   : > { %v9175_v41 = vadd.f32 %v7776_v62, %v1474_v60  ;;  %v1472_v31 = vadd.f32 %v1283_v25, %v9044_v5  ;;  %v8499_v60 = vld [vmem:[#allocation2 + $0x88] sm:$0xff]  }
 0x176   : > { %v7715_v15 = vpop.f32.mrf.mxu1  ;;  %v7779_v40 = vpop.f32.mrf.mxu0  ;;  %7970 = vmatmul.mubr.bf16.gmra.mxu1 %v3979_v39  ;;  %8034 = vmatmul.mubr.bf16.gmra.mxu0 %v4658_v47  ;;  %v3986_v33 = vrot.slane %v8499_v60, 2  ;;  %v8505_v60 = vld [vmem:[#allocation2 + $0x98] sm:$0xff]  }
 0x177   : > { %v9178_v57 = vadd.f32 %v1963_v2, %v1472_v31  ;;  %v1477_v19 = vadd.f32 %v7715_v15, %v9050_v23  ;;  %7973 = vmatprep.mubr.bf16.mxu1 %v3981_v48  ;;  %8037 = vmatprep.mubr.bf16.mxu0 %v4660_v6  ;;  %v3983_v23 = vsel %vm3954_vm3, %v3980_v4, %v3982_v52 }
 0x178   : > { %v1296_v24 = vpop.f32.mrf.mxu1  ;;  %v1976_v11 = vpop.f32.mrf.mxu0  ;;  %v3985_v48 = vsel %vm3954_vm3, %v3982_v52, %v3984_v36  ;;  %v4664_v6 = vsel %vm3954_vm3, %v4661_v17, %v4663_v59 }
 0x179   : > { %v9181_v29 = vadd.f32 %v7779_v40, %v1477_v19  ;;  %v1475_v5 = vadd.f32 %v1296_v24, %v9054_v27  ;;  %v8504_v27 = vld [vmem:[#allocation2 + $0x98] sm:$0xff]   ;;  %v4665_v19 = vrot.slane %v8500_v0, 2  ;;  %v3988_v24 = vrot.slane %v8503_v44, 2  ;;  %v8506_v0 = vld [vmem:[#allocation2 + $0xa0] sm:$0xff]  }
 0x17a   : > { %v7716_v53 = vpop.f32.mrf.mxu1  ;;  %v7780_v62 = vpop.f32.mrf.mxu0  ;;  %v8507_v44 = vld [vmem:[#allocation2 + $0xa0] sm:$0xff]  }
 0x17b   : > { %v9184_v39 = vadd.f32 %v1976_v11, %v1475_v5  ;;  %v1478_v47 = vadd.f32 %v7716_v53, %v9058_v28  ;;  %v4667_v11 = vrot.slane %v8504_v27, 2 }
 0x17c   : > { %v1299_v25 = vpop.f32.mrf.mxu1  ;;  %v1979_v2 = vpop.f32.mrf.mxu0 }
 0x17d   : > { %v9191_v49 = vadd.f32 %v7780_v62, %v1478_v47  ;;  %v1476_v31 = vadd.f32 %v1299_v25, %v9066_v1 }
 0x17e   : > { %v7719_v15 = vpop.f32.mrf.mxu1  ;;  %v7783_v40 = vpop.f32.mrf.mxu0  ;;  %7974 = vmatmul.mubr.bf16.gmra.mxu1 %v3983_v23  ;;  %8038 = vmatmul.mubr.bf16.gmra.mxu0 %v4662_v50  ;;  %v4666_v50 = vsel %vm3954_vm3, %v4663_v59, %v4665_v19 }
 0x17f   : > { %v9194_v28 = vadd.f32 %v1979_v2, %v1476_v31  ;;  %v1481_v4 = vadd.f32 %v7719_v15, %v8945_v32  ;;  %7977 = vmatprep.mubr.bf16.mxu1 %v3985_v48  ;;  %8041 = vmatprep.mubr.bf16.mxu0 %v4664_v6  ;;  %v3987_v32 = vsel %vm3954_vm3, %v3984_v36, %v3986_v33 }
 0x180   : > { %v1312_v52 = vpop.f32.mrf.mxu1  ;;  %v1992_v17 = vpop.f32.mrf.mxu0  ;;  %v3989_v48 = vsel %vm3954_vm3, %v3986_v33, %v3988_v24  ;;  %v4668_v6 = vsel %vm3954_vm3, %v4665_v19, %v4667_v11 }
 0x181   : > { %v9197_v5 = vadd.f32 %v7783_v40, %v1481_v4  ;;  %v1479_v1 = vadd.f32 %v1312_v52, %v8950_v21  ;;  %v8508_v21 = vld [vmem:[#allocation2 + $0xa8] sm:$0xff]   ;;  %v3990_v40 = vrot.slane %v8505_v60, 2  ;;  %v4669_v4 = vrot.slane %v8506_v0, 2  ;;  %v8510_v0 = vld [vmem:[#allocation2 + $0xb0] sm:$0xff]  }
 0x182   : > { %v7720_v53 = vpop.f32.mrf.mxu1  ;;  %v7784_v62 = vpop.f32.mrf.mxu0  ;;  %v3992_v52 = vrot.slane %v8507_v44, 2  ;;  %v8509_v60 = vld [vmem:[#allocation2 + $0xa8] sm:$0xff]   ;;  %v9223_v44 = vld [vmem:[#allocation2 + $0xb0] sm:$0xff]  }
 0x183   : > { %v9200_v47 = vadd.f32 %v1992_v17, %v1479_v1  ;;  %v1482_v23 = vadd.f32 %v7720_v53, %v8954_v46  ;;  %v4671_v17 = vrot.slane %v8508_v21, 2 }
 0x184   : > { %v1315_v25 = vpop.f32.mrf.mxu1  ;;  %v1995_v2 = vpop.f32.mrf.mxu0 }
 0x185   : > { %v9207_v27 = vadd.f32 %v7784_v62, %v1482_v23  ;;  %v1480_v31 = vadd.f32 %v1315_v25, %v8962_v54 }
 0x186   : > { %v7723_v15 = vpop.f32.mrf.mxu1  ;;  %v7787_v46 = vpop.f32.mrf.mxu0  ;;  %7978 = vmatmul.mubr.bf16.gmra.mxu1 %v3987_v32  ;;  %8042 = vmatmul.mubr.bf16.gmra.mxu0 %v4666_v50  ;;  %v4670_v50 = vsel %vm3954_vm3, %v4667_v11, %v4669_v4 }
 0x187   : > { %v9210_v36 = vadd.f32 %v1995_v2, %v1480_v31  ;;  %v1485_v59 = vadd.f32 %v7723_v15, %v8968_v61  ;;  %7981 = vmatprep.mubr.bf16.mxu1 %v3989_v48  ;;  %8045 = vmatprep.mubr.bf16.mxu0 %v4668_v6  ;;  %v3991_v61 = vsel %vm3954_vm3, %v3988_v24, %v3990_v40 }
 0x188   : > { %v1328_v33 = vpop.f32.mrf.mxu1  ;;  %v2008_v19 = vpop.f32.mrf.mxu0  ;;  %v3993_v48 = vsel %vm3954_vm3, %v3990_v40, %v3992_v52  ;;  %v4672_v6 = vsel %vm3954_vm3, %v4669_v4, %v4671_v17 }
 0x189   : > { %v9213_v1 = vadd.f32 %v7787_v46, %v1485_v59  ;;  %v1483_v54 = vadd.f32 %v1328_v33, %v8972_v3  ;;  %v9225_v3 = vld [vmem:[#allocation2 + $0xb8] sm:$0xff]   ;;  %v3994_v46 = vrot.slane %v8509_v60, 2  ;;  %v4673_v59 = vrot.slane %v8510_v0, 2 }
 0x18a   : > { %v7724_v53 = vpop.f32.mrf.mxu1  ;;  %v7788_v62 = vpop.f32.mrf.mxu0  ;;  %v3996_v33 = vrot.slane %v9223_v44, 2  ;;  %v8515_v0 = vld [vmem:[#allocation2 + $0xb8] sm:$0xff]  }
 0x18b   : > { %v9216_v23 = vadd.f32 %v2008_v19, %v1483_v54  ;;  %v1486_v32 = vadd.f32 %v7724_v53, %v8977_v10  ;;  %v4675_v19 = vrot.slane %v9225_v3, 2  ;;  %v4674_v60 = vsel %vm3954_vm3, %v4671_v17, %v4673_v59  ;;  %v9247_v3 = vld [vmem:[#allocation2 + $0xc8] sm:$0xff]  }
 0x18c   : > { %v1331_v25 = vpop.f32.mrf.mxu1  ;;  %v2011_v2 = vpop.f32.mrf.mxu0 }
 0x18d   : > { %v9227_v21 = vadd.f32 %v7788_v62, %v1486_v32  ;;  %v1484_v10 = vadd.f32 %v1331_v25, %v8985_v18  ;;  %v8524_v32 = vld [vmem:[#allocation2 + $0x18] sm:$0xff]   ;;  %v8516_v25 = vld [vmem:[#allocation2 + $0xc0] sm:$0xff]   ;;  %v4676_v44 = vsel %vm3954_vm3, %v4673_v59, %v4675_v19  ;;  %v3998_v59 = vrot.slane %v8515_v0, 2  ;;  %v8525_v0 = vld [vmem:[#allocation2 + $0x10] sm:$0xf8]  }
 0x18e   : > { %v7727_v31 = vpop.f32.mrf.mxu1  ;;  %v7791_v24 = vpop.f32.mrf.mxu0  ;;  %7982 = vmatmul.mubr.bf16.gmra.mxu1 %v3991_v61  ;;  %8046 = vmatmul.mubr.bf16.gmra.mxu0 %v4670_v50  ;;  %v3995_v50 = vsel %vm3954_vm3, %v3992_v52, %v3994_v46  ;;  %v5323_v17 = vshrl.u32 %v8524_v32, 16 }
 0x18f   : > { %v9230_v11 = vadd.f32 %v2011_v2, %v1484_v10  ;;  %v1489_v15 = vadd.f32 %v7727_v31, %v8991_v26  ;;  %7985 = vmatprep.mubr.bf16.mxu1 %v3993_v48  ;;  %8049 = vmatprep.mubr.bf16.mxu0 %v4672_v6  ;;  %v3997_v6 = vsel %vm3954_vm3, %v3994_v46, %v3996_v33  ;;  %v8523_v10 = vld [vmem:[#allocation2 + $0x10] sm:$0xfc]  }
 0x190   : > { %v1344_v40 = vpop.f32.mrf.mxu1  ;;  %v2024_v4 = vpop.f32.mrf.mxu0 }
 0x191   : > { %v9235_v54 = vadd.f32 %v7791_v24, %v1489_v15  ;;  %v1487_v18 = vadd.f32 %v1344_v40, %v8996_v35  ;;  %v9245_v35 = vld [vmem:[#allocation2 + $0xc0] sm:$0xff]   ;;  %v5326_v15 = vshll.u32 %v8524_v32, 16 }
 0x192   : > { %v7728_v53 = vpop.f32.mrf.mxu1  ;;  %v7792_v62 = vpop.f32.mrf.mxu0 }
 0x193   : > { %v9238_v61 = vadd.f32 %v2024_v4, %v1487_v18  ;;  %v1490_v26 = vadd.f32 %v7728_v53, %v9000_v43  ;;  %v4677_v4 = vrot.slane %v8516_v25, 2 }
 0x194   : > { %v1347_v2 = vpop.f32.mrf.mxu1  ;;  %v2027_v48 = vpop.f32.mrf.mxu0 }
 0x195   : > { %9897 = vst [vmem:[#allocation27_spill] sm:$0xff] %v9238_v61  ;;  %v9249_v31 = vadd.f32 %v7792_v62, %v1490_v26  ;;  %v1488_v43 = vadd.f32 %v1347_v2, %v9006_v55  ;;  %v4000_v62 = vrot.slane %v9245_v35, 2  ;;  %v4679_v55 = vrot.slane %v9247_v3, 2 }
 0x196   : > { %v7731_v52 = vpop.f32.mrf.mxu1  ;;  %v7795_v24 = vpop.f32.mrf.mxu0  ;;  %7986 = vmatmul.mubr.bf16.gmra.mxu1 %v3995_v50  ;;  %8050 = vmatmul.mubr.bf16.gmra.mxu0 %v4674_v60  ;;  %v5315_v26 = vshrl.u32 %v8523_v10, 16  ;;  %v5318_v2 = vshll.u32 %v8523_v10, 16  ;;  %v8521_v60 = vld [vmem:[#allocation2 + $0xc8] ss:$0 sps:$4 sm:$0x33]   ;;  %v3999_v35 = vsel %vm3954_vm3, %v3996_v33, %v3998_v59  ;;  %v4678_v3 = vsel %vm3954_vm3, %v4675_v19, %v4677_v4  ;;  %v8527_v10 = vld [vmem:[#allocation2 + $0x20] sm:$0xff]  }
 0x197   : > { %9898 = vst [vmem:[#allocation28_spill] sm:$0xff] %v9249_v31  ;;  %v9252_v40 = vadd.f32 %v2027_v48, %v1488_v43  ;;  %v1493_v46 = vadd.f32 %v7731_v52, %v9012_v63  ;;  %7989 = vmatprep.mubr.bf16.mxu1 %v3997_v6  ;;  %8053 = vmatprep.mubr.bf16.mxu0 %v4676_v44  ;;  %v8522_v48 = vld [vmem:[#allocation2 + $0xd0] ss:$0 sps:$4 sm:$0x33]   ;;  %v5325_v6 = vrot.slane %v5323_v17, 2  ;;  %v5328_v44 = vrot.slane %v5326_v15, 3 }
 0x198   : > { %v1360_v18 = vpop.f32.mrf.mxu1  ;;  %v2040_v53 = vpop.f32.mrf.mxu0  ;;  %v9267_v17 = vld [vmem:[#allocation2 + $0x18] sm:$0xff]   ;;  %v8529_v15 = vld [vmem:[#allocation2 + $0x28] sm:$0xff]   ;;  %v4002_v19 = vrot.slane %v8521_v60, 2 }
 0x199   : > { %9899 = vst [vmem:[#allocation29_spill] sm:$0xff] %v9252_v40  ;;  %v9257_v50 = vadd.f32 %v7795_v24, %v1493_v46  ;;  %v1491_v32 = vadd.f32 %v1360_v18, %v9016_v7  ;;  %v4001_v7 = vsel %vm3954_vm3, %v3998_v59, %v4000_v62  ;;  %v4680_v18 = vsel %vm3954_vm3, %v4677_v4, %v4679_v55  ;;  %v9904_v4 = vld [vmem:[#allocation17_spill] sm:$0xff] }
 0x19a   : > { %v7732_v43 = vpop.f32.mrf.mxu1  ;;  %v7796_v63 = vpop.f32.mrf.mxu0  ;;  %v5320_v40 = vrot.slane %v5318_v2, 3  ;;  %v9272_v31 = vor.u32 %v5328_v44, %v5325_v6  ;;  %v6169_v59 = vrot.slane %v8525_v0, 3  ;;  %v5332_v2 = vshrl.u32 %v8527_v10, 16 }
 0x19b   : > { %9900 = vst [vmem:[#allocation30_spill] sm:$0xff] %v9257_v50  ;;  %v9260_v25 = vadd.f32 %v2040_v53, %v1491_v32  ;;  %v1494_v52 = vadd.f32 %v7732_v43, %v9020_v16  ;;  %v5317_v50 = vrot.slane %v5315_v26, 2  ;;  %v9903_v32 = vld [vmem:[#allocation16_spill] sm:$0xff] }
 0x19c   : > { %v1363_v24 = vpop.f32.mrf.mxu1  ;;  %v2043_v46 = vpop.f32.mrf.mxu0 }
 0x19d   : > { %9901 = vst [vmem:[#allocation31_spill] sm:$0xff] %v9260_v25  ;;  %v9269_v53 = vadd.f32 %v7796_v63, %v1494_v52  ;;  %v1492_v16 = vadd.f32 %v1363_v24, %v9903_v32  ;;  %v4681_v25 = vrot.slane %v8522_v48, 2  ;;  %v5335_v63 = vshll.u32 %v8527_v10, 16  ;;  %v9906_v48 = vld [vmem:[#allocation18_spill] sm:$0xff]  ;;  %v8531_v10 = vld [vmem:[#allocation2 + $0x30] sm:$0xff]  }
 0x19e   : > { %v7735_v43 = vpop.f32.mrf.mxu1  ;;  %v7799_v33 = vpop.f32.mrf.mxu0  ;;  %7990 = vmatmul.mubr.bf16.gmra.mxu1 %v3999_v35  ;;  %8054 = vmatmul.mubr.bf16.gmra.mxu0 %v4678_v3  ;;  %v5321_v24 = vor.u32 %v5320_v40, %v5317_v50  ;;  %v6170_v32 = vrot.slane %v9267_v17, 3  ;;  %v5341_v35 = vshrl.u32 %v8529_v15, 16  ;;  %v5344_v3 = vshll.u32 %v8529_v15, 16  ;;  %v9908_v40 = vld [vmem:[#allocation19_spill] sm:$0xff]  ;;  %v8528_v15 = vld [vmem:[#allocation2 + $0x20] sm:$0xff]  }
 0x19f   : > { %9902 = vst [vmem:[#allocation32_spill] sm:$0xff] %v9269_v53  ;;  %v9274_v61 = vadd.f32 %v2043_v46, %v1492_v16  ;;  %v1497_v26 = vadd.f32 %v7735_v43, %v9904_v4  ;;  %7993 = vmatprep.mubr.bf16.mxu1 %v4001_v7  ;;  %8057 = vmatprep.mubr.bf16.mxu0 %v4680_v18  ;;  %v5334_v17 = vrot.slane %v5332_v2, 2  ;;  %v5337_v16 = vrot.slane %v5335_v63, 3 }
 0x1a0   : > { %v1376_v52 = vpop.f32.mrf.mxu1  ;;  %v2056_v53 = vpop.f32.mrf.mxu0  ;;  %v4003_v46 = vsel %vm3954_vm3, %v4000_v62, %v4002_v19  ;;  %v4682_v7 = vsel %vm3954_vm3, %v4679_v55, %v4681_v25  ;;  %v5330_v4 = vsel %vm5313_vm4, %v5321_v24, %v9272_v31  ;;  %v9289_v62 = vld [vmem:[#allocation2 + $0x28] sm:$0xff]   ;;  %v8533_v55 = vld [vmem:[#allocation2 + $0x38] sm:$0xff]   ;;  %v5350_v63 = vshrl.u32 %v8531_v10, 16 }
 0x1a1   : > { %v9278_v60 = vadd.f32 %v7799_v33, %v1497_v26  ;;  %v1495_v6 = vadd.f32 %v1376_v52, %v9906_v48  ;;  %v6171_v26 = vsel %vm6168_vm5, %v6169_v59, %v6170_v32  ;;  %v5343_v52 = vrot.slane %v5341_v35, 2  ;;  %v9912_v24 = vld [vmem:[#allocation21_spill] sm:$0xff] }
 0x1a2   : > { %v7736_v44 = vpop.f32.mrf.mxu1  ;;  %v7800_v0 = vpop.f32.mrf.mxu0  ;;  %v5346_v48 = vrot.slane %v5344_v3, 3  ;;  %v5338_v59 = vor.u32 %v5337_v16, %v5334_v17  ;;  %v6172_v35 = vrot.slane %v8528_v15, 3  ;;  %v9916_v17 = vld [vmem:[#allocation23_spill] sm:$0xff] }
 0x1a3   : > { %9905 = vst [vmem:[#allocation16_spill] sm:$0xff] %v9278_v60  ;;  %v9283_v18 = vadd.f32 %v2056_v53, %v1495_v6  ;;  %v1498_v50 = vadd.f32 %v7736_v44, %v9908_v40  ;;  %v9910_v53 = vld [vmem:[#allocation20_spill] sm:$0xff]  ;;  %v5353_v44 = vshll.u32 %v8531_v10, 16 }
 0x1a4   : > { %v1379_v43 = vpop.f32.mrf.mxu1  ;;  %v2059_v33 = vpop.f32.mrf.mxu0  ;;  %v5339_v15 = vsel %vm5313_vm4, %v9272_v31, %v5338_v59 }
 0x1a5   : > { %9907 = vst [vmem:[#allocation17_spill] sm:$0xff] %v9283_v18  ;;  %v9291_v25 = vadd.f32 %v7800_v0, %v1498_v50  ;;  %v1496_v19 = vadd.f32 %v1379_v43, %v9910_v53  ;;  %v5347_v0 = vor.u32 %v5346_v48, %v5343_v52  ;;  %v6174_v50 = vrot.slane %v9289_v62, 3  ;;  %v8535_v52 = vld [vmem:[#allocation2 + $0x40] sm:$0xff]  }
 0x1a6   : > { %v7739_v6 = vpop.f32.mrf.mxu1  ;;  %v7803_v2 = vpop.f32.mrf.mxu0  ;;  %7994 = vmatmul.mubr.bf16.gmra.mxu1 %v4003_v46  ;;  %8058 = vmatmul.mubr.bf16.gmra.mxu0 %v4682_v7  ;;  %v5359_v43 = vshrl.u32 %v8533_v55, 16  ;;  %v5362_v53 = vshll.u32 %v8533_v55, 16  ;;  %v9914_v46 = vld [vmem:[#allocation22_spill] sm:$0xff] }
 0x1a7   : > { %9909 = vst [vmem:[#allocation18_spill] sm:$0xff] %v9291_v25  ;;  %v9294_v40 = vadd.f32 %v2059_v33, %v1496_v19  ;;  %v1501_v18 = vadd.f32 %v7739_v6, %v9912_v24  ;;  %8077 = vmatprep.mubr.bf16.mxu1 %v5330_v4  ;;  %8141 = vmatprep.mubr.bf16.mxu0 %v6171_v26  ;;  %v5352_v19 = vrot.slane %v5350_v63, 2  ;;  %v8532_v6 = vld [vmem:[#allocation2 + $0x30] sm:$0xff]  }
 0x1a8   : > { %v1392_v3 = vpop.f32.mrf.mxu1  ;;  %v2072_v60 = vpop.f32.mrf.mxu0  ;;  %v6173_v26 = vsel %vm6168_vm5, %v6170_v32, %v6172_v35  ;;  %v5348_v62 = vsel %vm5313_vm4, %v5338_v59, %v5347_v0  ;;  %v6175_v55 = vsel %vm6168_vm5, %v6172_v35, %v6174_v50  ;;  %v5364_v63 = vrot.slane %v5362_v53, 3  ;;  %v9919_v59 = vld [vmem:[#allocation25_spill] sm:$0xff] }
 0x1a9   : > { %9911 = vst [vmem:[#allocation19_spill] sm:$0xff] %v9294_v40  ;;  %v9298_v25 = vadd.f32 %v7803_v2, %v1501_v18  ;;  %v1499_v7 = vadd.f32 %v1392_v3, %v9914_v46  ;;  %v5355_v40 = vrot.slane %v5353_v44, 3  ;;  %v5361_v2 = vrot.slane %v5359_v43, 2  ;;  %v9309_v44 = vld [vmem:[#allocation2 + $0x38] sm:$0xff]  }
 0x1aa   : > { %v7740_v10 = vpop.f32.mrf.mxu1  ;;  %v7804_v33 = vpop.f32.mrf.mxu0  ;;  %v9918_v3 = vld [vmem:[#allocation24_spill] sm:$0xff]  ;;  %v5368_v35 = vshrl.u32 %v8535_v52, 16  ;;  %v5371_v43 = vshll.u32 %v8535_v52, 16 }
 0x1ab   : > { %9913 = vst [vmem:[#allocation20_spill] sm:$0xff] %v9298_v25  ;;  %v9301_v4 = vadd.f32 %v2072_v60, %v1499_v7  ;;  %v1502_v16 = vadd.f32 %v7740_v10, %v9916_v17  ;;  %v8537_v60 = vld [vmem:[#allocation2 + $0x48] sm:$0xff]   ;;  %v5356_v32 = vor.u32 %v5355_v40, %v5352_v19  ;;  %v6176_v10 = vrot.slane %v8532_v6, 3 }
 0x1ac   : > { %v1395_v48 = vpop.f32.mrf.mxu1  ;;  %v2075_v18 = vpop.f32.mrf.mxu0 }
 0x1ad   : > { %9915 = vst [vmem:[#allocation21_spill] sm:$0xff] %v9301_v4  ;;  %v9311_v24 = vadd.f32 %v7804_v33, %v1502_v16  ;;  %v1500_v46 = vadd.f32 %v1395_v48, %v9918_v3  ;;  %v5365_v33 = vor.u32 %v5364_v63, %v5361_v2  ;;  %v6178_v16 = vrot.slane %v9309_v44, 3  ;;  %v8536_v44 = vld [vmem:[#allocation2 + $0x40] sm:$0xff]  }
 0x1ae   : > { %v7823_v7 = vpop.f32.mrf.mxu1  ;;  %v7887_v31 = vpop.f32.mrf.mxu0  ;;  %8078 = vmatmul.mubr.bf16.vlgmr.msra.gmra.mxu1 %v5339_v15  ;;  %8142 = vmatmul.mubr.bf16.vlgmr.msra.gmra.mxu0 %v6173_v26  ;;  %v5377_v48 = vshrl.u32 %v8537_v60, 16  ;;  %v5380_v3 = vshll.u32 %v8537_v60, 16  ;;  %v9920_v15 = vld [vmem:[#allocation26_spill] sm:$0xff]  ;;  %v5357_v26 = vsel %vm5313_vm4, %v5347_v0, %v5356_v32  ;;  %v5370_v2 = vrot.slane %v5368_v35, 2  ;;  %v8541_v0 = vld [vmem:[#allocation2 + $0x58] sm:$0xff]  }
 0x1af   : > { %9917 = vst [vmem:[#allocation22_spill] sm:$0xff] %v9311_v24  ;;  %v9314_v17 = vadd.f32 %v2075_v18, %v1500_v46  ;;  %v2816_v4 = vadd.f32 %v7823_v7, %v9919_v59  ;;  %8081 = vmatprep.mubr.bf16.mxu1 %v5348_v62  ;;  %8145 = vmatprep.mubr.bf16.mxu0 %v6175_v55  ;;  %v8539_v62 = vld [vmem:[#allocation2 + $0x50] sm:$0xff]   ;;  %v5373_v63 = vrot.slane %v5371_v43, 3 }
 0x1b0   : > { %v2575_v53 = vpop.f32.mrf.mxu1  ;;  %v3430_v25 = vpop.f32.mrf.mxu0  ;;  %v6177_v18 = vsel %vm6168_vm5, %v6174_v50, %v6176_v10  ;;  %v6179_v7 = vsel %vm6168_vm5, %v6176_v10, %v6178_v16  ;;  %v5382_v59 = vrot.slane %v5380_v3, 3  ;;  %v5386_v35 = vshrl.u32 %v8539_v62, 16 }
 0x1b1   : > { %v9318_v24 = vadd.f32 %v7887_v31, %v2816_v4  ;;  %v2814_v40 = vadd.f32 %v2575_v53, %v9920_v15  ;;  %v5366_v4 = vsel %vm5313_vm4, %v5356_v32, %v5365_v33  ;;  %v5379_v31 = vrot.slane %v5377_v48, 2  ;;  %v9328_v53 = vld [vmem:[#allocation2 + $0x48] sm:$0xff]  }
 0x1b2   : > { %v7824_v19 = vpop.f32.mrf.mxu1  ;;  %v7888_v6 = vpop.f32.mrf.mxu0  ;;  %v5389_v43 = vshll.u32 %v8539_v62, 16  ;;  %v5374_v10 = vor.u32 %v5373_v63, %v5370_v2  ;;  %v6180_v48 = vrot.slane %v8536_v44, 3 }
 0x1b3   : > { %v9323_v55 = vadd.f32 %v3430_v25, %v2814_v40  ;;  %v2817_v52 = vadd.f32 %v7824_v19, %v9095_v45 }
 0x1b4   : > { %v2578_v46 = vpop.f32.mrf.mxu1  ;;  %v3433_v60 = vpop.f32.mrf.mxu0  ;;  %v5375_v63 = vsel %vm5313_vm4, %v5365_v33, %v5374_v10  ;;  %v6181_v44 = vsel %vm6168_vm5, %v6178_v16, %v6180_v48 }
 0x1b5   : > { %v9330_v50 = vadd.f32 %v7888_v6, %v2817_v52  ;;  %v2815_v25 = vadd.f32 %v2578_v46, %v9098_v42  ;;  %v5383_v6 = vor.u32 %v5382_v59, %v5379_v31  ;;  %v6182_v52 = vrot.slane %v9328_v53, 3 }
 0x1b6   : > { %v7827_v15 = vpop.f32.mrf.mxu1  ;;  %v7891_v45 = vpop.f32.mrf.mxu0  ;;  %8082 = vmatmul.mubr.bf16.gmra.mxu1 %v5357_v26  ;;  %8146 = vmatmul.mubr.bf16.gmra.mxu0 %v6177_v18  ;;  %v5395_v42 = vshrl.u32 %v8541_v0, 16  ;;  %v5398_v46 = vshll.u32 %v8541_v0, 16 }
 0x1b7   : > { %9921 = vst [vmem:[#allocation23_spill] sm:$0xff] %v9330_v50  ;;  %v9333_v40 = vadd.f32 %v3433_v60, %v2815_v25  ;;  %v2820_v32 = vadd.f32 %v7827_v15, %v9103_v12  ;;  %8085 = vmatprep.mubr.bf16.mxu1 %v5366_v4  ;;  %8149 = vmatprep.mubr.bf16.mxu0 %v6179_v7  ;;  %v5388_v60 = vrot.slane %v5386_v35, 2  ;;  %v5391_v25 = vrot.slane %v5389_v43, 3  ;;  %v8540_v12 = vld [vmem:[#allocation2 + $0x50] sm:$0xff]   ;;  %v8543_v7 = vld [vmem:[#allocation2 + $0x60] sm:$0xff]   ;;  %v8545_v35 = vld [vmem:[#allocation2 + $0x68] sm:$0xff]  }
 0x1b8   : > { %v2591_v3 = vpop.f32.mrf.mxu1  ;;  %v3446_v19 = vpop.f32.mrf.mxu0  ;;  %v5384_v53 = vsel %vm5313_vm4, %v5374_v10, %v5383_v6  ;;  %v5397_v0 = vrot.slane %v5395_v42, 2  ;;  %v5400_v15 = vrot.slane %v5398_v46, 3  ;;  %v5407_v42 = vshll.u32 %v8543_v7, 16 }
 0x1b9   : > { %v9337_v50 = vadd.f32 %v7891_v45, %v2820_v32  ;;  %v2818_v26 = vadd.f32 %v2591_v3, %v9106_v13  ;;  %v6183_v13 = vsel %vm6168_vm5, %v6180_v48, %v6182_v52  ;;  %v9347_v45 = vld [vmem:[#allocation2 + $0x58] sm:$0xff]   ;;  %v5392_v16 = vor.u32 %v5391_v25, %v5388_v60 }
 0x1ba   : > { %v7828_v18 = vpop.f32.mrf.mxu1  ;;  %v7892_v62 = vpop.f32.mrf.mxu0  ;;  %v6184_v3 = vrot.slane %v8540_v12, 3  ;;  %v5404_v48 = vshrl.u32 %v8543_v7, 16 }
 0x1bb   : > { %v9340_v4 = vadd.f32 %v3446_v19, %v2818_v26  ;;  %v2821_v2 = vadd.f32 %v7828_v18, %v9119_v9  ;;  %v5401_v18 = vor.u32 %v5400_v15, %v5397_v0  ;;  %v5409_v0 = vrot.slane %v5407_v42, 3 }
 0x1bc   : > { %v2594_v31 = vpop.f32.mrf.mxu1  ;;  %v3449_v59 = vpop.f32.mrf.mxu0 }
 0x1bd   : > { %v9349_v43 = vadd.f32 %v7892_v62, %v2821_v2  ;;  %v2819_v9 = vadd.f32 %v2594_v31, %v9122_v20  ;;  %v6186_v62 = vrot.slane %v9347_v45, 3  ;;  %v5413_v20 = vshrl.u32 %v8545_v35, 16 }
 0x1be   : > { %v7831_v32 = vpop.f32.mrf.mxu1  ;;  %v7895_v33 = vpop.f32.mrf.mxu0  ;;  %8086 = vmatmul.mubr.bf16.gmra.mxu1 %v5375_v63  ;;  %8150 = vmatmul.mubr.bf16.gmra.mxu0 %v6181_v44  ;;  %v5416_v2 = vshll.u32 %v8545_v35, 16  ;;  %v5393_v63 = vsel %vm5313_vm4, %v5383_v6, %v5392_v16  ;;  %v8544_v44 = vld [vmem:[#allocation2 + $0x60] sm:$0xff]   ;;  %v5402_v35 = vsel %vm5313_vm4, %v5392_v16, %v5401_v18  ;;  %v8549_v6 = vld [vmem:[#allocation2 + $0x78] sm:$0xff]  }
 0x1bf   : > { %v9352_v19 = vadd.f32 %v3449_v59, %v2819_v9  ;;  %v2824_v10 = vadd.f32 %v7831_v32, %v9127_v8  ;;  %8089 = vmatprep.mubr.bf16.mxu1 %v5384_v53  ;;  %8153 = vmatprep.mubr.bf16.mxu0 %v6183_v13  ;;  %v6185_v8 = vsel %vm6168_vm5, %v6182_v52, %v6184_v3  ;;  %v8547_v59 = vld [vmem:[#allocation2 + $0x70] sm:$0xff]   ;;  %v5406_v13 = vrot.slane %v5404_v48, 2 }
 0x1c0   : > { %v2607_v46 = vpop.f32.mrf.mxu1  ;;  %v3462_v26 = vpop.f32.mrf.mxu0  ;;  %v5415_v9 = vrot.slane %v5413_v20, 2  ;;  %v5418_v32 = vrot.slane %v5416_v2, 3  ;;  %v5422_v48 = vshrl.u32 %v8547_v59, 16  ;;  %v5425_v20 = vshll.u32 %v8547_v59, 16 }
 0x1c1   : > { %v9356_v31 = vadd.f32 %v7895_v33, %v2824_v10  ;;  %v2822_v60 = vadd.f32 %v2607_v46, %v9130_v38  ;;  %v6187_v38 = vsel %vm6168_vm5, %v6184_v3, %v6186_v62  ;;  %v9366_v33 = vld [vmem:[#allocation2 + $0x68] sm:$0xff]   ;;  %v5410_v3 = vor.u32 %v5409_v0, %v5406_v13 }
 0x1c2   : > { %v7832_v25 = vpop.f32.mrf.mxu1  ;;  %v7896_v12 = vpop.f32.mrf.mxu0  ;;  %v5427_v0 = vrot.slane %v5425_v20, 3 }
 0x1c3   : > { %v9361_v7 = vadd.f32 %v3462_v26, %v2822_v60  ;;  %v2825_v53 = vadd.f32 %v7832_v25, %v9141_v56  ;;  %v6188_v56 = vrot.slane %v8544_v44, 3  ;;  %v5419_v25 = vor.u32 %v5418_v32, %v5415_v9  ;;  %v8548_v9 = vld [vmem:[#allocation2 + $0x70] sm:$0xff]  }
 0x1c4   : > { %v2610_v15 = vpop.f32.mrf.mxu1  ;;  %v3465_v45 = vpop.f32.mrf.mxu0  ;;  %v5411_v13 = vsel %vm5313_vm4, %v5401_v18, %v5410_v3 }
 0x1c5   : > { %v9368_v52 = vadd.f32 %v7896_v12, %v2825_v53  ;;  %v2823_v10 = vadd.f32 %v2610_v15, %v9144_v30  ;;  %v6190_v12 = vrot.slane %v9366_v33, 3  ;;  %v5431_v30 = vshrl.u32 %v8549_v6, 16 }
 0x1c6   : > { %v7835_v46 = vpop.f32.mrf.mxu1  ;;  %v7899_v26 = vpop.f32.mrf.mxu0  ;;  %8090 = vmatmul.mubr.bf16.gmra.mxu1 %v5393_v63  ;;  %8154 = vmatmul.mubr.bf16.gmra.mxu0 %v6185_v8  ;;  %v5434_v53 = vshll.u32 %v8549_v6, 16  ;;  %v5420_v6 = vsel %vm5313_vm4, %v5410_v3, %v5419_v25 }
 0x1c7   : > { %v9371_v42 = vadd.f32 %v3465_v45, %v2823_v10  ;;  %v2828_v16 = vadd.f32 %v7835_v46, %v9149_v37  ;;  %8093 = vmatprep.mubr.bf16.mxu1 %v5402_v35  ;;  %8157 = vmatprep.mubr.bf16.mxu0 %v6187_v38  ;;  %v6189_v45 = vsel %vm6168_vm5, %v6186_v62, %v6188_v56  ;;  %v5424_v37 = vrot.slane %v5422_v48, 2  ;;  %v8551_v35 = vld [vmem:[#allocation2 + $0x80] sm:$0xff]   ;;  %v8553_v62 = vld [vmem:[#allocation2 + $0x88] sm:$0xff]  }
 0x1c8   : > { %v2623_v2 = vpop.f32.mrf.mxu1  ;;  %v3478_v60 = vpop.f32.mrf.mxu0  ;;  %v5433_v10 = vrot.slane %v5431_v30, 2  ;;  %v5436_v46 = vrot.slane %v5434_v53, 3  ;;  %v5440_v18 = vshrl.u32 %v8551_v35, 16  ;;  %v5443_v20 = vshll.u32 %v8551_v35, 16 }
 0x1c9   : > { %v9375_v15 = vadd.f32 %v7899_v26, %v2828_v16  ;;  %v2826_v63 = vadd.f32 %v2623_v2, %v9152_v34  ;;  %v6191_v34 = vsel %vm6168_vm5, %v6188_v56, %v6190_v12  ;;  %v9385_v26 = vld [vmem:[#allocation2 + $0x78] sm:$0xff]   ;;  %v5428_v56 = vor.u32 %v5427_v0, %v5424_v37 }
 0x1ca   : > { %v7836_v8 = vpop.f32.mrf.mxu1  ;;  %v7900_v44 = vpop.f32.mrf.mxu0  ;;  %v6192_v30 = vrot.slane %v8548_v9, 3 }
 0x1cb   : > { %v9379_v38 = vadd.f32 %v3478_v60, %v2826_v63  ;;  %v2829_v59 = vadd.f32 %v7836_v8, %v9159_v14  ;;  %v5437_v8 = vor.u32 %v5436_v46, %v5433_v10  ;;  %v5429_v0 = vsel %vm5313_vm4, %v5419_v25, %v5428_v56 }
 0x1cc   : > { %v2626_v32 = vpop.f32.mrf.mxu1  ;;  %v3481_v33 = vpop.f32.mrf.mxu0  ;;  %v6193_v9 = vsel %vm6168_vm5, %v6190_v12, %v6192_v30 }
 0x1cd   : > { %v9387_v48 = vadd.f32 %v7900_v44, %v2829_v59  ;;  %v2827_v16 = vadd.f32 %v2626_v32, %v9162_v58  ;;  %v6194_v44 = vrot.slane %v9385_v26, 3  ;;  %v5449_v58 = vshrl.u32 %v8553_v62, 16 }
 0x1ce   : > { %v7839_v14 = vpop.f32.mrf.mxu1  ;;  %v7903_v2 = vpop.f32.mrf.mxu0  ;;  %8094 = vmatmul.mubr.bf16.gmra.mxu1 %v5411_v13  ;;  %8158 = vmatmul.mubr.bf16.gmra.mxu0 %v6189_v45  ;;  %v5452_v59 = vshll.u32 %v8553_v62, 16  ;;  %v5438_v26 = vsel %vm5313_vm4, %v5428_v56, %v5437_v8 }
 0x1cf   : > { %v9390_v60 = vadd.f32 %v3481_v33, %v2827_v16  ;;  %v2832_v3 = vadd.f32 %v7839_v14, %v9165_v22  ;;  %8097 = vmatprep.mubr.bf16.mxu1 %v5420_v6  ;;  %8161 = vmatprep.mubr.bf16.mxu0 %v6191_v34  ;;  %v5442_v33 = vrot.slane %v5440_v18, 2  ;;  %v5445_v16 = vrot.slane %v5443_v20, 3  ;;  %v8552_v22 = vld [vmem:[#allocation2 + $0x80] sm:$0xff]   ;;  %v8555_v34 = vld [vmem:[#allocation2 + $0x90] sm:$0xff]   ;;  %v8557_v18 = vld [vmem:[#allocation2 + $0x98] sm:$0xff]  }
 0x1d0   : > { %v2639_v53 = vpop.f32.mrf.mxu1  ;;  %v3494_v63 = vpop.f32.mrf.mxu0  ;;  %v5451_v62 = vrot.slane %v5449_v58, 2  ;;  %v5454_v14 = vrot.slane %v5452_v59, 3  ;;  %v5461_v58 = vshll.u32 %v8555_v34, 16 }
 0x1d1   : > { %v9394_v32 = vadd.f32 %v7903_v2, %v2832_v3  ;;  %v2830_v45 = vadd.f32 %v2639_v53, %v9168_v51  ;;  %v6195_v51 = vsel %vm6168_vm5, %v6192_v30, %v6194_v44  ;;  %v9404_v2 = vld [vmem:[#allocation2 + $0x88] sm:$0xff]   ;;  %v5446_v12 = vor.u32 %v5445_v16, %v5442_v33 }
 0x1d2   : > { %v7840_v35 = vpop.f32.mrf.mxu1  ;;  %v7904_v13 = vpop.f32.mrf.mxu0  ;;  %v6196_v53 = vrot.slane %v8552_v22, 3  ;;  %v5458_v30 = vshrl.u32 %v8555_v34, 16 }
 0x1d3   : > { %v9397_v6 = vadd.f32 %v3494_v63, %v2830_v45  ;;  %v2833_v37 = vadd.f32 %v7840_v35, %v9175_v41  ;;  %v5455_v35 = vor.u32 %v5454_v14, %v5451_v62  ;;  %v8556_v62 = vld [vmem:[#allocation2 + $0x90] sm:$0xff]  }
 0x1d4   : > { %v2642_v10 = vpop.f32.mrf.mxu1  ;;  %v3497_v46 = vpop.f32.mrf.mxu0 }
 0x1d5   : > { %v9406_v20 = vadd.f32 %v7904_v13, %v2833_v37  ;;  %v2831_v41 = vadd.f32 %v2642_v10, %v9178_v57  ;;  %v6198_v13 = vrot.slane %v9404_v2, 3  ;;  %v5467_v57 = vshrl.u32 %v8557_v18, 16 }
 0x1d6   : > { %v7843_v3 = vpop.f32.mrf.mxu1  ;;  %v7907_v25 = vpop.f32.mrf.mxu0  ;;  %8098 = vmatmul.mubr.bf16.gmra.mxu1 %v5429_v0  ;;  %8162 = vmatmul.mubr.bf16.gmra.mxu0 %v6193_v9  ;;  %v5470_v37 = vshll.u32 %v8557_v18, 16  ;;  %v5447_v0 = vsel %vm5313_vm4, %v5437_v8, %v5446_v12  ;;  %v8559_v9 = vld [vmem:[#allocation2 + $0xa0] sm:$0xff]   ;;  %v5456_v18 = vsel %vm5313_vm4, %v5446_v12, %v5455_v35  ;;  %v8561_v8 = vld [vmem:[#allocation2 + $0xa8] sm:$0xff]  }
 0x1d7   : > { %v9409_v63 = vadd.f32 %v3497_v46, %v2831_v41  ;;  %v2836_v56 = vadd.f32 %v7843_v3, %v9181_v29  ;;  %8101 = vmatprep.mubr.bf16.mxu1 %v5438_v26  ;;  %8165 = vmatprep.mubr.bf16.mxu0 %v6195_v51  ;;  %v6197_v29 = vsel %vm6168_vm5, %v6194_v44, %v6196_v53  ;;  %v5460_v26 = vrot.slane %v5458_v30, 2 }
 0x1d8   : > { %v2655_v59 = vpop.f32.mrf.mxu1  ;;  %v3510_v45 = vpop.f32.mrf.mxu0  ;;  %v5463_v51 = vrot.slane %v5461_v58, 3  ;;  %v5469_v41 = vrot.slane %v5467_v57, 2  ;;  %v5472_v3 = vrot.slane %v5470_v37, 3  ;;  %v5476_v30 = vshrl.u32 %v8559_v9, 16 }
 0x1d9   : > { %v9413_v10 = vadd.f32 %v7907_v25, %v2836_v56  ;;  %v2834_v33 = vadd.f32 %v2655_v59, %v9184_v39  ;;  %v6199_v39 = vsel %vm6168_vm5, %v6196_v53, %v6198_v13  ;;  %v9423_v25 = vld [vmem:[#allocation2 + $0x98] sm:$0xff]   ;;  %v5479_v58 = vshll.u32 %v8559_v9, 16 }
 0x1da   : > { %v7844_v16 = vpop.f32.mrf.mxu1  ;;  %v7908_v22 = vpop.f32.mrf.mxu0  ;;  %v5464_v53 = vor.u32 %v5463_v51, %v5460_v26  ;;  %v6200_v57 = vrot.slane %v8556_v62, 3 }
 0x1db   : > { %v9418_v46 = vadd.f32 %v3510_v45, %v2834_v33  ;;  %v2837_v34 = vadd.f32 %v7844_v16, %v9191_v49  ;;  %v5473_v16 = vor.u32 %v5472_v3, %v5469_v41 }
 0x1dc   : > { %v2658_v14 = vpop.f32.mrf.mxu1  ;;  %v3513_v2 = vpop.f32.mrf.mxu0  ;;  %v5465_v51 = vsel %vm5313_vm4, %v5455_v35, %v5464_v53  ;;  %v6201_v62 = vsel %vm6168_vm5, %v6198_v13, %v6200_v57 }
 0x1dd   : > { %v9425_v44 = vadd.f32 %v7908_v22, %v2837_v34  ;;  %v2835_v56 = vadd.f32 %v2658_v14, %v9194_v28  ;;  %v6202_v22 = vrot.slane %v9423_v25, 3  ;;  %v5485_v28 = vshrl.u32 %v8561_v8, 16 }
 0x1de   : > { %v7847_v59 = vpop.f32.mrf.mxu1  ;;  %v7911_v49 = vpop.f32.mrf.mxu0  ;;  %8102 = vmatmul.mubr.bf16.gmra.mxu1 %v5447_v0  ;;  %8166 = vmatmul.mubr.bf16.gmra.mxu0 %v6197_v29  ;;  %v5488_v34 = vshll.u32 %v8561_v8, 16  ;;  %v5474_v25 = vsel %vm5313_vm4, %v5464_v53, %v5473_v16 }
 0x1df   : > { %v9428_v45 = vadd.f32 %v3513_v2, %v2835_v56  ;;  %v2840_v12 = vadd.f32 %v7847_v59, %v9197_v5  ;;  %8105 = vmatprep.mubr.bf16.mxu1 %v5456_v18  ;;  %8169 = vmatprep.mubr.bf16.mxu0 %v6199_v39  ;;  %v5478_v2 = vrot.slane %v5476_v30, 2  ;;  %v5481_v56 = vrot.slane %v5479_v58, 3  ;;  %v8560_v5 = vld [vmem:[#allocation2 + $0xa0] sm:$0xff]   ;;  %v8563_v39 = vld [vmem:[#allocation2 + $0xb0] sm:$0xff]   ;;  %v8565_v30 = vld [vmem:[#allocation2 + $0xb8] sm:$0xff]  }
 0x1e0   : > { %v2671_v37 = vpop.f32.mrf.mxu1  ;;  %v3526_v33 = vpop.f32.mrf.mxu0  ;;  %v5487_v8 = vrot.slane %v5485_v28, 2  ;;  %v5490_v59 = vrot.slane %v5488_v34, 3  ;;  %v5497_v28 = vshll.u32 %v8563_v39, 16 }
 0x1e1   : > { %v9432_v14 = vadd.f32 %v7911_v49, %v2840_v12  ;;  %v2838_v0 = vadd.f32 %v2671_v37, %v9200_v47  ;;  %v6203_v47 = vsel %vm6168_vm5, %v6200_v57, %v6202_v22  ;;  %v9442_v49 = vld [vmem:[#allocation2 + $0xa8] sm:$0xff]   ;;  %v5482_v13 = vor.u32 %v5481_v56, %v5478_v2 }
 0x1e2   : > { %v7848_v29 = vpop.f32.mrf.mxu1  ;;  %v7912_v9 = vpop.f32.mrf.mxu0  ;;  %v6204_v37 = vrot.slane %v8560_v5, 3  ;;  %v5494_v57 = vshrl.u32 %v8563_v39, 16 }
 0x1e3   : > { %v9435_v18 = vadd.f32 %v3526_v33, %v2838_v0  ;;  %v2841_v26 = vadd.f32 %v7848_v29, %v9207_v27  ;;  %v5491_v29 = vor.u32 %v5490_v59, %v5487_v8  ;;  %v8564_v8 = vld [vmem:[#allocation2 + $0xb0] sm:$0xff]  }
 0x1e4   : > { %v2674_v41 = vpop.f32.mrf.mxu1  ;;  %v3529_v3 = vpop.f32.mrf.mxu0 }
 0x1e5   : > { %v9444_v58 = vadd.f32 %v7912_v9, %v2841_v26  ;;  %v2839_v27 = vadd.f32 %v2674_v41, %v9210_v36  ;;  %v6206_v9 = vrot.slane %v9442_v49, 3  ;;  %v5503_v36 = vshrl.u32 %v8565_v30, 16 }
 0x1e6   : > { %v7851_v12 = vpop.f32.mrf.mxu1  ;;  %v7915_v35 = vpop.f32.mrf.mxu0  ;;  %8106 = vmatmul.mubr.bf16.gmra.mxu1 %v5465_v51  ;;  %8170 = vmatmul.mubr.bf16.gmra.mxu0 %v6201_v62  ;;  %v5506_v26 = vshll.u32 %v8565_v30, 16  ;;  %v5483_v51 = vsel %vm5313_vm4, %v5473_v16, %v5482_v13  ;;  %v8567_v62 = vld [vmem:[#allocation2 + $0xc0] sm:$0xff]   ;;  %v5492_v30 = vsel %vm5313_vm4, %v5482_v13, %v5491_v29  ;;  %v8569_v16 = vld [vmem:[#allocation2 + $0xc8] sm:$0xff]  }
 0x1e7   : > { %v9447_v33 = vadd.f32 %v3529_v3, %v2839_v27  ;;  %v2844_v53 = vadd.f32 %v7851_v12, %v9213_v1  ;;  %8109 = vmatprep.mubr.bf16.mxu1 %v5474_v25  ;;  %8173 = vmatprep.mubr.bf16.mxu0 %v6203_v47  ;;  %v6205_v1 = vsel %vm6168_vm5, %v6202_v22, %v6204_v37  ;;  %v5496_v25 = vrot.slane %v5494_v57, 2 }
 0x1e8   : > { %v2687_v34 = vpop.f32.mrf.mxu1  ;;  %v3542_v0 = vpop.f32.mrf.mxu0  ;;  %v5499_v47 = vrot.slane %v5497_v28, 3  ;;  %v5505_v27 = vrot.slane %v5503_v36, 2  ;;  %v5508_v12 = vrot.slane %v5506_v26, 3  ;;  %v5512_v57 = vshrl.u32 %v8567_v62, 16 }
 0x1e9   : > { %v9451_v41 = vadd.f32 %v7915_v35, %v2844_v53  ;;  %v2842_v2 = vadd.f32 %v2687_v34, %v9216_v23  ;;  %v6207_v23 = vsel %vm6168_vm5, %v6204_v37, %v6206_v9  ;;  %v9461_v35 = vld [vmem:[#allocation2 + $0xb8] sm:$0xff]   ;;  %v5515_v28 = vshll.u32 %v8567_v62, 16 }
 0x1ea   : > { %v7852_v56 = vpop.f32.mrf.mxu1  ;;  %v7916_v5 = vpop.f32.mrf.mxu0  ;;  %v5500_v37 = vor.u32 %v5499_v47, %v5496_v25  ;;  %v6208_v36 = vrot.slane %v8564_v8, 3  ;;  %v9925_v25 = vld [vmem:[#allocation28_spill] sm:$0xff] }
 0x1eb   : > { %v9456_v3 = vadd.f32 %v3542_v0, %v2842_v2  ;;  %v2845_v39 = vadd.f32 %v7852_v56, %v9227_v21  ;;  %v5509_v56 = vor.u32 %v5508_v12, %v5505_v27  ;;  %v8571_v27 = vld [vmem:[#allocation2 + $0xd0] ss:$0 sps:$4 sm:$0x77]  }
 0x1ec   : > { %v2690_v59 = vpop.f32.mrf.mxu1  ;;  %v3545_v49 = vpop.f32.mrf.mxu0  ;;  %v5501_v8 = vsel %vm5313_vm4, %v5491_v29, %v5500_v37 }
 0x1ed   : > { %v9463_v22 = vadd.f32 %v7916_v5, %v2845_v39  ;;  %v2843_v53 = vadd.f32 %v2690_v59, %v9230_v11  ;;  %v6210_v5 = vrot.slane %v9461_v35, 3  ;;  %v5521_v11 = vshrl.u32 %v8569_v16, 16 }
 0x1ee   : > { %v7855_v34 = vpop.f32.mrf.mxu1  ;;  %v7919_v21 = vpop.f32.mrf.mxu0  ;;  %8110 = vmatmul.mubr.bf16.gmra.mxu1 %v5483_v51  ;;  %8174 = vmatmul.mubr.bf16.gmra.mxu0 %v6205_v1  ;;  %v5524_v39 = vshll.u32 %v8569_v16, 16  ;;  %v9923_v51 = vld [vmem:[#allocation27_spill] sm:$0xff]  ;;  %v5510_v16 = vsel %vm5313_vm4, %v5500_v37, %v5509_v56  ;;  %v5530_v37 = vshrl.u32 %v8571_v27, 16 }
 0x1ef   : > { %v9466_v0 = vadd.f32 %v3545_v49, %v2843_v53  ;;  %v2848_v13 = vadd.f32 %v7855_v34, %v9235_v54  ;;  %8113 = vmatprep.mubr.bf16.mxu1 %v5492_v30  ;;  %8177 = vmatprep.mubr.bf16.mxu0 %v6207_v23  ;;  %v5514_v53 = vrot.slane %v5512_v57, 2  ;;  %v8568_v54 = vld [vmem:[#allocation2 + $0xc0] sm:$0xff]   ;;  %v6209_v23 = vsel %vm6168_vm5, %v6206_v9, %v6208_v36  ;;  %v8570_v57 = vld [vmem:[#allocation2 + $0xc8] sm:$0xff]  }
 0x1f0   : > { %v2703_v26 = vpop.f32.mrf.mxu1  ;;  %v3558_v2 = vpop.f32.mrf.mxu0  ;;  %v6211_v34 = vsel %vm6168_vm5, %v6208_v36, %v6210_v5  ;;  %v6212_v9 = vrot.slane %v8568_v54, 3  ;;  %v5533_v36 = vshll.u32 %v8571_v27, 16 }
 0x1f1   : > { %9922 = vst [vmem:[#allocation24_spill] sm:$0xff] %v9466_v0  ;;  %v9470_v59 = vadd.f32 %v7919_v21, %v2848_v13  ;;  %v2846_v1 = vadd.f32 %v2703_v26, %v9923_v51  ;;  %v5517_v0 = vrot.slane %v5515_v28, 3  ;;  %v5523_v21 = vrot.slane %v5521_v11, 2  ;;  %v9927_v26 = vld [vmem:[#allocation29_spill] sm:$0xff] }
 0x1f2   : > { %v7856_v62 = vpop.f32.mrf.mxu1  ;;  %v7920_v49 = vpop.f32.mrf.mxu0  ;;  %v5526_v13 = vrot.slane %v5524_v39, 3  ;;  %v5535_v27 = vrot.slane %v5533_v36, 3 }
 0x1f3   : > { %v9473_v30 = vadd.f32 %v3558_v2, %v2846_v1  ;;  %v2849_v47 = vadd.f32 %v7856_v62, %v9925_v25  ;;  %v5518_v29 = vor.u32 %v5517_v0, %v5514_v53  ;;  %v9928_v25 = vld [vmem:[#allocation30_spill] sm:$0xff]  ;;  %v6213_v53 = vsel %vm6168_vm5, %v6210_v5, %v6212_v9 }
 0x1f4   : > { %v2706_v12 = vpop.f32.mrf.mxu1  ;;  %v3561_v35 = vpop.f32.mrf.mxu0 }
 0x1f5   : > { %9924 = vst [vmem:[#allocation25_spill] sm:$0xff] %v9473_v30  ;;  %v9480_v28 = vadd.f32 %v7920_v49, %v2849_v47  ;;  %v2847_v2 = vadd.f32 %v2706_v12, %v9927_v26  ;;  %v5527_v49 = vor.u32 %v5526_v13, %v5523_v21  ;;  %v6214_v47 = vrot.slane %v8570_v57, 3  ;;  %v9929_v12 = vld [vmem:[#allocation31_spill] sm:$0xff] }
 0x1f6   : > { %v7859_v51 = vpop.f32.mrf.mxu1  ;;  %v7923_v1 = vpop.f32.mrf.mxu0  ;;  %8114 = vmatmul.mubr.bf16.gmra.mxu1 %v5501_v8  ;;  %8178 = vmatmul.mubr.bf16.gmra.mxu0 %v6209_v23  ;;  %v5519_v0 = vsel %vm5313_vm4, %v5509_v56, %v5518_v29 }
 0x1f7   : > { %9926 = vst [vmem:[#allocation26_spill] sm:$0xff] %v9480_v28  ;;  %v9483_v62 = vadd.f32 %v3561_v35, %v2847_v2  ;;  %v2852_v30 = vadd.f32 %v7859_v51, %v9928_v25  ;;  %8117 = vmatprep.mubr.bf16.mxu1 %v5510_v16  ;;  %8181 = vmatprep.mubr.bf16.mxu0 %v6211_v34  ;;  %v9930_v35 = vld [vmem:[#allocation32_spill] sm:$0xff]  ;;  %v5532_v34 = vrot.slane %v5530_v37, 2  ;;  %v8572_v2 = vld [vmem:[#allocation2 + $0xd0] ss:$0 sps:$4 sm:$0x77]  }
 0x1f8   : > { %v2719_v11 = vpop.f32.mrf.mxu1  ;;  %v3574_v39 = vpop.f32.mrf.mxu0  ;;  %v6215_v13 = vsel %vm6168_vm5, %v6212_v9, %v6214_v47  ;;  %v9932_v9 = vld [vmem:[#allocation17_spill] sm:$0xff] }
 0x1f9   : > { %v9486_v28 = vadd.f32 %v7923_v1, %v2852_v30  ;;  %v2850_v26 = vadd.f32 %v2719_v11, %v9929_v12  ;;  %v5528_v30 = vsel %vm5313_vm4, %v5518_v29, %v5527_v49  ;;  %v9931_v11 = vld [vmem:[#allocation16_spill] sm:$0xff]  ;;  %v5536_v36 = vor.u32 %v5535_v27, %v5532_v34  ;;  %v9934_v27 = vld [vmem:[#allocation19_spill] sm:$0xff] }
 0x1fa   : > { %v7860_v8 = vpop.f32.mrf.mxu1  ;;  %v7924_v23 = vpop.f32.mrf.mxu0 }
 0x1fb   : > { %v9491_v54 = vadd.f32 %v3574_v39, %v2850_v26  ;;  %v2853_v16 = vadd.f32 %v7860_v8, %v9930_v35  ;;  %v6216_v39 = vrot.slane %v8572_v2, 3 }
 0x1fc   : > { %v2722_v51 = vpop.f32.mrf.mxu1  ;;  %v3577_v21 = vpop.f32.mrf.mxu0 }
 0x1fd   : > { %v9496_v57 = vadd.f32 %v7924_v23, %v2853_v16  ;;  %v2851_v1 = vadd.f32 %v2722_v51, %v9274_v61  ;;  %v5537_v16 = vsel %vm5313_vm4, %v5527_v49, %v5536_v36  ;;  %v6217_v51 = vsel %vm6168_vm5, %v6214_v47, %v6216_v39  ;;  %v9936_v49 = vld [vmem:[#allocation21_spill] sm:$0xff] }
 0x1fe   : > { %v7863_v56 = vpop.f32.mrf.mxu1  ;;  %v7927_v25 = vpop.f32.mrf.mxu0  ;;  %8118 = vmatmul.mubr.bf16.gmra.mxu1 %v5519_v0  ;;  %8182 = vmatmul.mubr.bf16.gmra.mxu0 %v6213_v53  ;;  %v9933_v0 = vld [vmem:[#allocation18_spill] sm:$0xff] }
 0x1ff   : > { %v9499_v5 = vadd.f32 %v3577_v21, %v2851_v1  ;;  %v2856_v37 = vadd.f32 %v7863_v56, %v9931_v11  ;;  %8121 = vmatprep.mubr.bf16.mxu1 %v5528_v30  ;;  %8185 = vmatprep.mubr.bf16.mxu0 %v6215_v13 }
 0x200   : > { %v2735_v12 = vpop.f32.mrf.mxu1  ;;  %v3590_v29 = vpop.f32.mrf.mxu0 }
 0x201   : > { %v9502_v26 = vadd.f32 %v7927_v25, %v2856_v37  ;;  %v2854_v8 = vadd.f32 %v2735_v12, %v9932_v9  ;;  %v9935_v25 = vld [vmem:[#allocation20_spill] sm:$0xff] }
 0x202   : > { %v7864_v23 = vpop.f32.mrf.mxu1  ;;  %v7928_v61 = vpop.f32.mrf.mxu0 }
 0x203   : > { %v9505_v35 = vadd.f32 %v3590_v29, %v2854_v8  ;;  %v2857_v53 = vadd.f32 %v7864_v23, %v9933_v0  ;;  %v9937_v8 = vld [vmem:[#allocation22_spill] sm:$0xff] }
 0x204   : > { %v2738_v21 = vpop.f32.mrf.mxu1  ;;  %v3593_v30 = vpop.f32.mrf.mxu0 }
 0x205   : > { %v9510_v34 = vadd.f32 %v7928_v61, %v2857_v53  ;;  %v2855_v2 = vadd.f32 %v2738_v21, %v9934_v27 }
 0x206   : > { %v7867_v13 = vpop.f32.mrf.mxu1  ;;  %v7931_v1 = vpop.f32.mrf.mxu0  ;;  %8122 = vmatmul.mubr.bf16.gmra.mxu1 %v5537_v16  ;;  %8186 = vmatmul.mubr.bf16.gmra.mxu0 %v6217_v51 }
 0x207   : > { %v9513_v56 = vadd.f32 %v3593_v30, %v2855_v2  ;;  %v2860_v11 = vadd.f32 %v7867_v13, %v9935_v25 }
 0x208   : > { %v2751_v37 = vpop.f32.mrf.mxu1  ;;  %v3606_v12 = vpop.f32.mrf.mxu0 }
 0x209   : > { %v9516_v29 = vadd.f32 %v7931_v1, %v2860_v11  ;;  %v2858_v47 = vadd.f32 %v2751_v37, %v9936_v49  ;;  %v9938_v49 = vld [vmem:[#allocation23_spill] sm:$0xff] }
 0x20a   : > { %v7868_v36 = vpop.f32.mrf.mxu1  ;;  %v7932_v39 = vpop.f32.mrf.mxu0 }
 0x20b   : > { %v9519_v9 = vadd.f32 %v3606_v12, %v2858_v47  ;;  %v2861_v23 = vadd.f32 %v7868_v36, %v9937_v8 }
 0x20c   : > { %v2754_v61 = vpop.f32.mrf.mxu1  ;;  %v3609_v0 = vpop.f32.mrf.mxu0 }
 0x20d   : > { %v9522_v53 = vadd.f32 %v7932_v39, %v2861_v23  ;;  %v2859_v16 = vadd.f32 %v2754_v61, %v9314_v17 }
 0x20e   : > { %v7951_v51 = vpop.f32.mrf.mxu1  ;;  %v8015_v21 = vpop.f32.mrf.mxu0 }
 0x20f   : > { %v9525_v30 = vadd.f32 %v3609_v0, %v2859_v16  ;;  %v4351_v27 = vadd.f32 %v7951_v51, %v9318_v24 }
 0x210   : > { %v4110_v2 = vpop.f32.mrf.mxu1  ;;  %v4789_v13 = vpop.f32.mrf.mxu0 }
 0x211   : > { %v9528_v1 = vadd.f32 %v8015_v21, %v4351_v27  ;;  %v4349_v25 = vadd.f32 %v4110_v2, %v9323_v55 }
 0x212   : > { %v7952_v11 = vpop.f32.mrf.mxu1  ;;  %v8016_v37 = vpop.f32.mrf.mxu0 }
 0x213   : > { %v9531_v12 = vadd.f32 %v4789_v13, %v4349_v25  ;;  %v4352_v47 = vadd.f32 %v7952_v11, %v9938_v49 }
 0x214   : > { %v4113_v36 = vpop.f32.mrf.mxu1  ;;  %v4792_v17 = vpop.f32.mrf.mxu0 }
 0x215   : > { %v9534_v39 = vadd.f32 %v8016_v37, %v4352_v47  ;;  %v4350_v8 = vadd.f32 %v4113_v36, %v9333_v40 }
 0x216   : > { %v7955_v23 = vpop.f32.mrf.mxu1  ;;  %v8019_v24 = vpop.f32.mrf.mxu0 }
 0x217   : > { %v9537_v61 = vadd.f32 %v4792_v17, %v4350_v8  ;;  %v4355_v0 = vadd.f32 %v7955_v23, %v9337_v50 }
 0x218   : > { %v4126_v16 = vpop.f32.mrf.mxu1  ;;  %v4805_v55 = vpop.f32.mrf.mxu0 }
 0x219   : > { %v9540_v51 = vadd.f32 %v8019_v24, %v4355_v0  ;;  %v4353_v21 = vadd.f32 %v4126_v16, %v9340_v4 }
 0x21a   : > { %v7956_v27 = vpop.f32.mrf.mxu1  ;;  %v8020_v2 = vpop.f32.mrf.mxu0 }
 0x21b   : > { %v9543_v13 = vadd.f32 %v4805_v55, %v4353_v21  ;;  %v4356_v25 = vadd.f32 %v7956_v27, %v9349_v43 }
 0x21c   : > { %v4129_v11 = vpop.f32.mrf.mxu1  ;;  %v4808_v40 = vpop.f32.mrf.mxu0 }
 0x21d   : > { %v9546_v37 = vadd.f32 %v8020_v2, %v4356_v25  ;;  %v4354_v49 = vadd.f32 %v4129_v11, %v9352_v19 }
 0x21e   : > { %v7959_v47 = vpop.f32.mrf.mxu1  ;;  %v8023_v50 = vpop.f32.mrf.mxu0 }
 0x21f   : > { %v9549_v36 = vadd.f32 %v4808_v40, %v4354_v49  ;;  %v4359_v17 = vadd.f32 %v7959_v47, %v9356_v31 }
 0x220   : > { %v4142_v8 = vpop.f32.mrf.mxu1  ;;  %v4821_v4 = vpop.f32.mrf.mxu0 }
 0x221   : > { %v9552_v23 = vadd.f32 %v8023_v50, %v4359_v17  ;;  %v4357_v24 = vadd.f32 %v4142_v8, %v9361_v7 }
 0x222   : > { %v7960_v0 = vpop.f32.mrf.mxu1  ;;  %v8024_v43 = vpop.f32.mrf.mxu0 }
 0x223   : > { %v9555_v16 = vadd.f32 %v4821_v4, %v4357_v24  ;;  %v4360_v55 = vadd.f32 %v7960_v0, %v9368_v52 }
 0x224   : > { %v4145_v21 = vpop.f32.mrf.mxu1  ;;  %v4824_v19 = vpop.f32.mrf.mxu0 }
 0x225   : > { %v9558_v27 = vadd.f32 %v8024_v43, %v4360_v55  ;;  %v4358_v2 = vadd.f32 %v4145_v21, %v9371_v42 }
 0x226   : > { %v7963_v25 = vpop.f32.mrf.mxu1  ;;  %v8027_v31 = vpop.f32.mrf.mxu0 }
 0x227   : > { %v9561_v11 = vadd.f32 %v4824_v19, %v4358_v2  ;;  %v4363_v40 = vadd.f32 %v7963_v25, %v9375_v15 }
 0x228   : > { %v4158_v49 = vpop.f32.mrf.mxu1  ;;  %v4837_v7 = vpop.f32.mrf.mxu0 }
 0x229   : > { %v9564_v47 = vadd.f32 %v8027_v31, %v4363_v40  ;;  %v4361_v50 = vadd.f32 %v4158_v49, %v9379_v38 }
 0x22a   : > { %v7964_v17 = vpop.f32.mrf.mxu1  ;;  %v8028_v52 = vpop.f32.mrf.mxu0 }
 0x22b   : > { %v9567_v8 = vadd.f32 %v4837_v7, %v4361_v50  ;;  %v4364_v4 = vadd.f32 %v7964_v17, %v9387_v48 }
 0x22c   : > { %v4161_v24 = vpop.f32.mrf.mxu1  ;;  %v4840_v42 = vpop.f32.mrf.mxu0 }
 0x22d   : > { %v9570_v0 = vadd.f32 %v8028_v52, %v4364_v4  ;;  %v4362_v43 = vadd.f32 %v4161_v24, %v9390_v60 }
 0x22e   : > { %v7967_v55 = vpop.f32.mrf.mxu1  ;;  %v8031_v15 = vpop.f32.mrf.mxu0 }
 0x22f   : > { %v9573_v21 = vadd.f32 %v4840_v42, %v4362_v43  ;;  %v4367_v19 = vadd.f32 %v7967_v55, %v9394_v32 }
 0x230   : > { %v4174_v2 = vpop.f32.mrf.mxu1  ;;  %v4853_v38 = vpop.f32.mrf.mxu0 }
 0x231   : > { %v9576_v25 = vadd.f32 %v8031_v15, %v4367_v19  ;;  %v4365_v31 = vadd.f32 %v4174_v2, %v9397_v6 }
 0x232   : > { %v7968_v40 = vpop.f32.mrf.mxu1  ;;  %v8032_v48 = vpop.f32.mrf.mxu0 }
 0x233   : > { %v9579_v49 = vadd.f32 %v4853_v38, %v4365_v31  ;;  %v4368_v7 = vadd.f32 %v7968_v40, %v9406_v20 }
 0x234   : > { %v4177_v50 = vpop.f32.mrf.mxu1  ;;  %v4856_v60 = vpop.f32.mrf.mxu0 }
 0x235   : > { %v9582_v17 = vadd.f32 %v8032_v48, %v4368_v7  ;;  %v4366_v52 = vadd.f32 %v4177_v50, %v9409_v63 }
 0x236   : > { %v7971_v4 = vpop.f32.mrf.mxu1  ;;  %v8035_v32 = vpop.f32.mrf.mxu0 }
 0x237   : > { %v9585_v24 = vadd.f32 %v4856_v60, %v4366_v52  ;;  %v4371_v42 = vadd.f32 %v7971_v4, %v9413_v10 }
 0x238   : > { %v4190_v43 = vpop.f32.mrf.mxu1  ;;  %v4869_v6 = vpop.f32.mrf.mxu0 }
 0x239   : > { %v9588_v55 = vadd.f32 %v8035_v32, %v4371_v42  ;;  %v4369_v15 = vadd.f32 %v4190_v43, %v9418_v46 }
 0x23a   : > { %v7972_v19 = vpop.f32.mrf.mxu1  ;;  %v8036_v20 = vpop.f32.mrf.mxu0 }
 0x23b   : > { %v9591_v2 = vadd.f32 %v4869_v6, %v4369_v15  ;;  %v4372_v38 = vadd.f32 %v7972_v19, %v9425_v44 }
 0x23c   : > { %v4193_v31 = vpop.f32.mrf.mxu1  ;;  %v4872_v63 = vpop.f32.mrf.mxu0 }
 0x23d   : > { %v9594_v40 = vadd.f32 %v8036_v20, %v4372_v38  ;;  %v4370_v48 = vadd.f32 %v4193_v31, %v9428_v45 }
 0x23e   : > { %v7975_v7 = vpop.f32.mrf.mxu1  ;;  %v8039_v10 = vpop.f32.mrf.mxu0 }
 0x23f   : > { %v9597_v50 = vadd.f32 %v4872_v63, %v4370_v48  ;;  %v4375_v60 = vadd.f32 %v7975_v7, %v9432_v14 }
 0x240   : > { %v4206_v52 = vpop.f32.mrf.mxu1  ;;  %v4885_v46 = vpop.f32.mrf.mxu0 }
 0x241   : > { %v9600_v4 = vadd.f32 %v8039_v10, %v4375_v60  ;;  %v4373_v32 = vadd.f32 %v4206_v52, %v9435_v18 }
 0x242   : > { %v7976_v42 = vpop.f32.mrf.mxu1  ;;  %v8040_v44 = vpop.f32.mrf.mxu0 }
 0x243   : > { %v9603_v43 = vadd.f32 %v4885_v46, %v4373_v32  ;;  %v4376_v6 = vadd.f32 %v7976_v42, %v9444_v58 }
 0x244   : > { %v4209_v15 = vpop.f32.mrf.mxu1  ;;  %v4888_v45 = vpop.f32.mrf.mxu0 }
 0x245   : > { %v9606_v19 = vadd.f32 %v8040_v44, %v4376_v6  ;;  %v4374_v20 = vadd.f32 %v4209_v15, %v9447_v33  ;;  %v9939_v44 = vld [vmem:[#allocation24_spill] sm:$0xff] }
 0x246   : > { %v7979_v38 = vpop.f32.mrf.mxu1  ;;  %v8043_v14 = vpop.f32.mrf.mxu0 }
 0x247   : > { %v9609_v31 = vadd.f32 %v4888_v45, %v4374_v20  ;;  %v4379_v63 = vadd.f32 %v7979_v38, %v9451_v41 }
 0x248   : > { %v4222_v48 = vpop.f32.mrf.mxu1  ;;  %v4901_v18 = vpop.f32.mrf.mxu0 }
 0x249   : > { %v9612_v7 = vadd.f32 %v8043_v14, %v4379_v63  ;;  %v4377_v10 = vadd.f32 %v4222_v48, %v9456_v3  ;;  %v9940_v63 = vld [vmem:[#allocation25_spill] sm:$0xff] }
 0x24a   : > { %v7980_v60 = vpop.f32.mrf.mxu1  ;;  %v8044_v58 = vpop.f32.mrf.mxu0 }
 0x24b   : > { %v9615_v52 = vadd.f32 %v4901_v18, %v4377_v10  ;;  %v4380_v46 = vadd.f32 %v7980_v60, %v9463_v22  ;;  %v9941_v60 = vld [vmem:[#allocation26_spill] sm:$0xff] }
 0x24c   : > { %v4225_v32 = vpop.f32.mrf.mxu1  ;;  %v4904_v33 = vpop.f32.mrf.mxu0 }
 0x24d   : > { %v9618_v42 = vadd.f32 %v8044_v58, %v4380_v46  ;;  %v4378_v6 = vadd.f32 %v4225_v32, %v9939_v44 }
 0x24e   : > { %v7983_v15 = vpop.f32.mrf.mxu1  ;;  %v8047_v41 = vpop.f32.mrf.mxu0 }
 0x24f   : > { %v9621_v45 = vadd.f32 %v4904_v33, %v4378_v6  ;;  %v4383_v20 = vadd.f32 %v7983_v15, %v9470_v59 }
 0x250   : > { %v4238_v38 = vpop.f32.mrf.mxu1  ;;  %v4917_v3 = vpop.f32.mrf.mxu0 }
 0x251   : > { %v9624_v14 = vadd.f32 %v8047_v41, %v4383_v20  ;;  %v4381_v48 = vadd.f32 %v4238_v38, %v9940_v63 }
 0x252   : > { %v7984_v18 = vpop.f32.mrf.mxu1  ;;  %v8048_v22 = vpop.f32.mrf.mxu0 }
 0x253   : > { %v9627_v10 = vadd.f32 %v4917_v3, %v4381_v48  ;;  %v4384_v58 = vadd.f32 %v7984_v18, %v9941_v60 }
 0x254   : > { %v4241_v46 = vpop.f32.mrf.mxu1  ;;  %v4920_v32 = vpop.f32.mrf.mxu0 }
 0x255   : > { %v9630_v44 = vadd.f32 %v8048_v22, %v4384_v58  ;;  %v4382_v33 = vadd.f32 %v4241_v46, %v9483_v62 }
 0x256   : > { %v7987_v6 = vpop.f32.mrf.mxu1  ;;  %v8051_v59 = vpop.f32.mrf.mxu0 }
 0x257   : > { %v9633_v15 = vadd.f32 %v4920_v32, %v4382_v33  ;;  %v4387_v41 = vadd.f32 %v7987_v6, %v9486_v28 }
 0x258   : > { %v4254_v20 = vpop.f32.mrf.mxu1  ;;  %v4933_v38 = vpop.f32.mrf.mxu0 }
 0x259   : > { %v9636_v63 = vadd.f32 %v8051_v59, %v4387_v41  ;;  %v4385_v3 = vadd.f32 %v4254_v20, %v9491_v54 }
 0x25a   : > { %v7988_v48 = vpop.f32.mrf.mxu1  ;;  %v8052_v18 = vpop.f32.mrf.mxu0 }
 0x25b   : > { %v9639_v60 = vadd.f32 %v4933_v38, %v4385_v3  ;;  %v4388_v22 = vadd.f32 %v7988_v48, %v9496_v57 }
 0x25c   : > { %v4257_v58 = vpop.f32.mrf.mxu1  ;;  %v4936_v62 = vpop.f32.mrf.mxu0 }
 0x25d   : > { %v9642_v46 = vadd.f32 %v8052_v18, %v4388_v22  ;;  %v4386_v32 = vadd.f32 %v4257_v58, %v9499_v5 }
 0x25e   : > { %v7991_v33 = vpop.f32.mrf.mxu1  ;;  %v8055_v28 = vpop.f32.mrf.mxu0 }
 0x25f   : > { %v9645_v6 = vadd.f32 %v4936_v62, %v4386_v32  ;;  %v4391_v59 = vadd.f32 %v7991_v33, %v9502_v26 }
 0x260   : > { %v4270_v41 = vpop.f32.mrf.mxu1  ;;  %v4949_v54 = vpop.f32.mrf.mxu0 }
 0x261   : > { %v9648_v20 = vadd.f32 %v8055_v28, %v4391_v59  ;;  %v4389_v38 = vadd.f32 %v4270_v41, %v9505_v35 }
 0x262   : > { %v7992_v3 = vpop.f32.mrf.mxu1  ;;  %v8056_v57 = vpop.f32.mrf.mxu0 }
 0x263   : > { %v9651_v48 = vadd.f32 %v4949_v54, %v4389_v38  ;;  %v4392_v18 = vadd.f32 %v7992_v3, %v9510_v34 }
 0x264   : > { %v4273_v22 = vpop.f32.mrf.mxu1  ;;  %v4952_v5 = vpop.f32.mrf.mxu0 }
 0x265   : > { %v9654_v58 = vadd.f32 %v8056_v57, %v4392_v18  ;;  %v4390_v62 = vadd.f32 %v4273_v22, %v9513_v56 }
 0x266   : > { %v7995_v32 = vpop.f32.mrf.mxu1  ;;  %v8059_v26 = vpop.f32.mrf.mxu0 }
 0x267   : > { %v9657_v33 = vadd.f32 %v4952_v5, %v4390_v62  ;;  %v4395_v28 = vadd.f32 %v7995_v32, %v9516_v29 }
 0x268   : > { %v4286_v59 = vpop.f32.mrf.mxu1  ;;  %v4965_v35 = vpop.f32.mrf.mxu0 }
 0x269   : > { %v9660_v41 = vadd.f32 %v8059_v26, %v4395_v28  ;;  %v4393_v54 = vadd.f32 %v4286_v59, %v9519_v9  ;;  %v9675_v9 = vld [vmem:[%s9878_s2] ss:$0 sm:$0xff] }
 0x26a   : > { %v7996_v38 = vpop.f32.mrf.mxu1  ;;  %v8060_v34 = vpop.f32.mrf.mxu0 }
 0x26b   : > { %v9663_v3 = vadd.f32 %v4965_v35, %v4393_v54  ;;  %v4396_v57 = vadd.f32 %v7996_v38, %v9522_v53 }
 0x26c   : > { %v4289_v18 = vpop.f32.mrf.mxu1  ;;  %v4968_v56 = vpop.f32.mrf.mxu0 }
 0x26d   : > { %9942 = vst [vmem:[#allocation27_spill] sm:$0xff] %v9663_v3  ;;  %v9666_v22 = vadd.f32 %v8060_v34, %v4396_v57  ;;  %v4394_v5 = vadd.f32 %v4289_v18, %v9525_v30 }
 0x26e   : > { %v8079_v62 = vpop.f32.mrf.mxu1  ;;  %v8143_v29 = vpop.f32.mrf.mxu0 }
 0x26f   : > { %9943 = vst [vmem:[#allocation28_spill] sm:$0xff] %v9666_v22  ;;  %v9669_v32 = vadd.f32 %v4968_v56, %v4394_v5  ;;  %v5885_v26 = vadd.f32 %v8079_v62, %v9528_v1 }
 0x270   : > { %v5644_v28 = vpop.f32.mrf.mxu1  ;;  %v6324_v59 = vpop.f32.mrf.mxu0 }
 0x271   : > { %9944 = vst [vmem:[#allocation29_spill] sm:$0xff] %v9669_v32  ;;  %v6565_v53 = vadd.f32 %v8143_v29, %v5885_v26  ;;  %v5883_v35 = vadd.f32 %v5644_v28, %v9531_v12 }
 0x272   : > { %v8080_v54 = vpop.f32.mrf.mxu1  ;;  %v8144_v38 = vpop.f32.mrf.mxu0 }
 0x273   : > { %v6716_v30 = vadd.f32 %v9675_v9, %v6565_v53  ;;  %v6563_v34 = vadd.f32 %v6324_v59, %v5883_v35  ;;  %v5886_v57 = vadd.f32 %v8080_v54, %v9534_v39 }
 0x274   : > { %v5647_v18 = vpop.f32.mrf.mxu1  ;;  %v6327_v1 = vpop.f32.mrf.mxu0 }
 0x275   : > { %v6764_v56 = vmul.f32 0.1, %v6716_v30  ;;  %v6714_v5 = vadd.f32 %v9675_v9, %v6563_v34  ;;  %v6566_v62 = vadd.f32 %v8144_v38, %v5886_v57  ;;  %v5884_v32 = vadd.f32 %v5647_v18, %v9537_v61 }
 0x276   : > { %v8083_v22 = vpop.f32.mrf.mxu1  ;;  %v8147_v29 = vpop.f32.mrf.mxu0 }
 0x277   : > { %v6812_v12 = vmax.f32 %v6716_v30, %v6764_v56  ;;  %v6762_v26 = vmul.f32 0.1, %v6714_v5  ;;  %v6717_v28 = vadd.f32 %v9675_v9, %v6566_v62  ;;  %v6564_v53 = vadd.f32 %v6327_v1, %v5884_v32 }
 0x278   : > { %v5889_v59 = vadd.f32 %v8083_v22, %v9540_v51  ;;  %v5660_v39 = vpop.f32.mrf.mxu1  ;;  %v6340_v35 = vpop.f32.mrf.mxu0 }
 0x279   : > { %6860 = vst [vmem:[%s8821_s9 + $0x10] sm:$0xff] %v6812_v12  ;;  %v6810_v54 = vmax.f32 %v6714_v5, %v6762_v26  ;;  %v6765_v3 = vmul.f32 0.1, %v6717_v28  ;;  %v6715_v38 = vadd.f32 %v9675_v9, %v6564_v53  ;;  %v5887_v61 = vadd.f32 %v5660_v39, %v9543_v13 }
 0x27a   : > { %v6569_v34 = vadd.f32 %v8147_v29, %v5889_v59  ;;  %v8084_v57 = vpop.f32.mrf.mxu1  ;;  %v8148_v18 = vpop.f32.mrf.mxu0 }
 0x27b   : > { %6858 = vst [vmem:[%s8821_s9] sm:$0xff] %v6810_v54  ;;  %v6813_v30 = vmax.f32 %v6717_v28, %v6765_v3  ;;  %v6763_v56 = vmul.f32 0.1, %v6715_v38  ;;  %v6567_v32 = vadd.f32 %v6340_v35, %v5887_v61  ;;  %v5890_v51 = vadd.f32 %v8084_v57, %v9546_v37 }
 0x27c   : > { %v6720_v22 = vadd.f32 %v9675_v9, %v6569_v34  ;;  %v5663_v1 = vpop.f32.mrf.mxu1  ;;  %v6343_v62 = vpop.f32.mrf.mxu0 }
 0x27d   : > { %6861 = vst [vmem:[%s8821_s9 + $0x18] sm:$0xff] %v6813_v30  ;;  %v6811_v5 = vmax.f32 %v6715_v38, %v6763_v56  ;;  %v6718_v12 = vadd.f32 %v9675_v9, %v6567_v32  ;;  %v6570_v26 = vadd.f32 %v8148_v18, %v5890_v51  ;;  %v5888_v13 = vadd.f32 %v5663_v1, %v9549_v36 }
 0x27e   : > { %v6768_v29 = vmul.f32 0.1, %v6720_v22  ;;  %v8087_v53 = vpop.f32.mrf.mxu1  ;;  %v8151_v59 = vpop.f32.mrf.mxu0 }
 0x27f   : > { %6859 = vst [vmem:[%s8821_s9 + $0x8] sm:$0xff] %v6811_v5  ;;  %v6766_v3 = vmul.f32 0.1, %v6718_v12  ;;  %v6721_v37 = vadd.f32 %v9675_v9, %v6570_v26  ;;  %v6568_v28 = vadd.f32 %v6343_v62, %v5888_v13  ;;  %v5893_v39 = vadd.f32 %v8087_v53, %v9552_v23 }
 0x280   : > { %v6816_v35 = vmax.f32 %v6720_v22, %v6768_v29  ;;  %v5676_v54 = vpop.f32.mrf.mxu1  ;;  %v6356_v38 = vpop.f32.mrf.mxu0 }
 0x281   : > { %v6814_v61 = vmax.f32 %v6718_v12, %v6766_v3  ;;  %v6769_v34 = vmul.f32 0.1, %v6721_v37  ;;  %v6719_v36 = vadd.f32 %v9675_v9, %v6568_v28  ;;  %v6573_v57 = vadd.f32 %v8151_v59, %v5893_v39 }
 0x282   : > { %6864 = vst [vmem:[%s8821_s9 + $0x30] sm:$0xff] %v6816_v35  ;;  %v5891_v18 = vadd.f32 %v5676_v54, %v9555_v16  ;;  %v8088_v30 = vpop.f32.mrf.mxu1  ;;  %v8152_v56 = vpop.f32.mrf.mxu0 }
 0x283   : > { %6862 = vst [vmem:[%s8821_s9 + $0x20] sm:$0xff] %v6814_v61  ;;  %v6817_v32 = vmax.f32 %v6721_v37, %v6769_v34  ;;  %v6767_v51 = vmul.f32 0.1, %v6719_v36  ;;  %v6724_v23 = vadd.f32 %v9675_v9, %v6573_v57  ;;  %v5894_v22 = vadd.f32 %v8088_v30, %v9558_v27 }
 0x284   : > { %v6571_v1 = vadd.f32 %v6356_v38, %v5891_v18  ;;  %v5679_v62 = vpop.f32.mrf.mxu1  ;;  %v6359_v5 = vpop.f32.mrf.mxu0 }
 0x285   : > { %6865 = vst [vmem:[%s8821_s9 + $0x38] sm:$0xff] %v6817_v32  ;;  %v6815_v12 = vmax.f32 %v6719_v36, %v6767_v51  ;;  %v6772_v26 = vmul.f32 0.1, %v6724_v23  ;;  %v6574_v13 = vadd.f32 %v8152_v56, %v5894_v22  ;;  %v5892_v16 = vadd.f32 %v5679_v62, %v9561_v11 }
 0x286   : > { %v6722_v29 = vadd.f32 %v9675_v9, %v6571_v1  ;;  %v8091_v53 = vpop.f32.mrf.mxu1  ;;  %v8155_v59 = vpop.f32.mrf.mxu0 }
 0x287   : > { %6863 = vst [vmem:[%s8821_s9 + $0x28] sm:$0xff] %v6815_v12  ;;  %v6820_v3 = vmax.f32 %v6724_v23, %v6772_v26  ;;  %v6725_v37 = vadd.f32 %v9675_v9, %v6574_v13  ;;  %v6572_v28 = vadd.f32 %v6359_v5, %v5892_v16  ;;  %v5897_v27 = vadd.f32 %v8091_v53, %v9564_v47 }
 0x288   : > { %v6770_v39 = vmul.f32 0.1, %v6722_v29  ;;  %v5692_v35 = vpop.f32.mrf.mxu1  ;;  %v6372_v54 = vpop.f32.mrf.mxu0 }
 0x289   : > { %6868 = vst [vmem:[%s8821_s9 + $0x50] sm:$0xff] %v6820_v3  ;;  %v6773_v38 = vmul.f32 0.1, %v6725_v37  ;;  %v6723_v11 = vadd.f32 %v9675_v9, %v6572_v28  ;;  %v6577_v61 = vadd.f32 %v8155_v59, %v5897_v27  ;;  %v5895_v34 = vadd.f32 %v5692_v35, %v9567_v8 }
 0x28a   : > { %v6818_v36 = vmax.f32 %v6722_v29, %v6770_v39  ;;  %v8092_v57 = vpop.f32.mrf.mxu1  ;;  %v8156_v18 = vpop.f32.mrf.mxu0 }
 0x28b   : > { %v6821_v30 = vmax.f32 %v6725_v37, %v6773_v38  ;;  %v6771_v56 = vmul.f32 0.1, %v6723_v11  ;;  %v6728_v47 = vadd.f32 %v9675_v9, %v6577_v61  ;;  %v6575_v32 = vadd.f32 %v6372_v54, %v5895_v34 }
 0x28c   : > { %6866 = vst [vmem:[%s8821_s9 + $0x40] sm:$0xff] %v6818_v36  ;;  %v5898_v51 = vadd.f32 %v8092_v57, %v9570_v0  ;;  %v5695_v23 = vpop.f32.mrf.mxu1  ;;  %v6375_v22 = vpop.f32.mrf.mxu0 }
 0x28d   : > { %6869 = vst [vmem:[%s8821_s9 + $0x58] sm:$0xff] %v6821_v30  ;;  %v6819_v1 = vmax.f32 %v6723_v11, %v6771_v56  ;;  %v6776_v62 = vmul.f32 0.1, %v6728_v47  ;;  %v6726_v8 = vadd.f32 %v9675_v9, %v6575_v32  ;;  %v5896_v5 = vadd.f32 %v5695_v23, %v9573_v21 }
 0x28e   : > { %v6578_v12 = vadd.f32 %v8156_v18, %v5898_v51  ;;  %v8095_v26 = vpop.f32.mrf.mxu1  ;;  %v8159_v13 = vpop.f32.mrf.mxu0 }
 0x28f   : > { %6867 = vst [vmem:[%s8821_s9 + $0x48] sm:$0xff] %v6819_v1  ;;  %v6824_v16 = vmax.f32 %v6728_v47, %v6776_v62  ;;  %v6774_v29 = vmul.f32 0.1, %v6726_v8  ;;  %v6576_v53 = vadd.f32 %v6375_v22, %v5896_v5  ;;  %v5901_v0 = vadd.f32 %v8095_v26, %v9576_v25 }
 0x290   : > { %v6729_v59 = vadd.f32 %v9675_v9, %v6578_v12  ;;  %v5708_v3 = vpop.f32.mrf.mxu1  ;;  %v6388_v37 = vpop.f32.mrf.mxu0 }
 0x291   : > { %6872 = vst [vmem:[%s8821_s9 + $0x70] sm:$0xff] %v6824_v16  ;;  %v6822_v28 = vmax.f32 %v6726_v8, %v6774_v29  ;;  %v6727_v27 = vadd.f32 %v9675_v9, %v6576_v53  ;;  %v6581_v39 = vadd.f32 %v8159_v13, %v5901_v0  ;;  %v5899_v21 = vadd.f32 %v5708_v3, %v9579_v49 }
 0x292   : > { %v6777_v35 = vmul.f32 0.1, %v6729_v59  ;;  %v8096_v54 = vpop.f32.mrf.mxu1  ;;  %v8160_v38 = vpop.f32.mrf.mxu0 }
 0x293   : > { %6870 = vst [vmem:[%s8821_s9 + $0x60] sm:$0xff] %v6822_v28  ;;  %v6775_v11 = vmul.f32 0.1, %v6727_v27  ;;  %v6732_v25 = vadd.f32 %v9675_v9, %v6581_v39  ;;  %v6579_v61 = vadd.f32 %v6388_v37, %v5899_v21  ;;  %v5902_v34 = vadd.f32 %v8096_v54, %v9582_v17 }
 0x294   : > { %v6825_v36 = vmax.f32 %v6729_v59, %v6777_v35  ;;  %v5711_v57 = vpop.f32.mrf.mxu1  ;;  %v6391_v18 = vpop.f32.mrf.mxu0 }
 0x295   : > { %v6823_v30 = vmax.f32 %v6727_v27, %v6775_v11  ;;  %v6780_v56 = vmul.f32 0.1, %v6732_v25  ;;  %v6730_v49 = vadd.f32 %v9675_v9, %v6579_v61  ;;  %v6582_v47 = vadd.f32 %v8160_v38, %v5902_v34 }
 0x296   : > { %6873 = vst [vmem:[%s8821_s9 + $0x78] sm:$0xff] %v6825_v36  ;;  %v5900_v32 = vadd.f32 %v5711_v57, %v9585_v24  ;;  %v8099_v51 = vpop.f32.mrf.mxu1  ;;  %v8163_v23 = vpop.f32.mrf.mxu0 }
 0x297   : > { %6871 = vst [vmem:[%s8821_s9 + $0x68] sm:$0xff] %v6823_v30  ;;  %v6828_v22 = vmax.f32 %v6732_v25, %v6780_v56  ;;  %v6778_v1 = vmul.f32 0.1, %v6730_v49  ;;  %v6733_v17 = vadd.f32 %v9675_v9, %v6582_v47  ;;  %v5905_v62 = vadd.f32 %v8099_v51, %v9588_v55 }
 0x298   : > { %v6580_v8 = vadd.f32 %v6391_v18, %v5900_v32  ;;  %v5724_v5 = vpop.f32.mrf.mxu1  ;;  %v6404_v12 = vpop.f32.mrf.mxu0 }
 0x299   : > { %6876 = vst [vmem:[%s8821_s9 + $0x90] sm:$0xff] %v6828_v22  ;;  %v6826_v26 = vmax.f32 %v6730_v49, %v6778_v1  ;;  %v6781_v13 = vmul.f32 0.1, %v6733_v17  ;;  %v6585_v16 = vadd.f32 %v8163_v23, %v5905_v62  ;;  %v5903_v24 = vadd.f32 %v5724_v5, %v9591_v2 }
 0x29a   : > { %v6731_v29 = vadd.f32 %v9675_v9, %v6580_v8  ;;  %v8100_v53 = vpop.f32.mrf.mxu1  ;;  %v8164_v0 = vpop.f32.mrf.mxu0 }
 0x29b   : > { %6874 = vst [vmem:[%s8821_s9 + $0x80] sm:$0xff] %v6826_v26  ;;  %v6829_v59 = vmax.f32 %v6733_v17, %v6781_v13  ;;  %v6736_v3 = vadd.f32 %v9675_v9, %v6585_v16  ;;  %v6583_v37 = vadd.f32 %v6404_v12, %v5903_v24  ;;  %v5906_v55 = vadd.f32 %v8100_v53, %v9594_v40 }
 0x29c   : > { %v6779_v28 = vmul.f32 0.1, %v6731_v29  ;;  %v5727_v27 = vpop.f32.mrf.mxu1  ;;  %v6407_v39 = vpop.f32.mrf.mxu0 }
 0x29d   : > { %6877 = vst [vmem:[%s8821_s9 + $0x98] sm:$0xff] %v6829_v59  ;;  %v6784_v21 = vmul.f32 0.1, %v6736_v3  ;;  %v6734_v2 = vadd.f32 %v9675_v9, %v6583_v37  ;;  %v6586_v35 = vadd.f32 %v8164_v0, %v5906_v55  ;;  %v5904_v54 = vadd.f32 %v5727_v27, %v9597_v50 }
 0x29e   : > { %v6827_v38 = vmax.f32 %v6731_v29, %v6779_v28  ;;  %v8103_v11 = vpop.f32.mrf.mxu1  ;;  %v8167_v25 = vpop.f32.mrf.mxu0 }
 0x29f   : > { %v6832_v61 = vmax.f32 %v6736_v3, %v6784_v21  ;;  %v6782_v34 = vmul.f32 0.1, %v6734_v2  ;;  %v6737_v40 = vadd.f32 %v9675_v9, %v6586_v35  ;;  %v6584_v36 = vadd.f32 %v6407_v39, %v5904_v54 }
 0x2a0   : > { %6875 = vst [vmem:[%s8821_s9 + $0x88] sm:$0xff] %v6827_v38  ;;  %v5909_v57 = vadd.f32 %v8103_v11, %v9600_v4  ;;  %v5740_v18 = vpop.f32.mrf.mxu1  ;;  %v6420_v30 = vpop.f32.mrf.mxu0 }
 0x2a1   : > { %6880 = vst [vmem:[%s8821_s9 + $0xb0] sm:$0xff] %v6832_v61  ;;  %v6830_v56 = vmax.f32 %v6734_v2, %v6782_v34  ;;  %v6785_v49 = vmul.f32 0.1, %v6737_v40  ;;  %v6735_v50 = vadd.f32 %v9675_v9, %v6584_v36  ;;  %v5907_v47 = vadd.f32 %v5740_v18, %v9603_v43 }
 0x2a2   : > { %v6589_v32 = vadd.f32 %v8167_v25, %v5909_v57  ;;  %v8104_v51 = vpop.f32.mrf.mxu1  ;;  %v8168_v23 = vpop.f32.mrf.mxu0 }
 0x2a3   : > { %6878 = vst [vmem:[%s8821_s9 + $0xa0] sm:$0xff] %v6830_v56  ;;  %v6833_v22 = vmax.f32 %v6737_v40, %v6785_v49  ;;  %v6783_v1 = vmul.f32 0.1, %v6735_v50  ;;  %v6587_v17 = vadd.f32 %v6420_v30, %v5907_v47  ;;  %v5910_v4 = vadd.f32 %v8104_v51, %v9606_v19 }
 0x2a4   : > { %v6740_v62 = vadd.f32 %v9675_v9, %v6589_v32  ;;  %v5743_v8 = vpop.f32.mrf.mxu1  ;;  %v6423_v5 = vpop.f32.mrf.mxu0 }
 0x2a5   : > { %6881 = vst [vmem:[%s8821_s9 + $0xb8] sm:$0xff] %v6833_v22  ;;  %v6831_v12 = vmax.f32 %v6735_v50, %v6783_v1  ;;  %v6738_v26 = vadd.f32 %v9675_v9, %v6587_v17  ;;  %v6590_v13 = vadd.f32 %v8168_v23, %v5910_v4  ;;  %v5908_v43 = vadd.f32 %v5743_v8, %v9609_v31 }
 0x2a6   : > { %v6788_v16 = vmul.f32 0.1, %v6740_v62  ;;  %v8107_v24 = vpop.f32.mrf.mxu1  ;;  %v8171_v29 = vpop.f32.mrf.mxu0 }
 0x2a7   : > { %6879 = vst [vmem:[%s8821_s9 + $0xa8] sm:$0xff] %v6831_v12  ;;  %v6786_v53 = vmul.f32 0.1, %v6738_v26  ;;  %v6741_v19 = vadd.f32 %v9675_v9, %v6590_v13  ;;  %v6588_v0 = vadd.f32 %v6423_v5, %v5908_v43  ;;  %v5913_v59 = vadd.f32 %v8107_v24, %v9612_v7 }
 0x2a8   : > { %v6836_v3 = vmax.f32 %v6740_v62, %v6788_v16  ;;  %v5756_v37 = vpop.f32.mrf.mxu1  ;;  %v6436_v55 = vpop.f32.mrf.mxu0 }
 0x2a9   : > { %v6834_v28 = vmax.f32 %v6738_v26, %v6786_v53  ;;  %v6789_v27 = vmul.f32 0.1, %v6741_v19  ;;  %v6739_v31 = vadd.f32 %v9675_v9, %v6588_v0  ;;  %v6593_v39 = vadd.f32 %v8171_v29, %v5913_v59 }
 0x2aa   : > { %6884 = vst [vmem:[%s8821_s9 + $0xd0] sm:$0xff] %v6836_v3  ;;  %v5911_v21 = vadd.f32 %v5756_v37, %v9615_v52  ;;  %v8108_v2 = vpop.f32.mrf.mxu1  ;;  %v8172_v35 = vpop.f32.mrf.mxu0 }
 0x2ab   : > { %6882 = vst [vmem:[%s8821_s9 + $0xc0] sm:$0xff] %v6834_v28  ;;  %v6837_v54 = vmax.f32 %v6741_v19, %v6789_v27  ;;  %v6787_v38 = vmul.f32 0.1, %v6739_v31  ;;  %v6744_v7 = vadd.f32 %v9675_v9, %v6593_v39  ;;  %v5914_v11 = vadd.f32 %v8108_v2, %v9618_v42 }
 0x2ac   : > { %v6591_v25 = vadd.f32 %v6436_v55, %v5911_v21  ;;  %v5759_v61 = vpop.f32.mrf.mxu1  ;;  %v6439_v34 = vpop.f32.mrf.mxu0 }
 0x2ad   : > { %6885 = vst [vmem:[%s8821_s9 + $0xd8] sm:$0xff] %v6837_v54  ;;  %v6835_v40 = vmax.f32 %v6739_v31, %v6787_v38  ;;  %v6792_v36 = vmul.f32 0.1, %v6744_v7  ;;  %v6594_v57 = vadd.f32 %v8172_v35, %v5914_v11  ;;  %v5912_v52 = vadd.f32 %v5759_v61, %v9621_v45 }
 0x2ae   : > { %v6742_v18 = vadd.f32 %v9675_v9, %v6591_v25  ;;  %v8111_v30 = vpop.f32.mrf.mxu1  ;;  %v8175_v56 = vpop.f32.mrf.mxu0 }
 0x2af   : > { %6883 = vst [vmem:[%s8821_s9 + $0xc8] sm:$0xff] %v6835_v40  ;;  %v6840_v49 = vmax.f32 %v6744_v7, %v6792_v36  ;;  %v6745_v50 = vadd.f32 %v9675_v9, %v6594_v57  ;;  %v6592_v47 = vadd.f32 %v6439_v34, %v5912_v52  ;;  %v5917_v42 = vadd.f32 %v8111_v30, %v9624_v14 }
 0x2b0   : > { %v6790_v32 = vmul.f32 0.1, %v6742_v18  ;;  %v5772_v51 = vpop.f32.mrf.mxu1  ;;  %v6452_v23 = vpop.f32.mrf.mxu0 }
 0x2b1   : > { %6888 = vst [vmem:[%s8821_s9 + $0xf0] sm:$0xff] %v6840_v49  ;;  %v6793_v22 = vmul.f32 0.1, %v6745_v50  ;;  %v6743_v45 = vadd.f32 %v9675_v9, %v6592_v47  ;;  %v6597_v1 = vadd.f32 %v8175_v56, %v5917_v42  ;;  %v5915_v17 = vadd.f32 %v5772_v51, %v9627_v10 }
 0x2b2   : > { %v6838_v4 = vmax.f32 %v6742_v18, %v6790_v32  ;;  %v8112_v62 = vpop.f32.mrf.mxu1  ;;  %v8176_v8 = vpop.f32.mrf.mxu0 }
 0x2b3   : > { %v6841_v5 = vmax.f32 %v6745_v50, %v6793_v22  ;;  %v6791_v12 = vmul.f32 0.1, %v6743_v45  ;;  %v6748_v14 = vadd.f32 %v9675_v9, %v6597_v1  ;;  %v6595_v26 = vadd.f32 %v6452_v23, %v5915_v17 }
 0x2b4   : > { %6886 = vst [vmem:[%s8821_s9 + $0xe0] sm:$0xff] %v6838_v4  ;;  %v5918_v13 = vadd.f32 %v8112_v62, %v9630_v44  ;;  %v5775_v43 = vpop.f32.mrf.mxu1  ;;  %v6455_v16 = vpop.f32.mrf.mxu0 }
 0x2b5   : > { %6889 = vst [vmem:[%s8821_s9 + $0xf8] sm:$0xff] %v6841_v5  ;;  %v6839_v24 = vmax.f32 %v6743_v45, %v6791_v12  ;;  %v6796_v29 = vmul.f32 0.1, %v6748_v14  ;;  %v6746_v10 = vadd.f32 %v9675_v9, %v6595_v26  ;;  %v5916_v53 = vadd.f32 %v5775_v43, %v9633_v15 }
 0x2b6   : > { %v6598_v19 = vadd.f32 %v8176_v8, %v5918_v13  ;;  %v8115_v0 = vpop.f32.mrf.mxu1  ;;  %v8179_v59 = vpop.f32.mrf.mxu0 }
 0x2b7   : > { %6887 = vst [vmem:[%s8821_s9 + $0xe8] sm:$0xff] %v6839_v24  ;;  %v6844_v3 = vmax.f32 %v6748_v14, %v6796_v29  ;;  %v6794_v37 = vmul.f32 0.1, %v6746_v10  ;;  %v6596_v55 = vadd.f32 %v6455_v16, %v5916_v53  ;;  %v5921_v44 = vadd.f32 %v8115_v0, %v9636_v63 }
 0x2b8   : > { %v6749_v28 = vadd.f32 %v9675_v9, %v6598_v19  ;;  %v5788_v27 = vpop.f32.mrf.mxu1  ;;  %v6468_v31 = vpop.f32.mrf.mxu0 }
 0x2b9   : > { %6892 = vst [vmem:[%s8821_s9 + $0x110] sm:$0xff] %v6844_v3  ;;  %v6842_v39 = vmax.f32 %v6746_v10, %v6794_v37  ;;  %v6747_v21 = vadd.f32 %v9675_v9, %v6596_v55  ;;  %v6601_v2 = vadd.f32 %v8179_v59, %v5921_v44  ;;  %v5919_v15 = vadd.f32 %v5788_v27, %v9639_v60 }
 0x2ba   : > { %v6797_v35 = vmul.f32 0.1, %v6749_v28  ;;  %v8116_v54 = vpop.f32.mrf.mxu1  ;;  %v8180_v38 = vpop.f32.mrf.mxu0 }
 0x2bb   : > { %6890 = vst [vmem:[%s8821_s9 + $0x100] sm:$0xff] %v6842_v39  ;;  %v6795_v7 = vmul.f32 0.1, %v6747_v21  ;;  %v6752_v63 = vadd.f32 %v9675_v9, %v6601_v2  ;;  %v6599_v11 = vadd.f32 %v6468_v31, %v5919_v15  ;;  %v5922_v25 = vadd.f32 %v8116_v54, %v9642_v46  ;;  %v9946_v54 = vld [vmem:[#allocation28_spill] sm:$0xff] }
 0x2bc   : > { %v6845_v61 = vmax.f32 %v6749_v28, %v6797_v35  ;;  %v5791_v34 = vpop.f32.mrf.mxu1  ;;  %v6471_v40 = vpop.f32.mrf.mxu0  ;;  %v9945_v28 = vld [vmem:[#allocation27_spill] sm:$0xff] }
 0x2bd   : > { %v6843_v36 = vmax.f32 %v6747_v21, %v6795_v7  ;;  %v6800_v57 = vmul.f32 0.1, %v6752_v63  ;;  %v6750_v60 = vadd.f32 %v9675_v9, %v6599_v11  ;;  %v6602_v52 = vadd.f32 %v8180_v38, %v5922_v25 }
 0x2be   : > { %6893 = vst [vmem:[%s8821_s9 + $0x118] sm:$0xff] %v6845_v61  ;;  %v5920_v18 = vadd.f32 %v5791_v34, %v9645_v6  ;;  %v8119_v30 = vpop.f32.mrf.mxu1  ;;  %v8183_v56 = vpop.f32.mrf.mxu0  ;;  %v9947_v61 = vld [vmem:[#allocation29_spill] sm:$0xff] }
 0x2bf   : > { %6891 = vst [vmem:[%s8821_s9 + $0x108] sm:$0xff] %v6843_v36  ;;  %v6848_v49 = vmax.f32 %v6752_v63, %v6800_v57  ;;  %v6798_v50 = vmul.f32 0.1, %v6750_v60  ;;  %v6753_v46 = vadd.f32 %v9675_v9, %v6602_v52  ;;  %v5925_v47 = vadd.f32 %v8119_v30, %v9648_v20 }
 0x2c0   : > { %v6600_v42 = vadd.f32 %v6471_v40, %v5920_v18  ;;  %v5804_v32 = vpop.f32.mrf.mxu1  ;;  %v6484_v51 = vpop.f32.mrf.mxu0 }
 0x2c1   : > { %6896 = vst [vmem:[%s8821_s9 + $0x130] sm:$0xff] %v6848_v49  ;;  %v6846_v23 = vmax.f32 %v6750_v60, %v6798_v50  ;;  %v6801_v22 = vmul.f32 0.1, %v6753_v46  ;;  %v6605_v45 = vadd.f32 %v8183_v56, %v5925_v47  ;;  %v5923_v6 = vadd.f32 %v5804_v32, %v9651_v48 }
 0x2c2   : > { %v6751_v1 = vadd.f32 %v9675_v9, %v6600_v42  ;;  %v8120_v17 = vpop.f32.mrf.mxu1  ;;  %v8184_v4 = vpop.f32.mrf.mxu0 }
 0x2c3   : > { %6894 = vst [vmem:[%s8821_s9 + $0x120] sm:$0xff] %v6846_v23  ;;  %v6849_v62 = vmax.f32 %v6753_v46, %v6801_v22  ;;  %v6756_v8 = vadd.f32 %v9675_v9, %v6605_v45  ;;  %v6603_v5 = vadd.f32 %v6484_v51, %v5923_v6  ;;  %v5926_v20 = vadd.f32 %v8120_v17, %v9654_v58 }
 0x2c4   : > { %v6799_v12 = vmul.f32 0.1, %v6751_v1  ;;  %v5807_v14 = vpop.f32.mrf.mxu1  ;;  %v6487_v26 = vpop.f32.mrf.mxu0 }
 0x2c5   : > { %6897 = vst [vmem:[%s8821_s9 + $0x138] sm:$0xff] %v6849_v62  ;;  %v6804_v13 = vmul.f32 0.1, %v6756_v8  ;;  %v6754_v48 = vadd.f32 %v9675_v9, %v6603_v5  ;;  %v6606_v43 = vadd.f32 %v8184_v4, %v5926_v20  ;;  %v5924_v16 = vadd.f32 %v5807_v14, %v9657_v33 }
 0x2c6   : > { %v6847_v24 = vmax.f32 %v6751_v1, %v6799_v12  ;;  %v8123_v29 = vpop.f32.mrf.mxu1  ;;  %v8187_v10 = vpop.f32.mrf.mxu0 }
 0x2c7   : > { %v6852_v53 = vmax.f32 %v6756_v8, %v6804_v13  ;;  %v6802_v19 = vmul.f32 0.1, %v6754_v48  ;;  %v6757_v58 = vadd.f32 %v9675_v9, %v6606_v43  ;;  %v6604_v0 = vadd.f32 %v6487_v26, %v5924_v16 }
 0x2c8   : > { %6895 = vst [vmem:[%s8821_s9 + $0x128] sm:$0xff] %v6847_v24  ;;  %v5929_v59 = vadd.f32 %v8123_v29, %v9660_v41  ;;  %v5820_v3 = vpop.f32.mrf.mxu1  ;;  %v6500_v37 = vpop.f32.mrf.mxu0 }
 0x2c9   : > { %6900 = vst [vmem:[%s8821_s9 + $0x150] sm:$0xff] %v6852_v53  ;;  %v6850_v55 = vmax.f32 %v6754_v48, %v6802_v19  ;;  %v6805_v44 = vmul.f32 0.1, %v6757_v58  ;;  %v6755_v33 = vadd.f32 %v9675_v9, %v6604_v0  ;;  %v5927_v27 = vadd.f32 %v5820_v3, %v9945_v28 }
 0x2ca   : > { %v6609_v31 = vadd.f32 %v8187_v10, %v5929_v59  ;;  %v8124_v39 = vpop.f32.mrf.mxu1  ;;  %v8188_v21 = vpop.f32.mrf.mxu0 }
 0x2cb   : > { %6898 = vst [vmem:[%s8821_s9 + $0x140] sm:$0xff] %v6850_v55  ;;  %v6853_v2 = vmax.f32 %v6757_v58, %v6805_v44  ;;  %v6803_v15 = vmul.f32 0.1, %v6755_v33  ;;  %v6607_v35 = vadd.f32 %v6500_v37, %v5927_v27  ;;  %v5930_v41 = vadd.f32 %v8124_v39, %v9946_v54 }
 0x2cc   : > { %v6760_v38 = vadd.f32 %v9675_v9, %v6609_v31  ;;  %v5823_v7 = vpop.f32.mrf.mxu1  ;;  %v6503_v36 = vpop.f32.mrf.mxu0 }
 0x2cd   : > { %6901 = vst [vmem:[%s8821_s9 + $0x158] sm:$0xff] %v6853_v2  ;;  %v6851_v63 = vmax.f32 %v6755_v33, %v6803_v15  ;;  %v6758_v11 = vadd.f32 %v9675_v9, %v6607_v35  ;;  %v6610_v25 = vadd.f32 %v8188_v21, %v5930_v41  ;;  %v5928_v34 = vadd.f32 %v5823_v7, %v9947_v61 }
 0x2ce   : > { %v6808_v40 = vmul.f32 0.1, %v6760_v38 }
 0x2cf   : > { %6899 = vst [vmem:[%s8821_s9 + $0x148] sm:$0xff] %v6851_v63  ;;  %v6806_v57 = vmul.f32 0.1, %v6758_v11  ;;  %v6761_v60 = vadd.f32 %v9675_v9, %v6610_v25  ;;  %v6608_v52 = vadd.f32 %v6503_v36, %v5928_v34 }
 0x2d0   : > { %v6856_v18 = vmax.f32 %v6760_v38, %v6808_v40 }
 0x2d1   : > { %v6854_v30 = vmax.f32 %v6758_v11, %v6806_v57  ;;  %v6809_v56 = vmul.f32 0.1, %v6761_v60  ;;  %v6759_v49 = vadd.f32 %v9675_v9, %v6608_v52 }
 0x2d2   : > { %6904 = vst [vmem:[%s8821_s9 + $0x170] sm:$0xff] %v6856_v18 }
 0x2d3   : > { %6902 = vst [vmem:[%s8821_s9 + $0x160] sm:$0xff] %v6854_v30  ;;  %v6857_v50 = vmax.f32 %v6761_v60, %v6809_v56  ;;  %v6807_v46 = vmul.f32 0.1, %v6759_v49 }
 0x2d5   : > { %6905 = vst [vmem:[%s8821_s9 + $0x178] sm:$0xff] %v6857_v50  ;;  %v6855_v47 = vmax.f32 %v6759_v49, %v6807_v46 }
 0x2d7   : > { %6903 = vst [vmem:[%s8821_s9 + $0x168] sm:$0xff] %v6855_v47 }
 0x2d8   : > { %8634 = shalt.err (!%p8631_p0)
}
 0x2d9   : > { %s8635_s8 = scalar_lea.hbm %s9823_s26, 6144  ;;  %s8639_s6 = scalar_lea.hbm %s9879_s3, 12288 }
 0x2da   : > { %p8636_p1 = scmp.ne.s32.totalorder %s9823_s26, %s8635_s8  ;;  %p8640_p5 = scmp.lt.s32.totalorder %s9823_s26, %s9879_s3 }
 0x2db   : > { %p8641_p6 = scmp.lt.s32.totalorder %s8639_s6, %s8635_s8 }
 0x2dc   : > { %p8637_p2 = pnand %p8636_p1, %p8772_p4 }
 0x2dd   : > { %p8642_p7 = por %p8641_p6, %p8640_p5 }
 0x2de   : > { %p8638_p3 = pneg %p8637_p2 }
 0x2e0   : > { %p8643_p9 = pnand %p8642_p7, %p8638_p3 }
 0x2e2   : > { %8646 = shalt.err (!%p8643_p9)
}
 0x2e3   : > { %s8710_s10 = smov 128   ;;  %s8711_s11 = smov 8  }
 0x2e4   : > { %8210 = dma.vmem_to_hbm [thread:$0]  (%p8772_p4), %s9825_s19, 6144, %s9823_s26, %s9831_s15, %s8710_s10, %s8710_s10, %s8711_s11  }
 0x2e5 PF: > { %p8222_p10 = scmp.ge.s32.totalorder %s8703_s17, 2  ;;  %s6936_s18 = sand.u32 1, %s8683_s12  }
 0x2e6   : > { %s6937_s21 = scalar_lea.sflag [#allocation7], %s6936_s18 }
 0x2e7   : > { %p8217_p11 = pnand %p8222_p10, %p8779_p8 }
 0x2e9   : > { %p8218_p12 = pneg %p8217_p11 }
 0x2eb   : > { %8678 = dma.done.wait (%p8218_p12), %s6937_s21, 6144  }
 0x2ec   : > { %8680 = vsyncadd (%p8218_p12), %s6937_s21, 4294961152  ;;  %s17_s17 = sadd.s32 1, %s8703_s17   ;;  %s9948_s12 = smov %s8687_s13 }
 0x2ed   : > { %p14_p13 = scmp.ge.s32.totalorder %s17_s17, 4   ;;  %s9949_s13 = smov %s8691_s14 }
 0x2ee   : > { %s9950_s14 = smov %s8785_s25  ;;  %s9951_s15 = smov %s8699_s16 }
 0x2ef   : > { %s9952_s16 = smov %s9954_s20  ;;  %16 = sbr.rel (!%p14_p13) target bundleno = 5 (0x5), region = 82 }
 0x2f4   :  { %6942 = vsyncpa [#allocation6], 1 }
 0x2f5   :  { %6944 = vsyncpa [#allocation6 + $0x1], 1 }
 0x2f6   :  { %6945 = vsyncpa [#allocation7], 1 }
 0x2f7   :  { %6947 = vsyncpa [#allocation7 + $0x1], 1 }
 0x2f8   :  { %6948 = vsyncmov [#allocation4] }
 0x2fb   :  { %s6949_s22 = vpop.sfrf %6948 }
 0x2fc   :  { %p7323_p4 = scmp.ne.s32.totalorder %s6949_s22, 0 }
 0x2fe   :  { %6953 = shalt.err (%p7323_p4)  }

</bundles_post_ra>
